<compile_context>
chip_gen: v7x
topology: tpu7x:2x2x1
jax: 0.10.0
libtpu: 0.0.40
codegen_flags: <defaults>
</compile_context>

<pallas_src>
import functools

import jax
import jax.numpy as jnp
from jax.experimental import pallas as pl
from jax.experimental.pallas import tpu as pltpu


def _round_up(v, m):
    return (v + m - 1) // m * m


# ------------------------------ fused kernel ------------------------------- #

def _fused_drb_kernel(x_ref, mask_ref, *refs, H, W, margin, c0, layer_meta,
                      zero_rows, residual_beta, negative_slope):
    """refs = (w_0..w_4, b_0..b_4, o_ref, acts_scratch).

    layer_meta: tuple of (cin_pad, cout, write_row) per layer (write_row = -1
    for the last layer, whose output is not appended to the stack).
    zero_rows:  tuple of (row_start, n_rows) alignment-padding rows that must
    stay zero (their weight columns are zero, but garbage could be NaN/Inf).
    """
    n_layers = len(layer_meta)
    w_refs = refs[:n_layers]                    # each (9, Cout_i, Cin_pad_i) bf16
    b_refs = refs[n_layers:2 * n_layers]        # each (Cout_i, 1) f32
    o_ref = refs[2 * n_layers]                  # (1, C0, L)
    a_ref = refs[2 * n_layers + 1]              # (c_max, L + 2*margin) bf16

    Wp = W + 2
    L = (H + 2) * Wp
    # tap t = kh*3 + kw  ->  flat lane offset (kh-1)*Wp + (kw-1)
    taps = [(kh - 1) * Wp + (kw - 1) for kh in range(3) for kw in range(3)]

    # Re-zero only the guard regions (cheap).  Done every grid step so the
    # kernel stays correct under megacore grid sharding, where program_id==0
    # may never execute on a given core.
    a_ref[:, 0:margin] = jnp.zeros((a_ref.shape[0], margin), jnp.bfloat16)
    a_ref[:, margin + L:2 * margin + L] = jnp.zeros(
        (a_ref.shape[0], margin), jnp.bfloat16)
    for (r0, nrow) in zero_rows:
        a_ref[r0:r0 + nrow, :] = jnp.zeros((nrow, a_ref.shape[1]), jnp.bfloat16)

    x_f32 = x_ref[0].astype(jnp.float32)        # (C0, L); pad ring already zero
    mask = mask_ref[...]                        # (1, L) f32, 1.0 on interior
    a_ref[0:c0, margin:margin + L] = x_f32.astype(jnp.bfloat16)

    out = None
    for i, (cin_pad, cout, wrow) in enumerate(layer_meta):
        # Bias-initialized f32 accumulator, then 9 lane-shifted MXU matmuls.
        acc = jnp.broadcast_to(b_refs[i][...], (cout, L))
        for t, off in enumerate(taps):
            lhs = w_refs[i][t]                                      # (Cout, Cin_pad) bf16
            rhs = a_ref[0:cin_pad, margin + off:margin + off + L]   # (Cin_pad, L) bf16
            acc = acc + jnp.dot(lhs, rhs, preferred_element_type=jnp.float32)
        if i < n_layers - 1:
            acc = jnp.where(acc >= 0.0, acc, negative_slope * acc)  # LeakyReLU(0.2)
            # Zero the pad ring, append to the stack (virtual channel concat).
            a_ref[wrow:wrow + cout, margin:margin + L] = (acc * mask).astype(jnp.bfloat16)
        out = acc

    # Fused residual epilogue (last layer has no activation).
    o_ref[0] = (residual_beta * out + x_f32).astype(o_ref.dtype)


# ----------------------- DenseResidualBlock forward ------------------------ #

def dense_residual_block(x_nchw, params, residual_beta=0.2, negative_slope=0.2):
    """params: list of 5 (w_oihw (Cout,Cin,3,3), b (Cout,)).  NCHW in/out."""
    N, C0, H, W = x_nchw.shape
    Hp, Wp = H + 2, W + 2
    L = Hp * Wp
    margin = _round_up(Wp + 1, 128)             # lane-aligned guard band >= Wp+1
    channels = params[0][0].shape[0]
    n_layers = len(params)

    ALIGN = 8                                   # sublane alignment of stack rows
    c0_pad = _round_up(C0, ALIGN)
    ch_pad = _round_up(channels, ALIGN)
    c_max = c0_pad + (n_layers - 1) * ch_pad

    # Zero-padded, spatially flattened input: (N, C0, (H+2)*(W+2)).
    x_pad = jnp.pad(x_nchw, ((0, 0), (0, 0), (1, 1), (1, 1))).reshape(N, C0, L)
    # Interior mask: 1.0 inside the original HxW window, 0.0 on the pad ring.
    interior = jnp.pad(jnp.ones((H, W), jnp.float32), ((1, 1), (1, 1))).reshape(1, L)

    # Per-layer per-tap weights (9, Cout, Cin_pad) bf16, with zero columns for
    # the stack's sublane-alignment padding rows, plus (Cout, 1) f32 biases.
    w_taps, biases, layer_meta = [], [], []
    for i, (w, b) in enumerate(params):
        cout, cin = w.shape[0], w.shape[1]
        wt = jnp.transpose(w, (2, 3, 0, 1)).reshape(9, cout, cin)
        segs = [jnp.pad(wt[:, :, :C0], ((0, 0), (0, 0), (0, c0_pad - C0)))]
        for j in range(i):
            seg = wt[:, :, C0 + j * channels:C0 + (j + 1) * channels]
            segs.append(jnp.pad(seg, ((0, 0), (0, 0), (0, ch_pad - channels))))
        w_taps.append(jnp.concatenate(segs, axis=2).astype(jnp.bfloat16))
        biases.append(b.reshape(cout, 1).astype(jnp.float32))
        cin_pad = c0_pad + i * ch_pad
        wrow = c0_pad + i * ch_pad if i < n_layers - 1 else -1
        layer_meta.append((cin_pad, cout, wrow))

    # Alignment-padding rows of the stack (must stay zero; cheap to re-zero).
    zero_rows = []
    if c0_pad > C0:
        zero_rows.append((C0, c0_pad - C0))
    if ch_pad > channels:
        for j in range(n_layers - 1):
            zero_rows.append((c0_pad + j * ch_pad + channels, ch_pad - channels))

    kernel = functools.partial(
        _fused_drb_kernel, H=H, W=W, margin=margin, c0=C0,
        layer_meta=tuple(layer_meta), zero_rows=tuple(zero_rows),
        residual_beta=residual_beta, negative_slope=negative_slope)

    in_specs = [pl.BlockSpec((1, C0, L), lambda n: (n, 0, 0)),
                pl.BlockSpec((1, L), lambda n: (0, 0))]
    in_specs += [pl.BlockSpec(w.shape, lambda n: (0, 0, 0)) for w in w_taps]
    in_specs += [pl.BlockSpec(b.shape, lambda n: (0, 0)) for b in biases]

    out = pl.pallas_call(
        kernel,
        out_shape=jax.ShapeDtypeStruct((N, C0, L), x_nchw.dtype),
        grid=(N,),
        in_specs=in_specs,
        out_specs=pl.BlockSpec((1, C0, L), lambda n: (n, 0, 0)),
        scratch_shapes=[pltpu.VMEM((c_max, L + 2 * margin), jnp.bfloat16)],
        compiler_params=pltpu.CompilerParams(
            dimension_semantics=("parallel",),
            vmem_limit_bytes=48 * 1024 * 1024),
    )(x_pad, interior, *w_taps, *biases)

    # Already NCHW; just crop the pad ring.
    return out.reshape(N, C0, Hp, Wp)[:, :, 1:-1, 1:-1]


# ------------------------- pure-JAX reference ------------------------------ #

def _conv3x3_ref(x, w, b, use_act, negative_slope=0.2):
    out = jax.lax.conv_general_dilated(
        x, w, window_strides=(1, 1), padding=((1, 1), (1, 1)),
        dimension_numbers=('NCHW', 'OIHW', 'NCHW'))
    out = out + b[None, :, None, None]
    if use_act:
        out = jnp.where(out >= 0.0, out, negative_slope * out)
    return out


def dense_residual_block_ref(x, params, residual_beta=0.2):
    new_inputs = x
    out = None
    for i, (w, b) in enumerate(params):
        out = _conv3x3_ref(new_inputs, w, b, use_act=(i <= 3))
        new_inputs = jnp.concatenate([new_inputs, out], axis=1)
    return residual_beta * out + x


# --------------------------------- main ------------------------------------ #

if __name__ == "__main__":
    in_channels, channels = 4, 8          # DenseResidualBlock(in_channels=4, channels=8)
    N, H, W = 2, 16, 16

    key = jax.random.PRNGKey(0)
    key, kx = jax.random.split(key)
    x_nchw = jax.random.normal(kx, (N, in_channels, H, W), dtype=jnp.float32)

    # Deterministic synthetic parameters (nn.Conv2d layout: OIHW).
    params = []
    for i in range(5):
        cin = in_channels + channels * i
        cout = channels if i <= 3 else in_channels
        key, kw, kb = jax.random.split(key, 3)
        bound = 1.0 / (cin * 9) ** 0.5     # kaiming-uniform-style bound
        w = jax.random.uniform(kw, (cout, cin, 3, 3), jnp.float32, -bound, bound)
        b = jax.random.uniform(kb, (cout,), jnp.float32, -bound, bound)
        params.append((w, b))

    y = dense_residual_block(x_nchw, params, residual_beta=0.2)
    y = jax.block_until_ready(y)

    y_ref = dense_residual_block_ref(x_nchw, params, residual_beta=0.2)
    assert y.shape == x_nchw.shape, (y.shape, x_nchw.shape)
    # bf16 MXU inputs with f32 accumulation -> loosened tolerance vs. f32 ref.
    max_err = jnp.max(jnp.abs(y - y_ref))
    assert jnp.allclose(y, y_ref, atol=3e-2, rtol=3e-2), f"mismatch, max err {max_err}"

    print("KERNEL_OK")
</pallas_src>

<mosaic_0001>
module attributes {stable_mosaic.version = 11 : i64} {
  func.func @_fused_drb_kernel(%arg0: i32, %arg1: memref<1x4x324xf32, #tpu.memory_space<vmem>>, %arg2: memref<1x324xf32, #tpu.memory_space<vmem>>, %arg3: memref<9x8x8xbf16, #tpu.memory_space<vmem>>, %arg4: memref<9x8x16xbf16, #tpu.memory_space<vmem>>, %arg5: memref<9x8x24xbf16, #tpu.memory_space<vmem>>, %arg6: memref<9x8x32xbf16, #tpu.memory_space<vmem>>, %arg7: memref<9x4x40xbf16, #tpu.memory_space<vmem>>, %arg8: memref<8x1xf32, #tpu.memory_space<vmem>>, %arg9: memref<8x1xf32, #tpu.memory_space<vmem>>, %arg10: memref<8x1xf32, #tpu.memory_space<vmem>>, %arg11: memref<8x1xf32, #tpu.memory_space<vmem>>, %arg12: memref<4x1xf32, #tpu.memory_space<vmem>>, %arg13: memref<1x4x324xf32, #tpu.memory_space<vmem>>, %arg14: memref<40x580xbf16, #tpu.memory_space<vmem>>) attributes {dimension_semantics = [#tpu.dimension_semantics<parallel>], iteration_bounds = array<i64: 2>, scalar_prefetch = 0 : i64, scratch_operands = 1 : i64, tpu.core_type = #tpu.core_type<tc>, window_params = [{transform_indices = @transform_0, window_bounds = array<i64: 1, 4, 324>}, {pipeline_mode = #tpu.pipeline_mode<synchronous>, transform_indices = @transform_1, window_bounds = array<i64: 1, 324>}, {pipeline_mode = #tpu.pipeline_mode<synchronous>, transform_indices = @transform_2, window_bounds = array<i64: 9, 8, 8>}, {pipeline_mode = #tpu.pipeline_mode<synchronous>, transform_indices = @transform_3, window_bounds = array<i64: 9, 8, 16>}, {pipeline_mode = #tpu.pipeline_mode<synchronous>, transform_indices = @transform_4, window_bounds = array<i64: 9, 8, 24>}, {pipeline_mode = #tpu.pipeline_mode<synchronous>, transform_indices = @transform_5, window_bounds = array<i64: 9, 8, 32>}, {pipeline_mode = #tpu.pipeline_mode<synchronous>, transform_indices = @transform_6, window_bounds = array<i64: 9, 4, 40>}, {pipeline_mode = #tpu.pipeline_mode<synchronous>, transform_indices = @transform_7, window_bounds = array<i64: 8, 1>}, {pipeline_mode = #tpu.pipeline_mode<synchronous>, transform_indices = @transform_8, window_bounds = array<i64: 8, 1>}, {pipeline_mode = #tpu.pipeline_mode<synchronous>, transform_indices = @transform_9, window_bounds = array<i64: 8, 1>}, {pipeline_mode = #tpu.pipeline_mode<synchronous>, transform_indices = @transform_10, window_bounds = array<i64: 8, 1>}, {pipeline_mode = #tpu.pipeline_mode<synchronous>, transform_indices = @transform_11, window_bounds = array<i64: 4, 1>}, {transform_indices = @transform_12, window_bounds = array<i64: 1, 4, 324>}]} {
    %cst = arith.constant 0.000000e+00 : bf16
    %0 = vector.broadcast %cst : bf16 to vector<40x128xbf16>
    %c0 = arith.constant 0 : index
    %c0_0 = arith.constant 0 : index
    %1 = vector.load %arg14[%c0, %c0_0] : memref<40x580xbf16, #tpu.memory_space<vmem>>, vector<40x128xbf16>
    tpu.vector_store %arg14[%c0, %c0_0], %0 {strides = array<i32>} : memref<40x580xbf16, #tpu.memory_space<vmem>>, vector<40x128xbf16>,
    %cst_1 = arith.constant 0.000000e+00 : bf16
    %2 = vector.broadcast %cst_1 : bf16 to vector<40x128xbf16>
    %c0_2 = arith.constant 0 : index
    %c452 = arith.constant 452 : index
    %3 = vector.load %arg14[%c0_2, %c452] : memref<40x580xbf16, #tpu.memory_space<vmem>>, vector<40x128xbf16>
    tpu.vector_store %arg14[%c0_2, %c452], %2 {strides = array<i32>} : memref<40x580xbf16, #tpu.memory_space<vmem>>, vector<40x128xbf16>,
    %cst_3 = arith.constant 0.000000e+00 : bf16
    %4 = vector.broadcast %cst_3 : bf16 to vector<4x580xbf16>
    %c4 = arith.constant 4 : index
    %c0_4 = arith.constant 0 : index
    %5 = vector.load %arg14[%c4, %c0_4] : memref<40x580xbf16, #tpu.memory_space<vmem>>, vector<4x580xbf16>
    tpu.vector_store %arg14[%c4, %c0_4], %4 {strides = array<i32>} : memref<40x580xbf16, #tpu.memory_space<vmem>>, vector<4x580xbf16>,
    %c0_5 = arith.constant 0 : index
    %c0_6 = arith.constant 0 : index
    %c0_7 = arith.constant 0 : index
    %6 = vector.load %arg1[%c0_5, %c0_6, %c0_7] : memref<1x4x324xf32, #tpu.memory_space<vmem>>, vector<1x4x324xf32>
    %7 = vector.shape_cast %6 : vector<1x4x324xf32> to vector<4x324xf32>
    %c0_8 = arith.constant 0 : index
    %c0_9 = arith.constant 0 : index
    %8 = vector.load %arg2[%c0_8, %c0_9] : memref<1x324xf32, #tpu.memory_space<vmem>>, vector<1x324xf32>
    %9 = arith.truncf %7 : vector<4x324xf32> to vector<4x324xbf16>
    %c0_10 = arith.constant 0 : index
    %c128 = arith.constant 128 : index
    %10 = vector.load %arg14[%c0_10, %c128] : memref<40x580xbf16, #tpu.memory_space<vmem>>, vector<4x324xbf16>
    tpu.vector_store %arg14[%c0_10, %c128], %9 {strides = array<i32>} : memref<40x580xbf16, #tpu.memory_space<vmem>>, vector<4x324xbf16>,
    %c0_11 = arith.constant 0 : index
    %c0_12 = arith.constant 0 : index
    %11 = vector.load %arg8[%c0_11, %c0_12] : memref<8x1xf32, #tpu.memory_space<vmem>>, vector<8x1xf32>
    %12 = vector.shape_cast %11 : vector<8x1xf32> to vector<8x1xf32>
    %13 = vector.broadcast %12 : vector<8x1xf32> to vector<8x324xf32>
    %c0_13 = arith.constant 0 : index
    %c0_14 = arith.constant 0 : index
    %c0_15 = arith.constant 0 : index
    %14 = vector.load %arg3[%c0_13, %c0_14, %c0_15] : memref<9x8x8xbf16, #tpu.memory_space<vmem>>, vector<1x8x8xbf16>
    %15 = vector.shape_cast %14 : vector<1x8x8xbf16> to vector<8x8xbf16>
    %c0_16 = arith.constant 0 : index
    %c109 = arith.constant 109 : index
    %16 = vector.load %arg14[%c0_16, %c109] : memref<40x580xbf16, #tpu.memory_space<vmem>>, vector<8x324xbf16>
    %cst_17 = arith.constant dense<0.000000e+00> : vector<8x324xf32>
    %17 = tpu.matmul %15, %16, %cst_17 {dimension_numbers = #tpu.dot_dimension_numbers<[1], [0], [0], [1], [0, 0, 1, 1], [], []>} : vector<8x8xbf16>, vector<8x324xbf16>, vector<8x324xf32> -> vector<8x324xf32>
    %18 = arith.addf %13, %17 : vector<8x324xf32>
    %c1 = arith.constant 1 : index
    %c0_18 = arith.constant 0 : index
    %c0_19 = arith.constant 0 : index
    %19 = vector.load %arg3[%c1, %c0_18, %c0_19] : memref<9x8x8xbf16, #tpu.memory_space<vmem>>, vector<1x8x8xbf16>
    %20 = vector.shape_cast %19 : vector<1x8x8xbf16> to vector<8x8xbf16>
    %c0_20 = arith.constant 0 : index
    %c110 = arith.constant 110 : index
    %21 = vector.load %arg14[%c0_20, %c110] : memref<40x580xbf16, #tpu.memory_space<vmem>>, vector<8x324xbf16>
    %cst_21 = arith.constant dense<0.000000e+00> : vector<8x324xf32>
    %22 = tpu.matmul %20, %21, %cst_21 {dimension_numbers = #tpu.dot_dimension_numbers<[1], [0], [0], [1], [0, 0, 1, 1], [], []>} : vector<8x8xbf16>, vector<8x324xbf16>, vector<8x324xf32> -> vector<8x324xf32>
    %23 = arith.addf %18, %22 : vector<8x324xf32>
    %c2 = arith.constant 2 : index
    %c0_22 = arith.constant 0 : index
    %c0_23 = arith.constant 0 : index
    %24 = vector.load %arg3[%c2, %c0_22, %c0_23] : memref<9x8x8xbf16, #tpu.memory_space<vmem>>, vector<1x8x8xbf16>
    %25 = vector.shape_cast %24 : vector<1x8x8xbf16> to vector<8x8xbf16>
    %c0_24 = arith.constant 0 : index
    %c111 = arith.constant 111 : index
    %26 = vector.load %arg14[%c0_24, %c111] : memref<40x580xbf16, #tpu.memory_space<vmem>>, vector<8x324xbf16>
    %cst_25 = arith.constant dense<0.000000e+00> : vector<8x324xf32>
    %27 = tpu.matmul %25, %26, %cst_25 {dimension_numbers = #tpu.dot_dimension_numbers<[1], [0], [0], [1], [0, 0, 1, 1], [], []>} : vector<8x8xbf16>, vector<8x324xbf16>, vector<8x324xf32> -> vector<8x324xf32>
    %28 = arith.addf %23, %27 : vector<8x324xf32>
    %c3 = arith.constant 3 : index
    %c0_26 = arith.constant 0 : index
    %c0_27 = arith.constant 0 : index
    %29 = vector.load %arg3[%c3, %c0_26, %c0_27] : memref<9x8x8xbf16, #tpu.memory_space<vmem>>, vector<1x8x8xbf16>
    %30 = vector.shape_cast %29 : vector<1x8x8xbf16> to vector<8x8xbf16>
    %c0_28 = arith.constant 0 : index
    %c127 = arith.constant 127 : index
    %31 = vector.load %arg14[%c0_28, %c127] : memref<40x580xbf16, #tpu.memory_space<vmem>>, vector<8x324xbf16>
    %cst_29 = arith.constant dense<0.000000e+00> : vector<8x324xf32>
    %32 = tpu.matmul %30, %31, %cst_29 {dimension_numbers = #tpu.dot_dimension_numbers<[1], [0], [0], [1], [0, 0, 1, 1], [], []>} : vector<8x8xbf16>, vector<8x324xbf16>, vector<8x324xf32> -> vector<8x324xf32>
    %33 = arith.addf %28, %32 : vector<8x324xf32>
    %c4_30 = arith.constant 4 : index
    %c0_31 = arith.constant 0 : index
    %c0_32 = arith.constant 0 : index
    %34 = vector.load %arg3[%c4_30, %c0_31, %c0_32] : memref<9x8x8xbf16, #tpu.memory_space<vmem>>, vector<1x8x8xbf16>
    %35 = vector.shape_cast %34 : vector<1x8x8xbf16> to vector<8x8xbf16>
    %c0_33 = arith.constant 0 : index
    %c128_34 = arith.constant 128 : index
    %36 = vector.load %arg14[%c0_33, %c128_34] : memref<40x580xbf16, #tpu.memory_space<vmem>>, vector<8x324xbf16>
    %cst_35 = arith.constant dense<0.000000e+00> : vector<8x324xf32>
    %37 = tpu.matmul %35, %36, %cst_35 {dimension_numbers = #tpu.dot_dimension_numbers<[1], [0], [0], [1], [0, 0, 1, 1], [], []>} : vector<8x8xbf16>, vector<8x324xbf16>, vector<8x324xf32> -> vector<8x324xf32>
    %38 = arith.addf %33, %37 : vector<8x324xf32>
    %c5 = arith.constant 5 : index
    %c0_36 = arith.constant 0 : index
    %c0_37 = arith.constant 0 : index
    %39 = vector.load %arg3[%c5, %c0_36, %c0_37] : memref<9x8x8xbf16, #tpu.memory_space<vmem>>, vector<1x8x8xbf16>
    %40 = vector.shape_cast %39 : vector<1x8x8xbf16> to vector<8x8xbf16>
    %c0_38 = arith.constant 0 : index
    %c129 = arith.constant 129 : index
    %41 = vector.load %arg14[%c0_38, %c129] : memref<40x580xbf16, #tpu.memory_space<vmem>>, vector<8x324xbf16>
    %cst_39 = arith.constant dense<0.000000e+00> : vector<8x324xf32>
    %42 = tpu.matmul %40, %41, %cst_39 {dimension_numbers = #tpu.dot_dimension_numbers<[1], [0], [0], [1], [0, 0, 1, 1], [], []>} : vector<8x8xbf16>, vector<8x324xbf16>, vector<8x324xf32> -> vector<8x324xf32>
    %43 = arith.addf %38, %42 : vector<8x324xf32>
    %c6 = arith.constant 6 : index
    %c0_40 = arith.constant 0 : index
    %c0_41 = arith.constant 0 : index
    %44 = vector.load %arg3[%c6, %c0_40, %c0_41] : memref<9x8x8xbf16, #tpu.memory_space<vmem>>, vector<1x8x8xbf16>
    %45 = vector.shape_cast %44 : vector<1x8x8xbf16> to vector<8x8xbf16>
    %c0_42 = arith.constant 0 : index
    %c145 = arith.constant 145 : index
    %46 = vector.load %arg14[%c0_42, %c145] : memref<40x580xbf16, #tpu.memory_space<vmem>>, vector<8x324xbf16>
    %cst_43 = arith.constant dense<0.000000e+00> : vector<8x324xf32>
    %47 = tpu.matmul %45, %46, %cst_43 {dimension_numbers = #tpu.dot_dimension_numbers<[1], [0], [0], [1], [0, 0, 1, 1], [], []>} : vector<8x8xbf16>, vector<8x324xbf16>, vector<8x324xf32> -> vector<8x324xf32>
    %48 = arith.addf %43, %47 : vector<8x324xf32>
    %c7 = arith.constant 7 : index
    %c0_44 = arith.constant 0 : index
    %c0_45 = arith.constant 0 : index
    %49 = vector.load %arg3[%c7, %c0_44, %c0_45] : memref<9x8x8xbf16, #tpu.memory_space<vmem>>, vector<1x8x8xbf16>
    %50 = vector.shape_cast %49 : vector<1x8x8xbf16> to vector<8x8xbf16>
    %c0_46 = arith.constant 0 : index
    %c146 = arith.constant 146 : index
    %51 = vector.load %arg14[%c0_46, %c146] : memref<40x580xbf16, #tpu.memory_space<vmem>>, vector<8x324xbf16>
    %cst_47 = arith.constant dense<0.000000e+00> : vector<8x324xf32>
    %52 = tpu.matmul %50, %51, %cst_47 {dimension_numbers = #tpu.dot_dimension_numbers<[1], [0], [0], [1], [0, 0, 1, 1], [], []>} : vector<8x8xbf16>, vector<8x324xbf16>, vector<8x324xf32> -> vector<8x324xf32>
    %53 = arith.addf %48, %52 : vector<8x324xf32>
    %c8 = arith.constant 8 : index
    %c0_48 = arith.constant 0 : index
    %c0_49 = arith.constant 0 : index
    %54 = vector.load %arg3[%c8, %c0_48, %c0_49] : memref<9x8x8xbf16, #tpu.memory_space<vmem>>, vector<1x8x8xbf16>
    %55 = vector.shape_cast %54 : vector<1x8x8xbf16> to vector<8x8xbf16>
    %c0_50 = arith.constant 0 : index
    %c147 = arith.constant 147 : index
    %56 = vector.load %arg14[%c0_50, %c147] : memref<40x580xbf16, #tpu.memory_space<vmem>>, vector<8x324xbf16>
    %cst_51 = arith.constant dense<0.000000e+00> : vector<8x324xf32>
    %57 = tpu.matmul %55, %56, %cst_51 {dimension_numbers = #tpu.dot_dimension_numbers<[1], [0], [0], [1], [0, 0, 1, 1], [], []>} : vector<8x8xbf16>, vector<8x324xbf16>, vector<8x324xf32> -> vector<8x324xf32>
    %58 = arith.addf %53, %57 : vector<8x324xf32>
    %cst_52 = arith.constant 0.000000e+00 : f32
    %59 = vector.broadcast %cst_52 : f32 to vector<8x324xf32>
    %60 = arith.cmpf oge, %58, %59 : vector<8x324xf32>
    %cst_53 = arith.constant 2.000000e-01 : f32
    %61 = vector.broadcast %cst_53 : f32 to vector<8x324xf32>
    %62 = arith.mulf %61, %58 : vector<8x324xf32>
    %63 = arith.select %60, %58, %62 : vector<8x324xi1>, vector<8x324xf32>
    %64 = vector.broadcast %8 : vector<1x324xf32> to vector<8x324xf32>
    %65 = arith.mulf %63, %64 : vector<8x324xf32>
    %66 = arith.truncf %65 : vector<8x324xf32> to vector<8x324xbf16>
    %c8_54 = arith.constant 8 : index
    %c128_55 = arith.constant 128 : index
    %67 = vector.load %arg14[%c8_54, %c128_55] : memref<40x580xbf16, #tpu.memory_space<vmem>>, vector<8x324xbf16>
    tpu.vector_store %arg14[%c8_54, %c128_55], %66 {strides = array<i32>} : memref<40x580xbf16, #tpu.memory_space<vmem>>, vector<8x324xbf16>,
    %c0_56 = arith.constant 0 : index
    %c0_57 = arith.constant 0 : index
    %68 = vector.load %arg9[%c0_56, %c0_57] : memref<8x1xf32, #tpu.memory_space<vmem>>, vector<8x1xf32>
    %69 = vector.shape_cast %68 : vector<8x1xf32> to vector<8x1xf32>
    %70 = vector.broadcast %69 : vector<8x1xf32> to vector<8x324xf32>
    %c0_58 = arith.constant 0 : index
    %c0_59 = arith.constant 0 : index
    %c0_60 = arith.constant 0 : index
    %71 = vector.load %arg4[%c0_58, %c0_59, %c0_60] : memref<9x8x16xbf16, #tpu.memory_space<vmem>>, vector<1x8x16xbf16>
    %72 = vector.shape_cast %71 : vector<1x8x16xbf16> to vector<8x16xbf16>
    %c0_61 = arith.constant 0 : index
    %c109_62 = arith.constant 109 : index
    %73 = vector.load %arg14[%c0_61, %c109_62] : memref<40x580xbf16, #tpu.memory_space<vmem>>, vector<16x324xbf16>
    %cst_63 = arith.constant dense<0.000000e+00> : vector<8x324xf32>
    %74 = tpu.matmul %72, %73, %cst_63 {dimension_numbers = #tpu.dot_dimension_numbers<[1], [0], [0], [1], [0, 0, 1, 1], [], []>} : vector<8x16xbf16>, vector<16x324xbf16>, vector<8x324xf32> -> vector<8x324xf32>
    %75 = arith.addf %70, %74 : vector<8x324xf32>
    %c1_64 = arith.constant 1 : index
    %c0_65 = arith.constant 0 : index
    %c0_66 = arith.constant 0 : index
    %76 = vector.load %arg4[%c1_64, %c0_65, %c0_66] : memref<9x8x16xbf16, #tpu.memory_space<vmem>>, vector<1x8x16xbf16>
    %77 = vector.shape_cast %76 : vector<1x8x16xbf16> to vector<8x16xbf16>
    %c0_67 = arith.constant 0 : index
    %c110_68 = arith.constant 110 : index
    %78 = vector.load %arg14[%c0_67, %c110_68] : memref<40x580xbf16, #tpu.memory_space<vmem>>, vector<16x324xbf16>
    %cst_69 = arith.constant dense<0.000000e+00> : vector<8x324xf32>
    %79 = tpu.matmul %77, %78, %cst_69 {dimension_numbers = #tpu.dot_dimension_numbers<[1], [0], [0], [1], [0, 0, 1, 1], [], []>} : vector<8x16xbf16>, vector<16x324xbf16>, vector<8x324xf32> -> vector<8x324xf32>
    %80 = arith.addf %75, %79 : vector<8x324xf32>
    %c2_70 = arith.constant 2 : index
    %c0_71 = arith.constant 0 : index
    %c0_72 = arith.constant 0 : index
    %81 = vector.load %arg4[%c2_70, %c0_71, %c0_72] : memref<9x8x16xbf16, #tpu.memory_space<vmem>>, vector<1x8x16xbf16>
    %82 = vector.shape_cast %81 : vector<1x8x16xbf16> to vector<8x16xbf16>
    %c0_73 = arith.constant 0 : index
    %c111_74 = arith.constant 111 : index
    %83 = vector.load %arg14[%c0_73, %c111_74] : memref<40x580xbf16, #tpu.memory_space<vmem>>, vector<16x324xbf16>
    %cst_75 = arith.constant dense<0.000000e+00> : vector<8x324xf32>
    %84 = tpu.matmul %82, %83, %cst_75 {dimension_numbers = #tpu.dot_dimension_numbers<[1], [0], [0], [1], [0, 0, 1, 1], [], []>} : vector<8x16xbf16>, vector<16x324xbf16>, vector<8x324xf32> -> vector<8x324xf32>
    %85 = arith.addf %80, %84 : vector<8x324xf32>
    %c3_76 = arith.constant 3 : index
    %c0_77 = arith.constant 0 : index
    %c0_78 = arith.constant 0 : index
    %86 = vector.load %arg4[%c3_76, %c0_77, %c0_78] : memref<9x8x16xbf16, #tpu.memory_space<vmem>>, vector<1x8x16xbf16>
    %87 = vector.shape_cast %86 : vector<1x8x16xbf16> to vector<8x16xbf16>
    %c0_79 = arith.constant 0 : index
    %c127_80 = arith.constant 127 : index
    %88 = vector.load %arg14[%c0_79, %c127_80] : memref<40x580xbf16, #tpu.memory_space<vmem>>, vector<16x324xbf16>
    %cst_81 = arith.constant dense<0.000000e+00> : vector<8x324xf32>
    %89 = tpu.matmul %87, %88, %cst_81 {dimension_numbers = #tpu.dot_dimension_numbers<[1], [0], [0], [1], [0, 0, 1, 1], [], []>} : vector<8x16xbf16>, vector<16x324xbf16>, vector<8x324xf32> -> vector<8x324xf32>
    %90 = arith.addf %85, %89 : vector<8x324xf32>
    %c4_82 = arith.constant 4 : index
    %c0_83 = arith.constant 0 : index
    %c0_84 = arith.constant 0 : index
    %91 = vector.load %arg4[%c4_82, %c0_83, %c0_84] : memref<9x8x16xbf16, #tpu.memory_space<vmem>>, vector<1x8x16xbf16>
    %92 = vector.shape_cast %91 : vector<1x8x16xbf16> to vector<8x16xbf16>
    %c0_85 = arith.constant 0 : index
    %c128_86 = arith.constant 128 : index
    %93 = vector.load %arg14[%c0_85, %c128_86] : memref<40x580xbf16, #tpu.memory_space<vmem>>, vector<16x324xbf16>
    %cst_87 = arith.constant dense<0.000000e+00> : vector<8x324xf32>
    %94 = tpu.matmul %92, %93, %cst_87 {dimension_numbers = #tpu.dot_dimension_numbers<[1], [0], [0], [1], [0, 0, 1, 1], [], []>} : vector<8x16xbf16>, vector<16x324xbf16>, vector<8x324xf32> -> vector<8x324xf32>
    %95 = arith.addf %90, %94 : vector<8x324xf32>
    %c5_88 = arith.constant 5 : index
    %c0_89 = arith.constant 0 : index
    %c0_90 = arith.constant 0 : index
    %96 = vector.load %arg4[%c5_88, %c0_89, %c0_90] : memref<9x8x16xbf16, #tpu.memory_space<vmem>>, vector<1x8x16xbf16>
    %97 = vector.shape_cast %96 : vector<1x8x16xbf16> to vector<8x16xbf16>
    %c0_91 = arith.constant 0 : index
    %c129_92 = arith.constant 129 : index
    %98 = vector.load %arg14[%c0_91, %c129_92] : memref<40x580xbf16, #tpu.memory_space<vmem>>, vector<16x324xbf16>
    %cst_93 = arith.constant dense<0.000000e+00> : vector<8x324xf32>
    %99 = tpu.matmul %97, %98, %cst_93 {dimension_numbers = #tpu.dot_dimension_numbers<[1], [0], [0], [1], [0, 0, 1, 1], [], []>} : vector<8x16xbf16>, vector<16x324xbf16>, vector<8x324xf32> -> vector<8x324xf32>
    %100 = arith.addf %95, %99 : vector<8x324xf32>
    %c6_94 = arith.constant 6 : index
    %c0_95 = arith.constant 0 : index
    %c0_96 = arith.constant 0 : index
    %101 = vector.load %arg4[%c6_94, %c0_95, %c0_96] : memref<9x8x16xbf16, #tpu.memory_space<vmem>>, vector<1x8x16xbf16>
    %102 = vector.shape_cast %101 : vector<1x8x16xbf16> to vector<8x16xbf16>
    %c0_97 = arith.constant 0 : index
    %c145_98 = arith.constant 145 : index
    %103 = vector.load %arg14[%c0_97, %c145_98] : memref<40x580xbf16, #tpu.memory_space<vmem>>, vector<16x324xbf16>
    %cst_99 = arith.constant dense<0.000000e+00> : vector<8x324xf32>
    %104 = tpu.matmul %102, %103, %cst_99 {dimension_numbers = #tpu.dot_dimension_numbers<[1], [0], [0], [1], [0, 0, 1, 1], [], []>} : vector<8x16xbf16>, vector<16x324xbf16>, vector<8x324xf32> -> vector<8x324xf32>
    %105 = arith.addf %100, %104 : vector<8x324xf32>
    %c7_100 = arith.constant 7 : index
    %c0_101 = arith.constant 0 : index
    %c0_102 = arith.constant 0 : index
    %106 = vector.load %arg4[%c7_100, %c0_101, %c0_102] : memref<9x8x16xbf16, #tpu.memory_space<vmem>>, vector<1x8x16xbf16>
    %107 = vector.shape_cast %106 : vector<1x8x16xbf16> to vector<8x16xbf16>
    %c0_103 = arith.constant 0 : index
    %c146_104 = arith.constant 146 : index
    %108 = vector.load %arg14[%c0_103, %c146_104] : memref<40x580xbf16, #tpu.memory_space<vmem>>, vector<16x324xbf16>
    %cst_105 = arith.constant dense<0.000000e+00> : vector<8x324xf32>
    %109 = tpu.matmul %107, %108, %cst_105 {dimension_numbers = #tpu.dot_dimension_numbers<[1], [0], [0], [1], [0, 0, 1, 1], [], []>} : vector<8x16xbf16>, vector<16x324xbf16>, vector<8x324xf32> -> vector<8x324xf32>
    %110 = arith.addf %105, %109 : vector<8x324xf32>
    %c8_106 = arith.constant 8 : index
    %c0_107 = arith.constant 0 : index
    %c0_108 = arith.constant 0 : index
    %111 = vector.load %arg4[%c8_106, %c0_107, %c0_108] : memref<9x8x16xbf16, #tpu.memory_space<vmem>>, vector<1x8x16xbf16>
    %112 = vector.shape_cast %111 : vector<1x8x16xbf16> to vector<8x16xbf16>
    %c0_109 = arith.constant 0 : index
    %c147_110 = arith.constant 147 : index
    %113 = vector.load %arg14[%c0_109, %c147_110] : memref<40x580xbf16, #tpu.memory_space<vmem>>, vector<16x324xbf16>
    %cst_111 = arith.constant dense<0.000000e+00> : vector<8x324xf32>
    %114 = tpu.matmul %112, %113, %cst_111 {dimension_numbers = #tpu.dot_dimension_numbers<[1], [0], [0], [1], [0, 0, 1, 1], [], []>} : vector<8x16xbf16>, vector<16x324xbf16>, vector<8x324xf32> -> vector<8x324xf32>
    %115 = arith.addf %110, %114 : vector<8x324xf32>
    %cst_112 = arith.constant 0.000000e+00 : f32
    %116 = vector.broadcast %cst_112 : f32 to vector<8x324xf32>
    %117 = arith.cmpf oge, %115, %116 : vector<8x324xf32>
    %cst_113 = arith.constant 2.000000e-01 : f32
    %118 = vector.broadcast %cst_113 : f32 to vector<8x324xf32>
    %119 = arith.mulf %118, %115 : vector<8x324xf32>
    %120 = arith.select %117, %115, %119 : vector<8x324xi1>, vector<8x324xf32>
    %121 = vector.broadcast %8 : vector<1x324xf32> to vector<8x324xf32>
    %122 = arith.mulf %120, %121 : vector<8x324xf32>
    %123 = arith.truncf %122 : vector<8x324xf32> to vector<8x324xbf16>
    %c16 = arith.constant 16 : index
    %c128_114 = arith.constant 128 : index
    %124 = vector.load %arg14[%c16, %c128_114] : memref<40x580xbf16, #tpu.memory_space<vmem>>, vector<8x324xbf16>
    tpu.vector_store %arg14[%c16, %c128_114], %123 {strides = array<i32>} : memref<40x580xbf16, #tpu.memory_space<vmem>>, vector<8x324xbf16>,
    %c0_115 = arith.constant 0 : index
    %c0_116 = arith.constant 0 : index
    %125 = vector.load %arg10[%c0_115, %c0_116] : memref<8x1xf32, #tpu.memory_space<vmem>>, vector<8x1xf32>
    %126 = vector.shape_cast %125 : vector<8x1xf32> to vector<8x1xf32>
    %127 = vector.broadcast %126 : vector<8x1xf32> to vector<8x324xf32>
    %c0_117 = arith.constant 0 : index
    %c0_118 = arith.constant 0 : index
    %c0_119 = arith.constant 0 : index
    %128 = vector.load %arg5[%c0_117, %c0_118, %c0_119] : memref<9x8x24xbf16, #tpu.memory_space<vmem>>, vector<1x8x24xbf16>
    %129 = vector.shape_cast %128 : vector<1x8x24xbf16> to vector<8x24xbf16>
    %c0_120 = arith.constant 0 : index
    %c109_121 = arith.constant 109 : index
    %130 = vector.load %arg14[%c0_120, %c109_121] : memref<40x580xbf16, #tpu.memory_space<vmem>>, vector<24x324xbf16>
    %cst_122 = arith.constant dense<0.000000e+00> : vector<8x324xf32>
    %131 = tpu.matmul %129, %130, %cst_122 {dimension_numbers = #tpu.dot_dimension_numbers<[1], [0], [0], [1], [0, 0, 1, 1], [], []>} : vector<8x24xbf16>, vector<24x324xbf16>, vector<8x324xf32> -> vector<8x324xf32>
    %132 = arith.addf %127, %131 : vector<8x324xf32>
    %c1_123 = arith.constant 1 : index
    %c0_124 = arith.constant 0 : index
    %c0_125 = arith.constant 0 : index
    %133 = vector.load %arg5[%c1_123, %c0_124, %c0_125] : memref<9x8x24xbf16, #tpu.memory_space<vmem>>, vector<1x8x24xbf16>
    %134 = vector.shape_cast %133 : vector<1x8x24xbf16> to vector<8x24xbf16>
    %c0_126 = arith.constant 0 : index
    %c110_127 = arith.constant 110 : index
    %135 = vector.load %arg14[%c0_126, %c110_127] : memref<40x580xbf16, #tpu.memory_space<vmem>>, vector<24x324xbf16>
    %cst_128 = arith.constant dense<0.000000e+00> : vector<8x324xf32>
    %136 = tpu.matmul %134, %135, %cst_128 {dimension_numbers = #tpu.dot_dimension_numbers<[1], [0], [0], [1], [0, 0, 1, 1], [], []>} : vector<8x24xbf16>, vector<24x324xbf16>, vector<8x324xf32> -> vector<8x324xf32>
    %137 = arith.addf %132, %136 : vector<8x324xf32>
    %c2_129 = arith.constant 2 : index
    %c0_130 = arith.constant 0 : index
    %c0_131 = arith.constant 0 : index
    %138 = vector.load %arg5[%c2_129, %c0_130, %c0_131] : memref<9x8x24xbf16, #tpu.memory_space<vmem>>, vector<1x8x24xbf16>
    %139 = vector.shape_cast %138 : vector<1x8x24xbf16> to vector<8x24xbf16>
    %c0_132 = arith.constant 0 : index
    %c111_133 = arith.constant 111 : index
    %140 = vector.load %arg14[%c0_132, %c111_133] : memref<40x580xbf16, #tpu.memory_space<vmem>>, vector<24x324xbf16>
    %cst_134 = arith.constant dense<0.000000e+00> : vector<8x324xf32>
    %141 = tpu.matmul %139, %140, %cst_134 {dimension_numbers = #tpu.dot_dimension_numbers<[1], [0], [0], [1], [0, 0, 1, 1], [], []>} : vector<8x24xbf16>, vector<24x324xbf16>, vector<8x324xf32> -> vector<8x324xf32>
    %142 = arith.addf %137, %141 : vector<8x324xf32>
    %c3_135 = arith.constant 3 : index
    %c0_136 = arith.constant 0 : index
    %c0_137 = arith.constant 0 : index
    %143 = vector.load %arg5[%c3_135, %c0_136, %c0_137] : memref<9x8x24xbf16, #tpu.memory_space<vmem>>, vector<1x8x24xbf16>
    %144 = vector.shape_cast %143 : vector<1x8x24xbf16> to vector<8x24xbf16>
    %c0_138 = arith.constant 0 : index
    %c127_139 = arith.constant 127 : index
    %145 = vector.load %arg14[%c0_138, %c127_139] : memref<40x580xbf16, #tpu.memory_space<vmem>>, vector<24x324xbf16>
    %cst_140 = arith.constant dense<0.000000e+00> : vector<8x324xf32>
    %146 = tpu.matmul %144, %145, %cst_140 {dimension_numbers = #tpu.dot_dimension_numbers<[1], [0], [0], [1], [0, 0, 1, 1], [], []>} : vector<8x24xbf16>, vector<24x324xbf16>, vector<8x324xf32> -> vector<8x324xf32>
    %147 = arith.addf %142, %146 : vector<8x324xf32>
    %c4_141 = arith.constant 4 : index
    %c0_142 = arith.constant 0 : index
    %c0_143 = arith.constant 0 : index
    %148 = vector.load %arg5[%c4_141, %c0_142, %c0_143] : memref<9x8x24xbf16, #tpu.memory_space<vmem>>, vector<1x8x24xbf16>
    %149 = vector.shape_cast %148 : vector<1x8x24xbf16> to vector<8x24xbf16>
    %c0_144 = arith.constant 0 : index
    %c128_145 = arith.constant 128 : index
    %150 = vector.load %arg14[%c0_144, %c128_145] : memref<40x580xbf16, #tpu.memory_space<vmem>>, vector<24x324xbf16>
    %cst_146 = arith.constant dense<0.000000e+00> : vector<8x324xf32>
    %151 = tpu.matmul %149, %150, %cst_146 {dimension_numbers = #tpu.dot_dimension_numbers<[1], [0], [0], [1], [0, 0, 1, 1], [], []>} : vector<8x24xbf16>, vector<24x324xbf16>, vector<8x324xf32> -> vector<8x324xf32>
    %152 = arith.addf %147, %151 : vector<8x324xf32>
    %c5_147 = arith.constant 5 : index
    %c0_148 = arith.constant 0 : index
    %c0_149 = arith.constant 0 : index
    %153 = vector.load %arg5[%c5_147, %c0_148, %c0_149] : memref<9x8x24xbf16, #tpu.memory_space<vmem>>, vector<1x8x24xbf16>
    %154 = vector.shape_cast %153 : vector<1x8x24xbf16> to vector<8x24xbf16>
    %c0_150 = arith.constant 0 : index
    %c129_151 = arith.constant 129 : index
    %155 = vector.load %arg14[%c0_150, %c129_151] : memref<40x580xbf16, #tpu.memory_space<vmem>>, vector<24x324xbf16>
    %cst_152 = arith.constant dense<0.000000e+00> : vector<8x324xf32>
    %156 = tpu.matmul %154, %155, %cst_152 {dimension_numbers = #tpu.dot_dimension_numbers<[1], [0], [0], [1], [0, 0, 1, 1], [], []>} : vector<8x24xbf16>, vector<24x324xbf16>, vector<8x324xf32> -> vector<8x324xf32>
    %157 = arith.addf %152, %156 : vector<8x324xf32>
    %c6_153 = arith.constant 6 : index
    %c0_154 = arith.constant 0 : index
    %c0_155 = arith.constant 0 : index
    %158 = vector.load %arg5[%c6_153, %c0_154, %c0_155] : memref<9x8x24xbf16, #tpu.memory_space<vmem>>, vector<1x8x24xbf16>
    %159 = vector.shape_cast %158 : vector<1x8x24xbf16> to vector<8x24xbf16>
    %c0_156 = arith.constant 0 : index
    %c145_157 = arith.constant 145 : index
    %160 = vector.load %arg14[%c0_156, %c145_157] : memref<40x580xbf16, #tpu.memory_space<vmem>>, vector<24x324xbf16>
    %cst_158 = arith.constant dense<0.000000e+00> : vector<8x324xf32>
    %161 = tpu.matmul %159, %160, %cst_158 {dimension_numbers = #tpu.dot_dimension_numbers<[1], [0], [0], [1], [0, 0, 1, 1], [], []>} : vector<8x24xbf16>, vector<24x324xbf16>, vector<8x324xf32> -> vector<8x324xf32>
    %162 = arith.addf %157, %161 : vector<8x324xf32>
    %c7_159 = arith.constant 7 : index
    %c0_160 = arith.constant 0 : index
    %c0_161 = arith.constant 0 : index
    %163 = vector.load %arg5[%c7_159, %c0_160, %c0_161] : memref<9x8x24xbf16, #tpu.memory_space<vmem>>, vector<1x8x24xbf16>
    %164 = vector.shape_cast %163 : vector<1x8x24xbf16> to vector<8x24xbf16>
    %c0_162 = arith.constant 0 : index
    %c146_163 = arith.constant 146 : index
    %165 = vector.load %arg14[%c0_162, %c146_163] : memref<40x580xbf16, #tpu.memory_space<vmem>>, vector<24x324xbf16>
    %cst_164 = arith.constant dense<0.000000e+00> : vector<8x324xf32>
    %166 = tpu.matmul %164, %165, %cst_164 {dimension_numbers = #tpu.dot_dimension_numbers<[1], [0], [0], [1], [0, 0, 1, 1], [], []>} : vector<8x24xbf16>, vector<24x324xbf16>, vector<8x324xf32> -> vector<8x324xf32>
    %167 = arith.addf %162, %166 : vector<8x324xf32>
    %c8_165 = arith.constant 8 : index
    %c0_166 = arith.constant 0 : index
    %c0_167 = arith.constant 0 : index
    %168 = vector.load %arg5[%c8_165, %c0_166, %c0_167] : memref<9x8x24xbf16, #tpu.memory_space<vmem>>, vector<1x8x24xbf16>
    %169 = vector.shape_cast %168 : vector<1x8x24xbf16> to vector<8x24xbf16>
    %c0_168 = arith.constant 0 : index
    %c147_169 = arith.constant 147 : index
    %170 = vector.load %arg14[%c0_168, %c147_169] : memref<40x580xbf16, #tpu.memory_space<vmem>>, vector<24x324xbf16>
    %cst_170 = arith.constant dense<0.000000e+00> : vector<8x324xf32>
    %171 = tpu.matmul %169, %170, %cst_170 {dimension_numbers = #tpu.dot_dimension_numbers<[1], [0], [0], [1], [0, 0, 1, 1], [], []>} : vector<8x24xbf16>, vector<24x324xbf16>, vector<8x324xf32> -> vector<8x324xf32>
    %172 = arith.addf %167, %171 : vector<8x324xf32>
    %cst_171 = arith.constant 0.000000e+00 : f32
    %173 = vector.broadcast %cst_171 : f32 to vector<8x324xf32>
    %174 = arith.cmpf oge, %172, %173 : vector<8x324xf32>
    %cst_172 = arith.constant 2.000000e-01 : f32
    %175 = vector.broadcast %cst_172 : f32 to vector<8x324xf32>
    %176 = arith.mulf %175, %172 : vector<8x324xf32>
    %177 = arith.select %174, %172, %176 : vector<8x324xi1>, vector<8x324xf32>
    %178 = vector.broadcast %8 : vector<1x324xf32> to vector<8x324xf32>
    %179 = arith.mulf %177, %178 : vector<8x324xf32>
    %180 = arith.truncf %179 : vector<8x324xf32> to vector<8x324xbf16>
    %c24 = arith.constant 24 : index
    %c128_173 = arith.constant 128 : index
    %181 = vector.load %arg14[%c24, %c128_173] : memref<40x580xbf16, #tpu.memory_space<vmem>>, vector<8x324xbf16>
    tpu.vector_store %arg14[%c24, %c128_173], %180 {strides = array<i32>} : memref<40x580xbf16, #tpu.memory_space<vmem>>, vector<8x324xbf16>,
    %c0_174 = arith.constant 0 : index
    %c0_175 = arith.constant 0 : index
    %182 = vector.load %arg11[%c0_174, %c0_175] : memref<8x1xf32, #tpu.memory_space<vmem>>, vector<8x1xf32>
    %183 = vector.shape_cast %182 : vector<8x1xf32> to vector<8x1xf32>
    %184 = vector.broadcast %183 : vector<8x1xf32> to vector<8x324xf32>
    %c0_176 = arith.constant 0 : index
    %c0_177 = arith.constant 0 : index
    %c0_178 = arith.constant 0 : index
    %185 = vector.load %arg6[%c0_176, %c0_177, %c0_178] : memref<9x8x32xbf16, #tpu.memory_space<vmem>>, vector<1x8x32xbf16>
    %186 = vector.shape_cast %185 : vector<1x8x32xbf16> to vector<8x32xbf16>
    %c0_179 = arith.constant 0 : index
    %c109_180 = arith.constant 109 : index
    %187 = vector.load %arg14[%c0_179, %c109_180] : memref<40x580xbf16, #tpu.memory_space<vmem>>, vector<32x324xbf16>
    %cst_181 = arith.constant dense<0.000000e+00> : vector<8x324xf32>
    %188 = tpu.matmul %186, %187, %cst_181 {dimension_numbers = #tpu.dot_dimension_numbers<[1], [0], [0], [1], [0, 0, 1, 1], [], []>} : vector<8x32xbf16>, vector<32x324xbf16>, vector<8x324xf32> -> vector<8x324xf32>
    %189 = arith.addf %184, %188 : vector<8x324xf32>
    %c1_182 = arith.constant 1 : index
    %c0_183 = arith.constant 0 : index
    %c0_184 = arith.constant 0 : index
    %190 = vector.load %arg6[%c1_182, %c0_183, %c0_184] : memref<9x8x32xbf16, #tpu.memory_space<vmem>>, vector<1x8x32xbf16>
    %191 = vector.shape_cast %190 : vector<1x8x32xbf16> to vector<8x32xbf16>
    %c0_185 = arith.constant 0 : index
    %c110_186 = arith.constant 110 : index
    %192 = vector.load %arg14[%c0_185, %c110_186] : memref<40x580xbf16, #tpu.memory_space<vmem>>, vector<32x324xbf16>
    %cst_187 = arith.constant dense<0.000000e+00> : vector<8x324xf32>
    %193 = tpu.matmul %191, %192, %cst_187 {dimension_numbers = #tpu.dot_dimension_numbers<[1], [0], [0], [1], [0, 0, 1, 1], [], []>} : vector<8x32xbf16>, vector<32x324xbf16>, vector<8x324xf32> -> vector<8x324xf32>
    %194 = arith.addf %189, %193 : vector<8x324xf32>
    %c2_188 = arith.constant 2 : index
    %c0_189 = arith.constant 0 : index
    %c0_190 = arith.constant 0 : index
    %195 = vector.load %arg6[%c2_188, %c0_189, %c0_190] : memref<9x8x32xbf16, #tpu.memory_space<vmem>>, vector<1x8x32xbf16>
    %196 = vector.shape_cast %195 : vector<1x8x32xbf16> to vector<8x32xbf16>
    %c0_191 = arith.constant 0 : index
    %c111_192 = arith.constant 111 : index
    %197 = vector.load %arg14[%c0_191, %c111_192] : memref<40x580xbf16, #tpu.memory_space<vmem>>, vector<32x324xbf16>
    %cst_193 = arith.constant dense<0.000000e+00> : vector<8x324xf32>
    %198 = tpu.matmul %196, %197, %cst_193 {dimension_numbers = #tpu.dot_dimension_numbers<[1], [0], [0], [1], [0, 0, 1, 1], [], []>} : vector<8x32xbf16>, vector<32x324xbf16>, vector<8x324xf32> -> vector<8x324xf32>
    %199 = arith.addf %194, %198 : vector<8x324xf32>
    %c3_194 = arith.constant 3 : index
    %c0_195 = arith.constant 0 : index
    %c0_196 = arith.constant 0 : index
    %200 = vector.load %arg6[%c3_194, %c0_195, %c0_196] : memref<9x8x32xbf16, #tpu.memory_space<vmem>>, vector<1x8x32xbf16>
    %201 = vector.shape_cast %200 : vector<1x8x32xbf16> to vector<8x32xbf16>
    %c0_197 = arith.constant 0 : index
    %c127_198 = arith.constant 127 : index
    %202 = vector.load %arg14[%c0_197, %c127_198] : memref<40x580xbf16, #tpu.memory_space<vmem>>, vector<32x324xbf16>
    %cst_199 = arith.constant dense<0.000000e+00> : vector<8x324xf32>
    %203 = tpu.matmul %201, %202, %cst_199 {dimension_numbers = #tpu.dot_dimension_numbers<[1], [0], [0], [1], [0, 0, 1, 1], [], []>} : vector<8x32xbf16>, vector<32x324xbf16>, vector<8x324xf32> -> vector<8x324xf32>
    %204 = arith.addf %199, %203 : vector<8x324xf32>
    %c4_200 = arith.constant 4 : index
    %c0_201 = arith.constant 0 : index
    %c0_202 = arith.constant 0 : index
    %205 = vector.load %arg6[%c4_200, %c0_201, %c0_202] : memref<9x8x32xbf16, #tpu.memory_space<vmem>>, vector<1x8x32xbf16>
    %206 = vector.shape_cast %205 : vector<1x8x32xbf16> to vector<8x32xbf16>
    %c0_203 = arith.constant 0 : index
    %c128_204 = arith.constant 128 : index
    %207 = vector.load %arg14[%c0_203, %c128_204] : memref<40x580xbf16, #tpu.memory_space<vmem>>, vector<32x324xbf16>
    %cst_205 = arith.constant dense<0.000000e+00> : vector<8x324xf32>
    %208 = tpu.matmul %206, %207, %cst_205 {dimension_numbers = #tpu.dot_dimension_numbers<[1], [0], [0], [1], [0, 0, 1, 1], [], []>} : vector<8x32xbf16>, vector<32x324xbf16>, vector<8x324xf32> -> vector<8x324xf32>
    %209 = arith.addf %204, %208 : vector<8x324xf32>
    %c5_206 = arith.constant 5 : index
    %c0_207 = arith.constant 0 : index
    %c0_208 = arith.constant 0 : index
    %210 = vector.load %arg6[%c5_206, %c0_207, %c0_208] : memref<9x8x32xbf16, #tpu.memory_space<vmem>>, vector<1x8x32xbf16>
    %211 = vector.shape_cast %210 : vector<1x8x32xbf16> to vector<8x32xbf16>
    %c0_209 = arith.constant 0 : index
    %c129_210 = arith.constant 129 : index
    %212 = vector.load %arg14[%c0_209, %c129_210] : memref<40x580xbf16, #tpu.memory_space<vmem>>, vector<32x324xbf16>
    %cst_211 = arith.constant dense<0.000000e+00> : vector<8x324xf32>
    %213 = tpu.matmul %211, %212, %cst_211 {dimension_numbers = #tpu.dot_dimension_numbers<[1], [0], [0], [1], [0, 0, 1, 1], [], []>} : vector<8x32xbf16>, vector<32x324xbf16>, vector<8x324xf32> -> vector<8x324xf32>
    %214 = arith.addf %209, %213 : vector<8x324xf32>
    %c6_212 = arith.constant 6 : index
    %c0_213 = arith.constant 0 : index
    %c0_214 = arith.constant 0 : index
    %215 = vector.load %arg6[%c6_212, %c0_213, %c0_214] : memref<9x8x32xbf16, #tpu.memory_space<vmem>>, vector<1x8x32xbf16>
    %216 = vector.shape_cast %215 : vector<1x8x32xbf16> to vector<8x32xbf16>
    %c0_215 = arith.constant 0 : index
    %c145_216 = arith.constant 145 : index
    %217 = vector.load %arg14[%c0_215, %c145_216] : memref<40x580xbf16, #tpu.memory_space<vmem>>, vector<32x324xbf16>
    %cst_217 = arith.constant dense<0.000000e+00> : vector<8x324xf32>
    %218 = tpu.matmul %216, %217, %cst_217 {dimension_numbers = #tpu.dot_dimension_numbers<[1], [0], [0], [1], [0, 0, 1, 1], [], []>} : vector<8x32xbf16>, vector<32x324xbf16>, vector<8x324xf32> -> vector<8x324xf32>
    %219 = arith.addf %214, %218 : vector<8x324xf32>
    %c7_218 = arith.constant 7 : index
    %c0_219 = arith.constant 0 : index
    %c0_220 = arith.constant 0 : index
    %220 = vector.load %arg6[%c7_218, %c0_219, %c0_220] : memref<9x8x32xbf16, #tpu.memory_space<vmem>>, vector<1x8x32xbf16>
    %221 = vector.shape_cast %220 : vector<1x8x32xbf16> to vector<8x32xbf16>
    %c0_221 = arith.constant 0 : index
    %c146_222 = arith.constant 146 : index
    %222 = vector.load %arg14[%c0_221, %c146_222] : memref<40x580xbf16, #tpu.memory_space<vmem>>, vector<32x324xbf16>
    %cst_223 = arith.constant dense<0.000000e+00> : vector<8x324xf32>
    %223 = tpu.matmul %221, %222, %cst_223 {dimension_numbers = #tpu.dot_dimension_numbers<[1], [0], [0], [1], [0, 0, 1, 1], [], []>} : vector<8x32xbf16>, vector<32x324xbf16>, vector<8x324xf32> -> vector<8x324xf32>
    %224 = arith.addf %219, %223 : vector<8x324xf32>
    %c8_224 = arith.constant 8 : index
    %c0_225 = arith.constant 0 : index
    %c0_226 = arith.constant 0 : index
    %225 = vector.load %arg6[%c8_224, %c0_225, %c0_226] : memref<9x8x32xbf16, #tpu.memory_space<vmem>>, vector<1x8x32xbf16>
    %226 = vector.shape_cast %225 : vector<1x8x32xbf16> to vector<8x32xbf16>
    %c0_227 = arith.constant 0 : index
    %c147_228 = arith.constant 147 : index
    %227 = vector.load %arg14[%c0_227, %c147_228] : memref<40x580xbf16, #tpu.memory_space<vmem>>, vector<32x324xbf16>
    %cst_229 = arith.constant dense<0.000000e+00> : vector<8x324xf32>
    %228 = tpu.matmul %226, %227, %cst_229 {dimension_numbers = #tpu.dot_dimension_numbers<[1], [0], [0], [1], [0, 0, 1, 1], [], []>} : vector<8x32xbf16>, vector<32x324xbf16>, vector<8x324xf32> -> vector<8x324xf32>
    %229 = arith.addf %224, %228 : vector<8x324xf32>
    %cst_230 = arith.constant 0.000000e+00 : f32
    %230 = vector.broadcast %cst_230 : f32 to vector<8x324xf32>
    %231 = arith.cmpf oge, %229, %230 : vector<8x324xf32>
    %cst_231 = arith.constant 2.000000e-01 : f32
    %232 = vector.broadcast %cst_231 : f32 to vector<8x324xf32>
    %233 = arith.mulf %232, %229 : vector<8x324xf32>
    %234 = arith.select %231, %229, %233 : vector<8x324xi1>, vector<8x324xf32>
    %235 = vector.broadcast %8 : vector<1x324xf32> to vector<8x324xf32>
    %236 = arith.mulf %234, %235 : vector<8x324xf32>
    %237 = arith.truncf %236 : vector<8x324xf32> to vector<8x324xbf16>
    %c32 = arith.constant 32 : index
    %c128_232 = arith.constant 128 : index
    %238 = vector.load %arg14[%c32, %c128_232] : memref<40x580xbf16, #tpu.memory_space<vmem>>, vector<8x324xbf16>
    tpu.vector_store %arg14[%c32, %c128_232], %237 {strides = array<i32>} : memref<40x580xbf16, #tpu.memory_space<vmem>>, vector<8x324xbf16>,
    %c0_233 = arith.constant 0 : index
    %c0_234 = arith.constant 0 : index
    %239 = vector.load %arg12[%c0_233, %c0_234] : memref<4x1xf32, #tpu.memory_space<vmem>>, vector<4x1xf32>
    %240 = vector.shape_cast %239 : vector<4x1xf32> to vector<4x1xf32>
    %241 = vector.broadcast %240 : vector<4x1xf32> to vector<4x324xf32>
    %c0_235 = arith.constant 0 : index
    %c0_236 = arith.constant 0 : index
    %c0_237 = arith.constant 0 : index
    %242 = vector.load %arg7[%c0_235, %c0_236, %c0_237] : memref<9x4x40xbf16, #tpu.memory_space<vmem>>, vector<1x4x40xbf16>
    %243 = vector.shape_cast %242 : vector<1x4x40xbf16> to vector<4x40xbf16>
    %c0_238 = arith.constant 0 : index
    %c109_239 = arith.constant 109 : index
    %244 = vector.load %arg14[%c0_238, %c109_239] : memref<40x580xbf16, #tpu.memory_space<vmem>>, vector<40x324xbf16>
    %cst_240 = arith.constant dense<0.000000e+00> : vector<4x324xf32>
    %245 = tpu.matmul %243, %244, %cst_240 {dimension_numbers = #tpu.dot_dimension_numbers<[1], [0], [0], [1], [0, 0, 1, 1], [], []>} : vector<4x40xbf16>, vector<40x324xbf16>, vector<4x324xf32> -> vector<4x324xf32>
    %246 = arith.addf %241, %245 : vector<4x324xf32>
    %c1_241 = arith.constant 1 : index
    %c0_242 = arith.constant 0 : index
    %c0_243 = arith.constant 0 : index
    %247 = vector.load %arg7[%c1_241, %c0_242, %c0_243] : memref<9x4x40xbf16, #tpu.memory_space<vmem>>, vector<1x4x40xbf16>
    %248 = vector.shape_cast %247 : vector<1x4x40xbf16> to vector<4x40xbf16>
    %c0_244 = arith.constant 0 : index
    %c110_245 = arith.constant 110 : index
    %249 = vector.load %arg14[%c0_244, %c110_245] : memref<40x580xbf16, #tpu.memory_space<vmem>>, vector<40x324xbf16>
    %cst_246 = arith.constant dense<0.000000e+00> : vector<4x324xf32>
    %250 = tpu.matmul %248, %249, %cst_246 {dimension_numbers = #tpu.dot_dimension_numbers<[1], [0], [0], [1], [0, 0, 1, 1], [], []>} : vector<4x40xbf16>, vector<40x324xbf16>, vector<4x324xf32> -> vector<4x324xf32>
    %251 = arith.addf %246, %250 : vector<4x324xf32>
    %c2_247 = arith.constant 2 : index
    %c0_248 = arith.constant 0 : index
    %c0_249 = arith.constant 0 : index
    %252 = vector.load %arg7[%c2_247, %c0_248, %c0_249] : memref<9x4x40xbf16, #tpu.memory_space<vmem>>, vector<1x4x40xbf16>
    %253 = vector.shape_cast %252 : vector<1x4x40xbf16> to vector<4x40xbf16>
    %c0_250 = arith.constant 0 : index
    %c111_251 = arith.constant 111 : index
    %254 = vector.load %arg14[%c0_250, %c111_251] : memref<40x580xbf16, #tpu.memory_space<vmem>>, vector<40x324xbf16>
    %cst_252 = arith.constant dense<0.000000e+00> : vector<4x324xf32>
    %255 = tpu.matmul %253, %254, %cst_252 {dimension_numbers = #tpu.dot_dimension_numbers<[1], [0], [0], [1], [0, 0, 1, 1], [], []>} : vector<4x40xbf16>, vector<40x324xbf16>, vector<4x324xf32> -> vector<4x324xf32>
    %256 = arith.addf %251, %255 : vector<4x324xf32>
    %c3_253 = arith.constant 3 : index
    %c0_254 = arith.constant 0 : index
    %c0_255 = arith.constant 0 : index
    %257 = vector.load %arg7[%c3_253, %c0_254, %c0_255] : memref<9x4x40xbf16, #tpu.memory_space<vmem>>, vector<1x4x40xbf16>
    %258 = vector.shape_cast %257 : vector<1x4x40xbf16> to vector<4x40xbf16>
    %c0_256 = arith.constant 0 : index
    %c127_257 = arith.constant 127 : index
    %259 = vector.load %arg14[%c0_256, %c127_257] : memref<40x580xbf16, #tpu.memory_space<vmem>>, vector<40x324xbf16>
    %cst_258 = arith.constant dense<0.000000e+00> : vector<4x324xf32>
    %260 = tpu.matmul %258, %259, %cst_258 {dimension_numbers = #tpu.dot_dimension_numbers<[1], [0], [0], [1], [0, 0, 1, 1], [], []>} : vector<4x40xbf16>, vector<40x324xbf16>, vector<4x324xf32> -> vector<4x324xf32>
    %261 = arith.addf %256, %260 : vector<4x324xf32>
    %c4_259 = arith.constant 4 : index
    %c0_260 = arith.constant 0 : index
    %c0_261 = arith.constant 0 : index
    %262 = vector.load %arg7[%c4_259, %c0_260, %c0_261] : memref<9x4x40xbf16, #tpu.memory_space<vmem>>, vector<1x4x40xbf16>
    %263 = vector.shape_cast %262 : vector<1x4x40xbf16> to vector<4x40xbf16>
    %c0_262 = arith.constant 0 : index
    %c128_263 = arith.constant 128 : index
    %264 = vector.load %arg14[%c0_262, %c128_263] : memref<40x580xbf16, #tpu.memory_space<vmem>>, vector<40x324xbf16>
    %cst_264 = arith.constant dense<0.000000e+00> : vector<4x324xf32>
    %265 = tpu.matmul %263, %264, %cst_264 {dimension_numbers = #tpu.dot_dimension_numbers<[1], [0], [0], [1], [0, 0, 1, 1], [], []>} : vector<4x40xbf16>, vector<40x324xbf16>, vector<4x324xf32> -> vector<4x324xf32>
    %266 = arith.addf %261, %265 : vector<4x324xf32>
    %c5_265 = arith.constant 5 : index
    %c0_266 = arith.constant 0 : index
    %c0_267 = arith.constant 0 : index
    %267 = vector.load %arg7[%c5_265, %c0_266, %c0_267] : memref<9x4x40xbf16, #tpu.memory_space<vmem>>, vector<1x4x40xbf16>
    %268 = vector.shape_cast %267 : vector<1x4x40xbf16> to vector<4x40xbf16>
    %c0_268 = arith.constant 0 : index
    %c129_269 = arith.constant 129 : index
    %269 = vector.load %arg14[%c0_268, %c129_269] : memref<40x580xbf16, #tpu.memory_space<vmem>>, vector<40x324xbf16>
    %cst_270 = arith.constant dense<0.000000e+00> : vector<4x324xf32>
    %270 = tpu.matmul %268, %269, %cst_270 {dimension_numbers = #tpu.dot_dimension_numbers<[1], [0], [0], [1], [0, 0, 1, 1], [], []>} : vector<4x40xbf16>, vector<40x324xbf16>, vector<4x324xf32> -> vector<4x324xf32>
    %271 = arith.addf %266, %270 : vector<4x324xf32>
    %c6_271 = arith.constant 6 : index
    %c0_272 = arith.constant 0 : index
    %c0_273 = arith.constant 0 : index
    %272 = vector.load %arg7[%c6_271, %c0_272, %c0_273] : memref<9x4x40xbf16, #tpu.memory_space<vmem>>, vector<1x4x40xbf16>
    %273 = vector.shape_cast %272 : vector<1x4x40xbf16> to vector<4x40xbf16>
    %c0_274 = arith.constant 0 : index
    %c145_275 = arith.constant 145 : index
    %274 = vector.load %arg14[%c0_274, %c145_275] : memref<40x580xbf16, #tpu.memory_space<vmem>>, vector<40x324xbf16>
    %cst_276 = arith.constant dense<0.000000e+00> : vector<4x324xf32>
    %275 = tpu.matmul %273, %274, %cst_276 {dimension_numbers = #tpu.dot_dimension_numbers<[1], [0], [0], [1], [0, 0, 1, 1], [], []>} : vector<4x40xbf16>, vector<40x324xbf16>, vector<4x324xf32> -> vector<4x324xf32>
    %276 = arith.addf %271, %275 : vector<4x324xf32>
    %c7_277 = arith.constant 7 : index
    %c0_278 = arith.constant 0 : index
    %c0_279 = arith.constant 0 : index
    %277 = vector.load %arg7[%c7_277, %c0_278, %c0_279] : memref<9x4x40xbf16, #tpu.memory_space<vmem>>, vector<1x4x40xbf16>
    %278 = vector.shape_cast %277 : vector<1x4x40xbf16> to vector<4x40xbf16>
    %c0_280 = arith.constant 0 : index
    %c146_281 = arith.constant 146 : index
    %279 = vector.load %arg14[%c0_280, %c146_281] : memref<40x580xbf16, #tpu.memory_space<vmem>>, vector<40x324xbf16>
    %cst_282 = arith.constant dense<0.000000e+00> : vector<4x324xf32>
    %280 = tpu.matmul %278, %279, %cst_282 {dimension_numbers = #tpu.dot_dimension_numbers<[1], [0], [0], [1], [0, 0, 1, 1], [], []>} : vector<4x40xbf16>, vector<40x324xbf16>, vector<4x324xf32> -> vector<4x324xf32>
    %281 = arith.addf %276, %280 : vector<4x324xf32>
    %c8_283 = arith.constant 8 : index
    %c0_284 = arith.constant 0 : index
    %c0_285 = arith.constant 0 : index
    %282 = vector.load %arg7[%c8_283, %c0_284, %c0_285] : memref<9x4x40xbf16, #tpu.memory_space<vmem>>, vector<1x4x40xbf16>
    %283 = vector.shape_cast %282 : vector<1x4x40xbf16> to vector<4x40xbf16>
    %c0_286 = arith.constant 0 : index
    %c147_287 = arith.constant 147 : index
    %284 = vector.load %arg14[%c0_286, %c147_287] : memref<40x580xbf16, #tpu.memory_space<vmem>>, vector<40x324xbf16>
    %cst_288 = arith.constant dense<0.000000e+00> : vector<4x324xf32>
    %285 = tpu.matmul %283, %284, %cst_288 {dimension_numbers = #tpu.dot_dimension_numbers<[1], [0], [0], [1], [0, 0, 1, 1], [], []>} : vector<4x40xbf16>, vector<40x324xbf16>, vector<4x324xf32> -> vector<4x324xf32>
    %286 = arith.addf %281, %285 : vector<4x324xf32>
    %cst_289 = arith.constant 2.000000e-01 : f32
    %287 = vector.broadcast %cst_289 : f32 to vector<4x324xf32>
    %288 = arith.mulf %287, %286 : vector<4x324xf32>
    %289 = arith.addf %288, %7 : vector<4x324xf32>
    %c0_290 = arith.constant 0 : index
    %c0_291 = arith.constant 0 : index
    %c0_292 = arith.constant 0 : index
    %290 = vector.load %arg13[%c0_290, %c0_291, %c0_292] : memref<1x4x324xf32, #tpu.memory_space<vmem>>, vector<1x4x324xf32>
    %291 = vector.shape_cast %290 : vector<1x4x324xf32> to vector<4x324xf32>
    %292 = vector.shape_cast %289 : vector<4x324xf32> to vector<1x4x324xf32>
    tpu.vector_store %arg13[%c0_290, %c0_291, %c0_292], %292 {strides = array<i32>} : memref<1x4x324xf32, #tpu.memory_space<vmem>>, vector<1x4x324xf32>,
    return
  }
  func.func @transform_0(%arg0: i32) -> (i32, i32, i32) {
    %c0_i32 = arith.constant 0 : i32
    %c0_i32_0 = arith.constant 0 : i32
    %c0_i32_1 = arith.constant 0 : i32
    return %arg0, %c0_i32, %c0_i32_0 : i32, i32, i32
  }
  func.func @transform_1(%arg0: i32) -> (i32, i32) {
    %c0_i32 = arith.constant 0 : i32
    %c0_i32_0 = arith.constant 0 : i32
    %c0_i32_1 = arith.constant 0 : i32
    return %c0_i32, %c0_i32_0 : i32, i32
  }
  func.func @transform_2(%arg0: i32) -> (i32, i32, i32) {
    %c0_i32 = arith.constant 0 : i32
    %c0_i32_0 = arith.constant 0 : i32
    %c0_i32_1 = arith.constant 0 : i32
    %c0_i32_2 = arith.constant 0 : i32
    return %c0_i32, %c0_i32_0, %c0_i32_1 : i32, i32, i32
  }
  func.func @transform_3(%arg0: i32) -> (i32, i32, i32) {
    %c0_i32 = arith.constant 0 : i32
    %c0_i32_0 = arith.constant 0 : i32
    %c0_i32_1 = arith.constant 0 : i32
    %c0_i32_2 = arith.constant 0 : i32
    return %c0_i32, %c0_i32_0, %c0_i32_1 : i32, i32, i32
  }
  func.func @transform_4(%arg0: i32) -> (i32, i32, i32) {
    %c0_i32 = arith.constant 0 : i32
    %c0_i32_0 = arith.constant 0 : i32
    %c0_i32_1 = arith.constant 0 : i32
    %c0_i32_2 = arith.constant 0 : i32
    return %c0_i32, %c0_i32_0, %c0_i32_1 : i32, i32, i32
  }
  func.func @transform_5(%arg0: i32) -> (i32, i32, i32) {
    %c0_i32 = arith.constant 0 : i32
    %c0_i32_0 = arith.constant 0 : i32
    %c0_i32_1 = arith.constant 0 : i32
    %c0_i32_2 = arith.constant 0 : i32
    return %c0_i32, %c0_i32_0, %c0_i32_1 : i32, i32, i32
  }
  func.func @transform_6(%arg0: i32) -> (i32, i32, i32) {
    %c0_i32 = arith.constant 0 : i32
    %c0_i32_0 = arith.constant 0 : i32
    %c0_i32_1 = arith.constant 0 : i32
    %c0_i32_2 = arith.constant 0 : i32
    return %c0_i32, %c0_i32_0, %c0_i32_1 : i32, i32, i32
  }
  func.func @transform_7(%arg0: i32) -> (i32, i32) {
    %c0_i32 = arith.constant 0 : i32
    %c0_i32_0 = arith.constant 0 : i32
    %c0_i32_1 = arith.constant 0 : i32
    return %c0_i32, %c0_i32_0 : i32, i32
  }
  func.func @transform_8(%arg0: i32) -> (i32, i32) {
    %c0_i32 = arith.constant 0 : i32
    %c0_i32_0 = arith.constant 0 : i32
    %c0_i32_1 = arith.constant 0 : i32
    return %c0_i32, %c0_i32_0 : i32, i32
  }
  func.func @transform_9(%arg0: i32) -> (i32, i32) {
    %c0_i32 = arith.constant 0 : i32
    %c0_i32_0 = arith.constant 0 : i32
    %c0_i32_1 = arith.constant 0 : i32
    return %c0_i32, %c0_i32_0 : i32, i32
  }
  func.func @transform_10(%arg0: i32) -> (i32, i32) {
    %c0_i32 = arith.constant 0 : i32
    %c0_i32_0 = arith.constant 0 : i32
    %c0_i32_1 = arith.constant 0 : i32
    return %c0_i32, %c0_i32_0 : i32, i32
  }
  func.func @transform_11(%arg0: i32) -> (i32, i32) {
    %c0_i32 = arith.constant 0 : i32
    %c0_i32_0 = arith.constant 0 : i32
    %c0_i32_1 = arith.constant 0 : i32
    return %c0_i32, %c0_i32_0 : i32, i32
  }
  func.func @transform_12(%arg0: i32) -> (i32, i32, i32) {
    %c0_i32 = arith.constant 0 : i32
    %c0_i32_0 = arith.constant 0 : i32
    %c0_i32_1 = arith.constant 0 : i32
    return %arg0, %c0_i32, %c0_i32_0 : i32, i32, i32
  }
}

</mosaic_0001>

<bundles_post_ra>
// kernel: tpu_custom_call.1
= control target key start
LH: loop header
LB: loop body
LE: loop exit
PB: predicated region body
PF: predicated region fallthrough
CT: control target
= control target key end

     0   :  { %s9170_s0 = inlined_call_operand.hbm [shape: f32[2,4,324], index: 0, kind: input, shape index: {}]   ;;  %s9171_s1 = inlined_call_operand.hbm [shape: f32[1,324], index: 1, kind: input, shape index: {}]   ;;  %s9172_s2 = inlined_call_operand.vmem [shape: bf16[9,8,8], index: 2, kind: input, shape index: {}]   ;;  %s9173_s3 = inlined_call_operand.vmem [shape: bf16[9,8,16], index: 3, kind: input, shape index: {}]   ;;  %s9174_s4 = inlined_call_operand.vmem [shape: bf16[9,8,24], index: 4, kind: input, shape index: {}]   ;;  %s9175_s5 = inlined_call_operand.vmem [shape: bf16[9,8,32], index: 5, kind: input, shape index: {}]   ;;  %s9176_s6 = inlined_call_operand.vmem [shape: bf16[9,4,40], index: 6, kind: input, shape index: {}]   ;;  %s9177_s7 = inlined_call_operand.vmem [shape: f32[8,1], index: 7, kind: input, shape index: {}]   ;;  %s9178_s8 = inlined_call_operand.vmem [shape: f32[8,1], index: 8, kind: input, shape index: {}]   ;;  %s9179_s9 = inlined_call_operand.vmem [shape: f32[8,1], index: 9, kind: input, shape index: {}]   ;;  %s9180_s10 = inlined_call_operand.vmem [shape: f32[8,1], index: 10, kind: input, shape index: {}]   ;;  %s9181_s11 = inlined_call_operand.vmem [shape: f32[4,1], index: 11, kind: input, shape index: {}]   ;;  %s9182_s12 = inlined_call_operand.hbm [shape: f32[2,4,324], index: 12, kind: output, shape index: {}]  }
   0x1   :  { %9191 = sst [smem:[#allocation17_spill]] %s9171_s1 }
   0x2   :  { %17 = vsyncpa [#allocation4], 0 }
   0x3   :  { %19 = vsyncpa [#allocation4 + $0x1], 0 }
   0x4   :  { %20 = vsyncpa [#allocation7], 0 }
   0x5   :  { %21 = vsyncpa [#allocation5], 0 }
   0x6   :  { %23 = vsyncpa [#allocation5 + $0x1], 0  ;;  %s7508_s21 = smov 0   ;;  %s7510_s22 = smov 0  }
   0x7   :  { %s7512_s23 = smov 0   ;;  %s7514_s24 = smov 0  }
   0x8 LB: > { %9192 = sst [smem:[#allocation12_spill]] %s7415_s21  ;;  %s7529_s25 = sadd.s32 4294967295, %s7427_s24   ;;  %s7427_s24 = sphi %s7514_s24, %s9217_s24   ;;  %s7423_s23 = sphi %s7512_s23, %s9219_s23   ;;  %s7419_s22 = sphi %s7510_s22, %s9221_s22   ;;  %s7415_s21 = sphi %s7508_s21, %s9220_s21  }
   0x9   : > { %9193 = sst [smem:[#allocation13_spill]] %s7423_s23  ;;  %s6136_s26 = sadd.s32 4294967294, %s7427_s24  }
   0xa   : > { %p49_p0 = scmp.ne.s32.totalorder %s7419_s22, %s7415_s21  ;;  %p9187_p1 = scmp.eq.s32.totalorder %s7529_s25, 0 }
   0xb   : > { %p310_p3 = scmp.eq.s32.totalorder %s6136_s26, 1  ;;  %p6137_p5 = scmp.ge.s32.totalorder %s7427_s24, 1 }
   0xc   : > { %p7538_p4 = por %p9187_p1, %p49_p0  ;;  %p317_p7 = scmp.lt.s32.totalorder %s7427_s24, 3 }
   0xd   : > { %p7543_p6 = por %p310_p3, %p49_p0  ;;  %s7429_s30 = smov [#allocation6]  }
   0xe   : > { %s9194_s27 = scalar_select %p7538_p4, 1, 0 }
   0xf   : > { %s9195_s28 = scalar_select %p7543_p6, 1, 0 }
  0x10   : > { %p7548_p8 = pnand %p6137_p5, %p317_p7  ;;  %s330_s13 = sshll.u32 %s7429_s30, 4  ;;  %s331_s13 = int_to_ptr.vmem [resolvable:$true] %s330_s13 }
  0x11   : > { %9196 = sst [smem:[#allocation14_spill]] %s9195_s28  ;;  %s7556_s14 = sadd.s32 1, %s7427_s24  }
  0x12   : > { %s9197_s29 = scalar_select %p7548_p8, 1, 0 }
  0x13   : > { %p7201_p10 = pneg %p7548_p8  ;;  %9198 = sst [smem:[#allocation15_spill]] %s7556_s14 }
  0x14   : > { %s33_s16 = ssub.s32 %s7427_s24, %s7556_s14  ;;  %s36_s18 = sadd.s32 1, %s7423_s23 }
  0x15   : > { %p7560_p11 = pnand %p7201_p10, %p9187_p1  ;;  %p7566_p12 = scmp.eq.s32.totalorder %s33_s16, 0 }
  0x16   : > { %s9201_s1 = sld [smem:[#allocation17_spill]] }
  0x17   : > { %s9200_s17 = scalar_select %p7566_p12, 1, 0 }
  0x18   : > { %p7301_p3 = pneg %p7560_p11 }
  0x1c   : > { %s7299_s26 = scalar_lea.hbm %s9201_s1, 48 }
  0x1d   : > { %p7300_p0 = scmp.ne.s32.totalorder %s9201_s1, %s7299_s26  ;;  %p7306_p10 = scmp.lt.u32.totalorder %s7299_s26, %s9201_s1 }
  0x1f   : > { %p7302_p5 = pnand %p7301_p3, %p7300_p0 }
  0x21   : > { %p7303_p7 = pneg %p7302_p5 }
  0x23   : > { %p7308_p9 = pnand %p7306_p10, %p7303_p7 }
  0x25   : > { %7311 = shalt.err (!%p7308_p9)
}
  0x26   : > { %s7312_s16 = scalar_lea.vmem %s331_s13, 48  ;;  %s7319_s19 = scalar_lea.vmem %s331_s13, 64 }
  0x27   : > { %p7313_p1 = scmp.ne.s32.totalorder %s331_s13, %s7312_s16  ;;  %p7320_p6 = scmp.lt.s32.totalorder %s331_s13, %s331_s13 }
  0x28   : > { %p7321_p4 = scmp.lt.s32.totalorder %s7319_s19, %s7312_s16 }
  0x29   : > { %p7315_p2 = pnand %p7313_p1, %p7301_p3 }
  0x2a   : > { %p7322_p8 = por %p7321_p4, %p7320_p6 }
  0x2b   : > { %p7316_p13 = pneg %p7315_p2 }
  0x2d   : > { %p7323_p12 = pnand %p7322_p8, %p7316_p13 }
  0x2f   : > { %7326 = shalt.err (!%p7323_p12)
}
  0x30   : > { %7204 = dma.hbm_to_vmem [thread:$0]  (!%p7560_p11), %s9201_s1, 48, %s331_s13, [#allocation7]  }
  0x31   : > { %p9202_p1 = scmp.ne.s32.totalorder %s9200_s17, 0  ;;  %p44_p2 = scmp.eq.s32.totalorder %s7427_s24, 0 }
  0x32   : > { %p9204_p4 = scmp.ne.s32.totalorder %s7423_s23, %s7419_s22  ;;  %p9205_p6 = scmp.eq.s32.totalorder %s7529_s25, 1 }
  0x33   : > { %s7592_s21 = scalar_select %p9202_p1, %s7423_s23, %s36_s18  }
  0x34   : > { %p7600_p8 = por %p9205_p6, %p9204_p4  ;;  %p7214_p9 = scmp.lt.s32.totalorder %s7427_s24, 2 }
  0x35   : > { %9203 = sst [smem:[#allocation16_spill]] %s7592_s21  ;;  %s371_s15 = sand.u32 1, %s7423_s23  }
  0x36   : > { %p9207_p12 = pmov %p9204_p4  ;;  %s7189_s26 = smul.u32 12, %s371_s15 }
  0x37   : > { %s7190_s30 = smul.u32 192, %s7427_s24  ;;  %s372_s20 = scalar_lea.sflag [#allocation4], %s371_s15 }
  0x38   : > { %p45_p13 = por %p44_p2, %p9207_p12  ;;  %s375_s19 = scalar_lea.vmem [#allocation3], %s7189_s26 }
  0x39   : > { %s7617_s18 = scalar_lea.hbm %s9170_s0, %s7190_s30  ;;  %s383_s28 = sshll.u32 %s375_s19, 4  ;;  %s7619_s28 = int_to_ptr.vmem [resolvable:$true] %s383_s28 }
  0x3a   : > { %p7610_p0 = pnand %p7214_p9, %p45_p13  ;;  %s7327_s1 = scalar_lea.hbm %s7617_s18, 192 }
  0x3b   : > { %p7328_p11 = scmp.ne.s32.totalorder %s7617_s18, %s7327_s1  ;;  %s7332_s17 = scalar_lea.hbm %s9170_s0, 384 }
  0x3c   : > { %p7329_p3 = pneg %p7610_p0  ;;  %p7333_p10 = scmp.lt.u32.totalorder %s7617_s18, %s9170_s0 }
  0x3d   : > { %p7334_p1 = scmp.lt.u32.totalorder %s7332_s17, %s7327_s1  ;;  %p7336_p4 = scmp.lt.u32.totalorder %s7327_s1, %s7617_s18 }
  0x3e   : > { %p7330_p5 = pnand %p7329_p3, %p7328_p11 }
  0x3f   : > { %p7335_p2 = por %p7334_p1, %p7333_p10 }
  0x40   : > { %p7331_p7 = pneg %p7330_p5 }
  0x41   : > { %p7337_p6 = por %p7336_p4, %p7335_p2 }
  0x43   : > { %p7338_p9 = pnand %p7337_p6, %p7331_p7 }
  0x45   : > { %7341 = shalt.err (!%p7338_p9)
}
  0x46   : > { %s7342_s15 = scalar_lea.vmem %s7619_s28, 192  ;;  %s7430_s26 = smov [#allocation3]  }
  0x47   : > { %p7343_p12 = scmp.ne.s32.totalorder %s7619_s28, %s7342_s15  ;;  %s7347_s19 = sshll.u32 %s7430_s26, 4  ;;  %s7348_s19 = int_to_ptr.vmem [resolvable:$false] %s7347_s19 }
  0x48   : > { %s7349_s23 = scalar_lea.vmem %s7348_s19, 384  ;;  %p7350_p5 = scmp.lt.s32.totalorder %s7619_s28, %s7348_s19 }
  0x49   : > { %p7345_p13 = pnand %p7343_p12, %p7329_p3  ;;  %p7351_p10 = scmp.lt.s32.totalorder %s7349_s23, %s7342_s15 }
  0x4b   : > { %p7346_p11 = pneg %p7345_p13  ;;  %p7352_p1 = por %p7351_p10, %p7350_p5 }
  0x4d   : > { %p7353_p2 = pnand %p7352_p1, %p7346_p11 }
  0x4f   : > { %7356 = shalt.err (!%p7353_p2)
}
  0x50   : > { %7208 = dma.hbm_to_vmem [thread:$0]  (!%p7610_p0), %s7617_s18, 192, %s7619_s28, %s372_s20  }
  0x51   : > { %p9209_p7 = scmp.ne.s32.totalorder %s9197_s29, 0 }
  0x52   : > { %s7649_s1 = sand.u32 (!%p9209_p7), 1, %s7419_s22   ;;  %p9210_p3 = scmp.ne.s32.totalorder (!%p9209_p7), %s9194_s27, 0 }
  0x53   : > { %392 = sbr.rel (%p9209_p7) target bundleno = 2375 (0x947), region = 68  ;;  %s395_s13 = scalar_lea.sflag (!%p9209_p7), [#allocation4], %s7649_s1 }
  0x54   : > { %s7191_s21 = smul.u32 (!%p9209_p7), 12, %s7649_s1 }
  0x56   : > { %s7655_s30 = scalar_lea.vmem (!%p9209_p7), [#allocation3], %s7191_s21 }
  0x5a   : > { %7402 = dma.done.wait (%p9210_p3), %s395_s13, 192  }
  0x5b   : > { %7404 = vsyncadd (%p9210_p3), %s395_s13, 4294967104  ;;  %p9211_p0 = scmp.eq.s32.totalorder %s7529_s25, 0 }
  0x5d   : > { %7406 = dma.done.wait (%p9211_p0), [#allocation7], 48   ;;  %p9212_p4 = pmov %p9211_p0 }
  0x5e   : > { %vm449_vm0 = vcmask 1044000   ;;  %vm450_vm1 = vcmask 556036   ;;  %v7431_v0 = vmov 0   ;;  %v461_v1 = vld [vmem:[%s7655_s30] sm:$0xff]  ;;  %v462_v2 = vld [vmem:[%s7655_s30 + $0x8] sm:$0xf] }
  0x5f   : > { %7408 = vsyncadd (%p9212_p4), [#allocation7], 4294967248  ;;  %444 = vst [vmem:[#allocation2] sm:$0xf] %v7431_v0  ;;  %560 = vmatprep.mubr.bf16.mxu0 %v7431_v0  ;;  %7261 = vset.pattern.permute.xlu0 %v7431_v0  ;;  %vm481_vm3 = vcmask 549888   ;;  %v7682_v3 = vcombine.high %v461_v1, %v461_v1  ;;  %v6377_v4 = vpack.c.bf16 %v462_v2, %v462_v2  ;;  %v7432_v6 = vmov 0.0  }
  0x60   : > { %vm451_vm2 = vmor %vm450_vm1, %vm449_vm0  ;;  %445 = vst [vmem:[#allocation2 + $0x14] sm:$0xf] %v7431_v0  ;;  %7262 = vset.pattern.permute.xlu1 %v7431_v0  ;;  %6512 = vmatprep.subr.bf16.mxu1 %v7432_v6  ;;  %vm7433_vm4 = vmmov 0   ;;  %s7434_s27 = smov 19   ;;  %s7435_s29 = smov 18   ;;  %v483_v17 = vld [vmem:[%s9177_s7] sm:$0xff] }
  0x61   : > { %446 = vst [vmem:[#allocation2 + $0x28] sm:$0xf] %v7431_v0  ;;  %447 = vst [vmem:[#allocation2 + $0x3c] sm:$0xf] %v7431_v0  ;;  %v6376_v5 = vpack.c.bf16 %v7682_v3, %v461_v1  ;;  %6514 = vmatprep.mubr.msk.bf16.mxu1 %vm7433_vm4, %v7432_v6  ;;  %s7436_s16 = smov 17   ;;  %s7437_s18 = smov 1  }
  0x62   : > { %448 = vst [vmem:[#allocation2 + $0x50] sm:$0xf] %v7431_v0  ;;  %452 = vst.msk [vmem:[#allocation2 + $0xc] sm:$0xff] %vm451_vm2, %v7431_v0  ;;  %s7438_s28 = smov 127   ;;  %s7439_s20 = smov 111   ;;  %vm510_vm5 = vcmask 154624  }
  0x63   : > { %453 = vst.msk [vmem:[#allocation2 + $0x20] sm:$0xff] %vm451_vm2, %v7431_v0  ;;  %454 = vst.msk [vmem:[#allocation2 + $0x34] sm:$0xff] %vm451_vm2, %v7431_v0  ;;  %s7440_s17 = smov 110   ;;  %s7441_s15 = smov 109   ;;  %vm518_vm6 = vcmask 1043456   ;;  %vm622_vm7 = vcmask 146432  }
  0x64   : > { %455 = vst.msk [vmem:[#allocation2 + $0x48] sm:$0xff] %vm451_vm2, %v7431_v0  ;;  %456 = vst.msk [vmem:[#allocation2 + $0x5c] sm:$0xff] %vm451_vm2, %v7431_v0  ;;  %v489_v27 = vld [vmem:[%s9172_s2] sm:$0xf]  ;;  %vm514_vm8 = vcmask 64512   ;;  %vm732_vm9 = vcmask 138240  }
  0x65   : > { %457 = vst [vmem:[#allocation2] sm:$0xcc] %v7431_v0  ;;  %458 = vst [vmem:[#allocation2 + $0x8] sm:$0xcc] %v7431_v0  ;;  %v6152_v40 = vld [vmem:[%s9172_s2 + $0x4] sm:$0xf] }
  0x66   : > { %482 = vst.msk [vmem:[#allocation2 + $0xc] sm:$0x3] %vm481_vm3, %v6377_v4  ;;  %480 = vst [vmem:[#allocation2 + $0x4] sm:$0x33] %v6376_v5  ;;  %vm842_vm10 = vcmask 7168   ;;  %vm1058_vm11 = vcmask 1039360  }
  0x67   : > { %v6156_v54 = vld [vmem:[%s9172_s2 + $0x8] sm:$0xf]  ;;  %v6160_v58 = vld [vmem:[%s9172_s2 + $0xc] sm:$0xf]  ;;  %v6164_v4 = vld [vmem:[%s9172_s2 + $0x10] sm:$0xf] }
  0x68   : > { %vm1165_vm12 = vcmask 908288   ;;  %vm1272_vm13 = vcmask 900096   ;;  %vm1379_vm14 = vcmask 891904   ;;  %vm1520_vm2 = vcmask 551936   ;;  %s7192_s26 = smul.u32 192, %s7529_s25  ;;  %s442_s19 = scalar_lea.vmem [#allocation8], %s7191_s21 }
  0x69   : > { %vm1563_vm3 = vcmask 130048   ;;  %s6056_s23 = sshll.u32 %s442_s19, 4  ;;  %s6042_s25 = scalar_lea.sflag [#allocation5], %s7649_s1  ;;  %s9128_s23 = int_to_ptr.vmem [resolvable:$true] %s6056_s23 }
  0x6a   : > { %s7442_s21 = smov [#allocation8]  }
  0x6d   : > { %v7688_v7 = vld [vmem:[#allocation2 + $0x8] sm:$0xff]  ;;  %v7690_v8 = vld [vmem:[#allocation2] sm:$0xff] }
  0x6e   : > { %v6147_v9 = vcombine.low %v7688_v7, %v7688_v7  ;;  %v6145_v10 = vcombine.low %v7690_v8, %v7690_v8  ;;  %v6148_v11 = vcombine.high %v7688_v7, %v7688_v7  ;;  %v6146_v12 = vcombine.high %v7690_v8, %v7690_v8  ;;  %v7714_v13 = vld [vmem:[#allocation2 + $0x4] sm:$0xff]  ;;  %v7730_v16 = vld [vmem:[#allocation2 + $0xc] ss:$0 sps:$4 sm:$0xff]  }
  0x6f   : > { %v7720_v14 = vcombine.low %v7714_v13, %v7714_v13  ;;  %v7724_v15 = vcombine.high %v7714_v13, %v7714_v13  ;;  %v964_v62 = vsel %vm518_vm6, %v7730_v16, 0 }
  0x70   : > { %506 = vrot.lane.b32.xlu1 %v6147_v9, %s7434_s27  ;;  %502 = vrot.lane.b32.xlu0 %v6145_v10, %s7434_s27 }
  0x71   : > { %v958_v61 = vsel %vm518_vm6, %v7720_v14, 0 }
  0x74   : > { %508 = vrot.lane.b32.xlu1 %v6148_v11, %s7434_s27  ;;  %504 = vrot.lane.b32.xlu0 %v6146_v12, %s7434_s27 }
  0x78   : > { %616 = vrot.lane.b32.xlu1 %v6146_v12, %s7435_s29  ;;  %614 = vrot.lane.b32.xlu0 %v6145_v10, %s7435_s29 }
  0x7c   : > { %620 = vrot.lane.b32.xlu1 %v6148_v11, %s7435_s29  ;;  %618 = vrot.lane.b32.xlu0 %v6147_v9, %s7435_s29 }
  0x80   : > { %724 = vrot.lane.b32.xlu0 %v6145_v10, %s7436_s16  ;;  %726 = vrot.lane.b32.xlu1 %v6146_v12, %s7436_s16 }
  0x84   : > { %728 = vrot.lane.b32.xlu0 %v6147_v9, %s7436_s16  ;;  %730 = vrot.lane.b32.xlu1 %v6148_v11, %s7436_s16 }
  0x88   : > { %834 = vrot.lane.b32.xlu0 %v6145_v10, %s7437_s18  ;;  %836 = vrot.lane.b32.xlu1 %v6146_v12, %s7437_s18 }
  0x8c   : > { %838 = vrot.lane.b32.xlu0 %v6147_v9, %s7437_s18  ;;  %840 = vrot.lane.b32.xlu1 %v6148_v11, %s7437_s18 }
  0x90   : > { %1052 = vrot.lane.b32.xlu0 %v7720_v14, %s7438_s28  ;;  %1054 = vrot.lane.b32.xlu1 %v7724_v15, %s7438_s28 }
  0x94   : > { %1056 = vrot.lane.b32.xlu0 %v7730_v16, %s7438_s28  ;;  %1159 = vrot.lane.b32.xlu1 %v7720_v14, %s7439_s20 }
  0x98   : > { %1163 = vrot.lane.b32.xlu1 %v7730_v16, %s7439_s20  ;;  %1161 = vrot.lane.b32.xlu0 %v7724_v15, %s7439_s20 }
  0x9c   : > { %1266 = vrot.lane.b32.xlu0 %v7720_v14, %s7440_s17  ;;  %1268 = vrot.lane.b32.xlu1 %v7724_v15, %s7440_s17 }
  0xa0   : > { %1270 = vrot.lane.b32.xlu0 %v7730_v16, %s7440_s17  ;;  %1373 = vrot.lane.b32.xlu1 %v7720_v14, %s7441_s15 }
  0xa4   : > { %1377 = vrot.lane.b32.xlu1 %v7730_v16, %s7441_s15  ;;  %1375 = vrot.lane.b32.xlu0 %v7724_v15, %s7441_s15  ;;  %v6171_v16 = vld [vmem:[%s9172_s2 + $0x14] sm:$0xf] }
  0xa8   : > { %486 = vperm.xlu0 %7261, %v483_v17  }
  0xe2   : > { %v507_v18 = vpop.permute.xlu1 %506  ;;  %v503_v19 = vpop.permute.xlu0 %502 }
  0xe6   : > { %v509_v20 = vpop.permute.xlu1 %508  ;;  %v505_v21 = vpop.permute.xlu0 %504 }
  0xe7   : > { %v512_v22 = vsel %vm510_vm5, %v505_v21, %v507_v18  ;;  %v511_v23 = vsel %vm510_vm5, %v503_v19, %v505_v21  ;;  %v513_v24 = vsel %vm510_vm5, %v507_v18, %v509_v20 }
  0xe8   : > { %6149 = vmatprep.subr.msk.bf16.mxu0 %vm518_vm6, %v512_v22  ;;  %v520_v25 = vsel %vm518_vm6, %v511_v23, 0  ;;  %v526_v26 = vsel %vm518_vm6, %v513_v24, 0  ;;  %v6175_v24 = vld [vmem:[%s9172_s2 + $0x18] sm:$0xf] }
  0xe9   : > { %529 = vmatpush1.bf16.msra.mxu0 %v520_v25  ;;  %6513 = vmatpush3.bf16.msra.mxu1 %v526_v26 }
  0xea   : > { %v617_v28 = vpop.permute.xlu1 %616  ;;  %v615_v29 = vpop.permute.xlu0 %614  ;;  %6518 = vmatprep.subr.bf16.mxu1 %v7432_v6 }
  0xeb   : > { %v623_v30 = vsel %vm622_vm7, %v615_v29, %v617_v28 }
  0xec   : > { %6150 = vmatmul.mubr.msk.bf16.vlgmr.msra.gmra.mrb[0].mxu0 %vm514_vm8, %v489_v27  ;;  %6515 = vmatmul.mubr.msk.bf16.vlgmr.msra.gmra.mrb[0].mxu1 %vm514_vm8, %v489_v27  ;;  %v630_v31 = vsel %vm518_vm6, %v623_v30, 0 }
  0xed   : > { %670 = vmatprep.mubr.bf16.mxu0 %v7431_v0  ;;  %6520 = vmatprep.mubr.msk.bf16.mxu1 %vm7433_vm4, %v7432_v6 }
  0xee   : > { %v621_v32 = vpop.permute.xlu1 %620  ;;  %v619_v33 = vpop.permute.xlu0 %618 }
  0xef   : > { %v625_v34 = vsel %vm622_vm7, %v619_v33, %v621_v32  ;;  %v624_v35 = vsel %vm622_vm7, %v617_v28, %v619_v33 }
  0xf0   : > { %6153 = vmatprep.subr.msk.bf16.mxu0 %vm518_vm6, %v624_v35  ;;  %v636_v36 = vsel %vm518_vm6, %v625_v34, 0  ;;  %v6183_v34 = vld [vmem:[%s9172_s2 + $0x20] sm:$0xf]  ;;  %v1488_v35 = vlaneseq }
  0xf1   : > { %639 = vmatpush1.bf16.msra.mxu0 %v630_v31  ;;  %6519 = vmatpush3.bf16.msra.mxu1 %v636_v36  ;;  %v6179_v31 = vld [vmem:[%s9172_s2 + $0x1c] sm:$0xf] }
  0xf2   : > { %v725_v37 = vpop.permute.xlu0 %724  ;;  %v727_v38 = vpop.permute.xlu1 %726  ;;  %6524 = vmatprep.subr.bf16.mxu1 %v7432_v6  ;;  %v1489_v36 = vshrl.u32 %v1488_v35, 7 }
  0xf3   : > { %v733_v39 = vsel %vm732_vm9, %v725_v37, %v727_v38 }
  0xf4   : > { %v740_v44 = vsel %vm518_vm6, %v733_v39, 0  ;;  %v1498_v37 = vsub.s32 2, %v1489_v36  ;;  %v1490_v39 = vsub.s32 0, %v1489_v36 }
  0xf6   : > { %v729_v41 = vpop.permute.xlu0 %728  ;;  %v731_v42 = vpop.permute.xlu1 %730 }
  0xf7   : > { %v734_v43 = vsel %vm732_vm9, %v727_v38, %v729_v41  ;;  %v735_v45 = vsel %vm732_vm9, %v729_v41, %v731_v42  ;;  %v463_v41 = vld [vmem:[#allocation6] sm:$0x7] }
  0xf8   : > { %6154 = vmatmul.mubr.msk.bf16.vlgmr.msra.gmra.mrb[0].mxu0 %vm514_vm8, %v6152_v40  ;;  %6521 = vmatmul.mubr.msk.bf16.vlgmr.msra.gmra.mrb[0].mxu1 %vm514_vm8, %v6152_v40  ;;  %v746_v46 = vsel %vm518_vm6, %v735_v45, 0  ;;  %v1494_v40 = vsub.s32 1, %v1489_v36 }
  0xf9   : > { %6157 = vmatprep.subr.msk.bf16.mxu0 %vm518_vm6, %v734_v43  ;;  %6525 = vmatpush3.bf16.msra.mxu1 %v746_v46 }
  0xfa   : > { %749 = vmatpush1.bf16.msra.mxu0 %v740_v44  ;;  %v835_v47 = vpop.permute.xlu0 %834  ;;  %v837_v48 = vpop.permute.xlu1 %836  ;;  %780 = vmatprep.mubr.bf16.mxu0 %v7431_v0 }
  0xfb   : > { %6526 = vmatprep.mubr.msk.bf16.mxu1 %vm7433_vm4, %v7432_v6  ;;  %6530 = vmatprep.subr.bf16.mxu1 %v7432_v6  ;;  %v843_v51 = vsel %vm842_vm10, %v835_v47, %v837_v48 }
  0xfc   : > { %v850_v55 = vsel %vm518_vm6, %v843_v51, 0  ;;  %v7890_v51 = vrot.slane %v463_v41, %v1494_v40 }
  0xfe   : > { %v839_v49 = vpop.permute.xlu0 %838  ;;  %v841_v50 = vpop.permute.xlu1 %840 }
  0xff   : > { %v844_v52 = vsel %vm842_vm10, %v837_v48, %v839_v49  ;;  %v845_v53 = vsel %vm842_vm10, %v839_v49, %v841_v50  ;;  %v7886_v48 = vrot.slane %v463_v41, %v1498_v37  ;;  %v7888_v50 = vrot.slane %v463_v41, %v1490_v39 }
 0x100   : > { %6161 = vmatprep.subr.msk.bf16.mxu0 %vm518_vm6, %v844_v52  ;;  %v856_v56 = vsel %vm518_vm6, %v845_v53, 0 }
 0x102   : > { %v1053_v57 = vpop.permute.xlu0 %1052  ;;  %v1055_v59 = vpop.permute.xlu1 %1054 }
 0x103   : > { %v1059_v2 = vsel %vm1058_vm11, %v1053_v57, %v1055_v59 }
 0x104   : > { %6158 = vmatmul.mubr.msk.bf16.vlgmr.msra.gmra.mrb[0].mxu0 %vm514_vm8, %v6156_v54  ;;  %6527 = vmatmul.mubr.msk.bf16.vlgmr.msra.gmra.mrb[0].mxu1 %vm514_vm8, %v6156_v54  ;;  %v1065_v10 = vsel %vm518_vm6, %v1059_v2, 0 }
 0x105   : > { %859 = vmatpush1.bf16.msra.mxu0 %v850_v55  ;;  %6531 = vmatpush3.bf16.msra.mxu1 %v856_v56 }
 0x106   : > { %890 = vmatprep.mubr.bf16.mxu0 %v7431_v0  ;;  %6532 = vmatprep.mubr.msk.bf16.mxu1 %vm7433_vm4, %v7432_v6  ;;  %v1057_v60 = vpop.permute.xlu0 %1056  ;;  %v1160_v1 = vpop.permute.xlu1 %1159 }
 0x107   : > { %6168 = vmatprep.subr.msk.bf16.mxu0 %vm518_vm6, %v7724_v15  ;;  %6536 = vmatprep.subr.bf16.mxu1 %v7432_v6  ;;  %v1060_v63 = vsel %vm1058_vm11, %v1055_v59, %v1057_v60  ;;  %v1071_v11 = vsel %vm518_vm6, %v1057_v60, 0 }
 0x10a   : > { %v1164_v5 = vpop.permute.xlu1 %1163  ;;  %v1162_v9 = vpop.permute.xlu0 %1161 }
 0x10b   : > { %v1167_v12 = vsel %vm1165_vm12, %v1162_v9, %v1164_v5  ;;  %v1166_v15 = vsel %vm1165_vm12, %v1160_v1, %v1162_v9  ;;  %v1178_v20 = vsel %vm518_vm6, %v1164_v5, 0 }
 0x10c   : > { %v1172_v19 = vsel %vm518_vm6, %v1166_v15, 0 }
 0x10e   : > { %v1267_v14 = vpop.permute.xlu0 %1266  ;;  %v1269_v17 = vpop.permute.xlu1 %1268 }
 0x10f   : > { %v1273_v23 = vsel %vm1272_vm13, %v1267_v14, %v1269_v17 }
 0x110   : > { %6162 = vmatmul.mubr.msk.bf16.vlgmr.msra.gmra.mrb[0].mxu0 %vm514_vm8, %v6160_v58  ;;  %6533 = vmatmul.mubr.msk.bf16.vlgmr.msra.gmra.mrb[0].mxu1 %vm514_vm8, %v6160_v58  ;;  %v1279_v27 = vsel %vm518_vm6, %v1273_v23, 0 }
 0x111   : > { %967 = vmatpush1.bf16.msra.mxu0 %v958_v61  ;;  %6537 = vmatpush3.bf16.msra.mxu1 %v964_v62 }
 0x112   : > { %998 = vmatprep.mubr.bf16.mxu0 %v7431_v0  ;;  %6538 = vmatprep.mubr.msk.bf16.mxu1 %vm7433_vm4, %v7432_v6  ;;  %v1271_v18 = vpop.permute.xlu0 %1270  ;;  %v1374_v22 = vpop.permute.xlu1 %1373 }
 0x113   : > { %6172 = vmatprep.subr.msk.bf16.mxu0 %vm518_vm6, %v1060_v63  ;;  %6542 = vmatprep.subr.bf16.mxu1 %v7432_v6  ;;  %v1274_v21 = vsel %vm1272_vm13, %v1269_v17, %v1271_v18  ;;  %v1285_v28 = vsel %vm518_vm6, %v1271_v18, 0 }
 0x116   : > { %v1378_v25 = vpop.permute.xlu1 %1377  ;;  %v1376_v26 = vpop.permute.xlu0 %1375 }
 0x117   : > { %v1381_v29 = vsel %vm1379_vm14, %v1376_v26, %v1378_v25  ;;  %v1380_v30 = vsel %vm1379_vm14, %v1374_v22, %v1376_v26  ;;  %v1392_v33 = vsel %vm518_vm6, %v1378_v25, 0  ;;  %v1528_v22 = vld [vmem:[%s9173_s3] sm:$0xf] }
 0x118   : > { %v1386_v32 = vsel %vm518_vm6, %v1380_v30, 0 }
 0x11c   : > { %6169 = vmatmul.mubr.msk.bf16.vlgmr.msra.gmra.mrb[0].mxu0 %vm514_vm8, %v6164_v4  ;;  %6539 = vmatmul.mubr.msk.bf16.vlgmr.msra.gmra.mrb[0].mxu1 %vm514_vm8, %v6164_v4 }
 0x11d   : > { %1074 = vmatpush1.bf16.msra.mxu0 %v1065_v10  ;;  %6543 = vmatpush3.bf16.msra.mxu1 %v1071_v11 }
 0x11e   : > { %1105 = vmatprep.mubr.bf16.mxu0 %v7431_v0  ;;  %6544 = vmatprep.mubr.msk.bf16.mxu1 %vm7433_vm4, %v7432_v6 }
 0x11f   : > { %6176 = vmatprep.subr.msk.bf16.mxu0 %vm518_vm6, %v1167_v12  ;;  %6548 = vmatprep.subr.bf16.mxu1 %v7432_v6 }
 0x127   : > { %v487_v38 = vpop.permute.xlu0 %486 }
 0x128   : > { %6173 = vmatmul.mubr.msk.bf16.vlgmr.msra.gmra.mrb[0].mxu0 %vm514_vm8, %v6171_v16  ;;  %6545 = vmatmul.mubr.msk.bf16.vlgmr.msra.gmra.mrb[0].mxu1 %vm514_vm8, %v6171_v16 }
 0x129   : > { %1181 = vmatpush1.bf16.msra.mxu0 %v1172_v19  ;;  %6549 = vmatpush3.bf16.msra.mxu1 %v1178_v20 }
 0x12a   : > { %1212 = vmatprep.mubr.bf16.mxu0 %v7431_v0  ;;  %6550 = vmatprep.mubr.msk.bf16.mxu1 %vm7433_vm4, %v7432_v6 }
 0x12b   : > { %6180 = vmatprep.subr.msk.bf16.mxu0 %vm518_vm6, %v1274_v21  ;;  %6554 = vmatprep.subr.bf16.mxu1 %v7432_v6 }
 0x134   : > { %6177 = vmatmul.mubr.msk.bf16.vlgmr.msra.gmra.mrb[0].mxu0 %vm514_vm8, %v6175_v24  ;;  %6551 = vmatmul.mubr.msk.bf16.vlgmr.msra.gmra.mrb[0].mxu1 %vm514_vm8, %v6175_v24 }
 0x135   : > { %1288 = vmatpush1.bf16.msra.mxu0 %v1279_v27  ;;  %6555 = vmatpush3.bf16.msra.mxu1 %v1285_v28 }
 0x136   : > { %1319 = vmatprep.mubr.bf16.mxu0 %v7431_v0  ;;  %6556 = vmatprep.mubr.msk.bf16.mxu1 %vm7433_vm4, %v7432_v6 }
 0x137   : > { %6184 = vmatprep.subr.msk.bf16.mxu0 %vm518_vm6, %v1381_v29  ;;  %6560 = vmatprep.subr.bf16.mxu1 %v7432_v6 }
 0x140   : > { %6181 = vmatmul.mubr.msk.bf16.vlgmr.msra.gmra.mrb[0].mxu0 %vm514_vm8, %v6179_v31  ;;  %6557 = vmatmul.mubr.msk.bf16.vlgmr.msra.gmra.mrb[0].mxu1 %vm514_vm8, %v6179_v31 }
 0x141   : > { %1395 = vmatpush1.bf16.msra.mxu0 %v1386_v32  ;;  %6561 = vmatpush3.bf16.msra.mxu1 %v1392_v33  ;;  %v6195_v33 = vld [vmem:[%s9173_s3 + $0x4] sm:$0xf] }
 0x142   : > { %1426 = vmatprep.mubr.bf16.mxu0 %v7431_v0  ;;  %6562 = vmatprep.mubr.msk.bf16.mxu1 %vm7433_vm4, %v7432_v6 }
 0x143   : > { %6566 = vmatprep.subr.bf16.mxu1 %v7432_v6 }
 0x14c   : > { %6185 = vmatmul.mubr.msk.bf16.vlgmr.msra.gmra.mrb[0].mxu0 %vm514_vm8, %v6183_v34  ;;  %6563 = vmatmul.mubr.msk.bf16.vlgmr.msra.gmra.mrb[0].mxu1 %vm514_vm8, %v6183_v34 }
 0x14d   : > { %1599 = vmatprep.mubr.bf16.mxu0 %v7431_v0  ;;  %6568 = vmatprep.mubr.msk.bf16.mxu1 %vm7433_vm4, %v7432_v6 }
 0x21f   : > { %v1428_v42 = vpop.f32.mrb[0].mxu0  ;;  %v1469_v43 = vpop.f32.mrb[0].mxu1 }
 0x220   : > { %v6854_v44 = vadd.f32 %v1428_v42, %v487_v38  ;;  %v6856_v45 = vadd.f32 %v1469_v43, %v487_v38  ;;  %v1430_v46 = vpop.f32.mrb[1].mxu0  ;;  %v6564_v47 = vpop.f32.mrb[1].mxu1  ;;  %v6198_v43 = vld [vmem:[%s9173_s3 + $0x8] sm:$0xf] }
 0x221   : > { %v6855_v49 = vadd.f32 %v1430_v46, %v487_v38  ;;  %v1432_v52 = vpop.f32.mrb[2].mxu0  ;;  %v1472_v53 = vpop.f32.mrb[2].mxu1  ;;  %v6201_v47 = vld [vmem:[%s9173_s3 + $0xc] sm:$0xf] }
 0x222   : > { %vm1478_vm15 = vcmp.ge.f32.partialorder %v6854_v44, 0.0  ;;  %vm1480_vm0 = vcmp.ge.f32.partialorder %v6856_v45, 0.0  ;;  %v1481_v54 = vmul.f32 0.2, %v6854_v44  ;;  %v1483_v55 = vmul.f32 0.2, %v6856_v45 }
 0x223   : > { %vm1479_vm1 = vcmp.ge.f32.partialorder %v6855_v49, 0.0  ;;  %v1482_v56 = vmul.f32 0.2, %v6855_v49  ;;  %v1433_v57 = vpop.f32.mrb[3].mxu0  ;;  %v6565_v58 = vpop.f32.mrb[3].mxu1 }
 0x224   : > { %v1484_v59 = vsel %vm1478_vm15, %v6854_v44, %v1481_v54  ;;  %v1486_v60 = vsel %vm1480_vm0, %v6856_v45, %v1483_v55  ;;  %v6204_v55 = vld [vmem:[%s9173_s3 + $0x10] sm:$0xf] }
 0x225   : > { %v1505_v61 = vmul.f32 %v7886_v48, %v1486_v60  ;;  %v1485_v62 = vsel %vm1479_vm1, %v6855_v49, %v1482_v56  ;;  %v1503_v63 = vmul.f32 %v7888_v50, %v1484_v59  ;;  %vm2560_vm1 = vcmask 195584  }
 0x226   : > { %v1504_v1 = vmul.f32 %v7890_v51, %v1485_v62 }
 0x227   : > { %v6379_v2 = vpack.c.bf16 %v1505_v61, %v1505_v61  ;;  %v6210_v61 = vld [vmem:[%s9173_s3 + $0x14] sm:$0xf] }
 0x228   : > { %v6378_v4 = vpack.c.bf16 %v1504_v1, %v1503_v63 }
 0x229   : > { %1521 = vst.msk [vmem:[#allocation2 + $0x20] sm:$0xf] %vm1520_vm2, %v6379_v2 }
 0x22a   : > { %1519 = vst [vmem:[#allocation2 + $0x18] sm:$0xff] %v6378_v4  ;;  %v7952_v14 = vcombine.low %v7714_v13, %v6378_v4 }
 0x230   : > { %v7958_v15 = vld [vmem:[#allocation2 + $0xc] ss:$20 sps:$4 sm:$0xff]  }
 0x231   : > { %v7896_v5 = vld [vmem:[#allocation2 + $0x14] sm:$0xff]  ;;  %v7906_v11 = vld [vmem:[#allocation2 + $0x1c] sm:$0xff] }
 0x232   : > { %v7900_v9 = vcombine.high %v7690_v8, %v7896_v5  ;;  %v7904_v10 = vcombine.low %v7690_v8, %v7896_v5  ;;  %v7914_v12 = vcombine.low %v7688_v7, %v7906_v11  ;;  %v7922_v8 = vcombine.high %v7688_v7, %v7906_v11 }
 0x233   : > { %v7945_v7 = vcombine.high %v7714_v13, %v6378_v4  ;;  %v1522_v13 = vld [vmem:[%s9178_s8] sm:$0xff] }
 0x234   : > { %1551 = vrot.lane.b32.xlu1 %v7900_v9, %s7434_s27  ;;  %1549 = vrot.lane.b32.xlu0 %v7904_v10, %s7434_s27 }
 0x238   : > { %1553 = vrot.lane.b32.xlu1 %v7914_v12, %s7434_s27  ;;  %1655 = vrot.lane.b32.xlu0 %v7900_v9, %s7435_s29 }
 0x23c   : > { %1555 = vrot.lane.b32.xlu1 %v7922_v8, %s7434_s27  ;;  %1653 = vrot.lane.b32.xlu0 %v7904_v10, %s7435_s29 }
 0x240   : > { %1657 = vrot.lane.b32.xlu1 %v7914_v12, %s7435_s29  ;;  %1758 = vrot.lane.b32.xlu0 %v7900_v9, %s7436_s16 }
 0x244   : > { %1659 = vrot.lane.b32.xlu1 %v7922_v8, %s7435_s29  ;;  %1756 = vrot.lane.b32.xlu0 %v7904_v10, %s7436_s16 }
 0x248   : > { %1760 = vrot.lane.b32.xlu1 %v7914_v12, %s7436_s16  ;;  %1861 = vrot.lane.b32.xlu0 %v7900_v9, %s7437_s18 }
 0x24c   : > { %1762 = vrot.lane.b32.xlu1 %v7922_v8, %s7436_s16  ;;  %1859 = vrot.lane.b32.xlu0 %v7904_v10, %s7437_s18 }
 0x250   : > { %1863 = vrot.lane.b32.xlu1 %v7914_v12, %s7437_s18  ;;  %2073 = vrot.lane.b32.xlu0 %v7945_v7, %s7438_s28 }
 0x254   : > { %1865 = vrot.lane.b32.xlu1 %v7922_v8, %s7437_s18  ;;  %2071 = vrot.lane.b32.xlu0 %v7952_v14, %s7438_s28 }
 0x258   : > { %2075 = vrot.lane.b32.xlu1 %v7958_v15, %s7438_s28  ;;  %2175 = vrot.lane.b32.xlu0 %v7958_v15, %s7439_s20 }
 0x25c   : > { %2173 = vrot.lane.b32.xlu1 %v7945_v7, %s7439_s20  ;;  %2273 = vrot.lane.b32.xlu0 %v7945_v7, %s7440_s17 }
 0x260   : > { %2171 = vrot.lane.b32.xlu1 %v7952_v14, %s7439_s20  ;;  %2271 = vrot.lane.b32.xlu0 %v7952_v14, %s7440_s17 }
 0x264   : > { %2275 = vrot.lane.b32.xlu1 %v7958_v15, %s7440_s17  ;;  %2375 = vrot.lane.b32.xlu0 %v7958_v15, %s7441_s15 }
 0x268   : > { %2373 = vrot.lane.b32.xlu1 %v7945_v7, %s7441_s15  ;;  %1525 = vperm.xlu0 %7261, %v1522_v13  }
 0x26c   : > { %2371 = vrot.lane.b32.xlu1 %v7952_v14, %s7441_s15  ;;  %2539 = vrot.lane.b32.xlu0 %v7914_v12, %s7434_s27 }
 0x270   : > { %2537 = vrot.lane.b32.xlu1 %v7900_v9, %s7434_s27  ;;  %2541 = vrot.lane.b32.xlu0 %v7922_v8, %s7434_s27 }
 0x274   : > { %2535 = vrot.lane.b32.xlu1 %v7904_v10, %s7434_s27  ;;  %2663 = vrot.lane.b32.xlu0 %v7914_v12, %s7435_s29 }
 0x278   : > { %2661 = vrot.lane.b32.xlu1 %v7900_v9, %s7435_s29  ;;  %2665 = vrot.lane.b32.xlu0 %v7922_v8, %s7435_s29 }
 0x27c   : > { %2659 = vrot.lane.b32.xlu1 %v7904_v10, %s7435_s29  ;;  %2786 = vrot.lane.b32.xlu0 %v7914_v12, %s7436_s16 }
 0x280   : > { %2784 = vrot.lane.b32.xlu1 %v7900_v9, %s7436_s16 }
 0x2a6   : > { %v1552_v16 = vpop.permute.xlu1 %1551  ;;  %v1550_v17 = vpop.permute.xlu0 %1549 }
 0x2a7   : > { %v1557_v21 = vsel %vm510_vm5, %v1550_v17, %v1552_v16 }
 0x2aa   : > { %v1554_v18 = vpop.permute.xlu1 %1553  ;;  %v1656_v19 = vpop.permute.xlu0 %1655 }
 0x2ab   : > { %v1558_v20 = vsel %vm510_vm5, %v1552_v16, %v1554_v18 }
 0x2ac   : > { %1567 = vmatprep.subr.bf16.mxu0 %v1558_v20 }
 0x2ad   : > { %1568 = vmatpush1.bf16.msra.mxu0 %v1557_v21  ;;  %v6216_v21 = vld [vmem:[%s9173_s3 + $0x1c] sm:$0xf] }
 0x2ae   : > { %v1556_v23 = vpop.permute.xlu1 %1555  ;;  %v1654_v24 = vpop.permute.xlu0 %1653 }
 0x2af   : > { %v1559_v25 = vsel %vm510_vm5, %v1554_v18, %v1556_v23  ;;  %v1661_v29 = vsel %vm622_vm7, %v1654_v24, %v1656_v19 }
 0x2b0   : > { %6193 = vmatmul.mubr.msk.bf16.vlgmr.msra.gmra.mrb[4].mxu0 %vm1563_vm3, %v1528_v22  ;;  %6567 = vmatpush3.bf16.msra.mxu1 %v1559_v25 }
 0x2b1   : > { %6572 = vmatprep.subr.bf16.mxu1 %v7432_v6  ;;  %1702 = vmatprep.mubr.bf16.mxu0 %v7431_v0 }
 0x2b2   : > { %v1658_v26 = vpop.permute.xlu1 %1657  ;;  %v1759_v27 = vpop.permute.xlu0 %1758 }
 0x2b3   : > { %6569 = vmatmul.mubr.msk.bf16.vlgmr.msra.gmra.mrb[4].mxu1 %vm1563_vm3, %v1528_v22  ;;  %v1662_v28 = vsel %vm622_vm7, %v1656_v19, %v1658_v26 }
 0x2b4   : > { %1670 = vmatprep.subr.bf16.mxu0 %v1662_v28  ;;  %6574 = vmatprep.mubr.msk.bf16.mxu1 %vm7433_vm4, %v7432_v6 }
 0x2b5   : > { %1671 = vmatpush1.bf16.msra.mxu0 %v1661_v29 }
 0x2b6   : > { %v1660_v30 = vpop.permute.xlu1 %1659  ;;  %v1757_v32 = vpop.permute.xlu0 %1756 }
 0x2b7   : > { %v1663_v31 = vsel %vm622_vm7, %v1658_v26, %v1660_v30  ;;  %v1764_v36 = vsel %vm732_vm9, %v1757_v32, %v1759_v27 }
 0x2b8   : > { %6573 = vmatpush3.bf16.msra.mxu1 %v1663_v31 }
 0x2b9   : > { %6578 = vmatprep.subr.bf16.mxu1 %v7432_v6 }
 0x2ba   : > { %v1761_v34 = vpop.permute.xlu1 %1760  ;;  %v1862_v38 = vpop.permute.xlu0 %1861 }
 0x2bb   : > { %v1765_v35 = vsel %vm732_vm9, %v1759_v27, %v1761_v34  ;;  %v6219_v27 = vld [vmem:[%s9173_s3 + $0x20] sm:$0xf] }
 0x2bc   : > { %6196 = vmatmul.mubr.msk.bf16.vlgmr.msra.gmra.mrb[4].mxu0 %vm1563_vm3, %v6195_v33  ;;  %1773 = vmatprep.subr.bf16.mxu0 %v1765_v35 }
 0x2bd   : > { %1774 = vmatpush1.bf16.msra.mxu0 %v1764_v36  ;;  %1805 = vmatprep.mubr.bf16.mxu0 %v7431_v0 }
 0x2be   : > { %v1763_v37 = vpop.permute.xlu1 %1762  ;;  %v1860_v42 = vpop.permute.xlu0 %1859 }
 0x2bf   : > { %v1766_v39 = vsel %vm732_vm9, %v1761_v34, %v1763_v37  ;;  %6575 = vmatmul.mubr.msk.bf16.vlgmr.msra.gmra.mrb[4].mxu1 %vm1563_vm3, %v6195_v33  ;;  %v1867_v44 = vsel %vm842_vm10, %v1860_v42, %v1862_v38 }
 0x2c0   : > { %6579 = vmatpush3.bf16.msra.mxu1 %v1766_v39  ;;  %6580 = vmatprep.mubr.msk.bf16.mxu1 %vm7433_vm4, %v7432_v6 }
 0x2c1   : > { %6584 = vmatprep.subr.bf16.mxu1 %v7432_v6 }
 0x2c2   : > { %v1864_v40 = vpop.permute.xlu1 %1863  ;;  %v2074_v52 = vpop.permute.xlu0 %2073 }
 0x2c3   : > { %v1868_v41 = vsel %vm842_vm10, %v1862_v38, %v1864_v40 }
 0x2c4   : > { %1876 = vmatprep.subr.bf16.mxu0 %v1868_v41 }
 0x2c6   : > { %v1866_v45 = vpop.permute.xlu1 %1865  ;;  %v2072_v54 = vpop.permute.xlu0 %2071 }
 0x2c7   : > { %v1869_v46 = vsel %vm842_vm10, %v1864_v40, %v1866_v45  ;;  %v2077_v57 = vsel %vm1058_vm11, %v2072_v54, %v2074_v52 }
 0x2c8   : > { %6199 = vmatmul.mubr.msk.bf16.vlgmr.msra.gmra.mrb[4].mxu0 %vm1563_vm3, %v6198_v43 }
 0x2c9   : > { %1877 = vmatpush1.bf16.msra.mxu0 %v1867_v44  ;;  %1908 = vmatprep.mubr.bf16.mxu0 %v7431_v0 }
 0x2ca   : > { %1985 = vmatprep.subr.bf16.mxu0 %v7945_v7  ;;  %v2076_v49 = vpop.permute.xlu1 %2075  ;;  %v2176_v58 = vpop.permute.xlu0 %2175 }
 0x2cb   : > { %6581 = vmatmul.mubr.msk.bf16.vlgmr.msra.gmra.mrb[4].mxu1 %vm1563_vm3, %v6198_v43  ;;  %v2078_v53 = vsel %vm1058_vm11, %v2074_v52, %v2076_v49 }
 0x2cc   : > { %6585 = vmatpush3.bf16.msra.mxu1 %v1869_v46  ;;  %6586 = vmatprep.mubr.msk.bf16.mxu1 %vm7433_vm4, %v7432_v6 }
 0x2cd   : > { %6590 = vmatprep.subr.bf16.mxu1 %v7432_v6 }
 0x2ce   : > { %v2174_v56 = vpop.permute.xlu1 %2173  ;;  %v2274_v63 = vpop.permute.xlu0 %2273 }
 0x2cf   : > { %v2178_v59 = vsel %vm1165_vm12, %v2174_v56, %v2176_v58 }
 0x2d2   : > { %v2172_v60 = vpop.permute.xlu1 %2171  ;;  %v2272_v4 = vpop.permute.xlu0 %2271 }
 0x2d3   : > { %v2177_v1 = vsel %vm1165_vm12, %v2172_v60, %v2174_v56  ;;  %v2277_v16 = vsel %vm1272_vm13, %v2272_v4, %v2274_v63 }
 0x2d4   : > { %6202 = vmatmul.mubr.msk.bf16.vlgmr.msra.gmra.mrb[4].mxu0 %vm1563_vm3, %v6201_v47 }
 0x2d5   : > { %1986 = vmatpush1.bf16.msra.mxu0 %v7952_v14  ;;  %2017 = vmatprep.mubr.bf16.mxu0 %v7431_v0 }
 0x2d6   : > { %2085 = vmatprep.subr.bf16.mxu0 %v2078_v53  ;;  %v2276_v62 = vpop.permute.xlu1 %2275  ;;  %v2376_v17 = vpop.permute.xlu0 %2375 }
 0x2d7   : > { %6587 = vmatmul.mubr.msk.bf16.vlgmr.msra.gmra.mrb[4].mxu1 %vm1563_vm3, %v6201_v47  ;;  %v2278_v2 = vsel %vm1272_vm13, %v2274_v63, %v2276_v62  ;;  %v2496_v63 = vld [vmem:[%s9179_s9] sm:$0xff] }
 0x2d8   : > { %6591 = vmatpush3.bf16.msra.mxu1 %v7958_v15  ;;  %6592 = vmatprep.mubr.msk.bf16.mxu1 %vm7433_vm4, %v7432_v6  ;;  %v6213_v15 = vld [vmem:[%s9173_s3 + $0x18] sm:$0xf] }
 0x2d9   : > { %6596 = vmatprep.subr.bf16.mxu1 %v7432_v6 }
 0x2da   : > { %v2374_v13 = vpop.permute.xlu1 %2373 }
 0x2db   : > { %v2378_v18 = vsel %vm1379_vm14, %v2374_v13, %v2376_v17 }
 0x2de   : > { %v2372_v20 = vpop.permute.xlu1 %2371 }
 0x2df   : > { %v2377_v23 = vsel %vm1379_vm14, %v2372_v20, %v2374_v13 }
 0x2e0   : > { %6208 = vmatmul.mubr.msk.bf16.vlgmr.msra.gmra.mrb[4].mxu0 %vm1563_vm3, %v6204_v55 }
 0x2e1   : > { %2086 = vmatpush1.bf16.msra.mxu0 %v2077_v57  ;;  %2117 = vmatprep.mubr.bf16.mxu0 %v7431_v0 }
 0x2e2   : > { %2185 = vmatprep.subr.bf16.mxu0 %v2178_v59  ;;  %v2538_v24 = vpop.permute.xlu1 %2537 }
 0x2e3   : > { %6593 = vmatmul.mubr.msk.bf16.vlgmr.msra.gmra.mrb[4].mxu1 %vm1563_vm3, %v6204_v55 }
 0x2e4   : > { %6597 = vmatpush3.bf16.msra.mxu1 %v2076_v49  ;;  %6598 = vmatprep.mubr.msk.bf16.mxu1 %vm7433_vm4, %v7432_v6 }
 0x2e5   : > { %6602 = vmatprep.subr.bf16.mxu1 %v7432_v6 }
 0x2e6   : > { %v2536_v26 = vpop.permute.xlu1 %2535 }
 0x2e7   : > { %v1526_v19 = vpop.permute.xlu0 %1525  ;;  %v2551_v28 = vsel %vm510_vm5, %v2536_v26, %v2538_v24 }
 0x2ea   : > { %v2662_v13 = vpop.permute.xlu1 %2661 }
 0x2eb   : > { %v2540_v22 = vpop.permute.xlu0 %2539 }
 0x2ec   : > { %6211 = vmatmul.mubr.msk.bf16.vlgmr.msra.gmra.mrb[4].mxu0 %vm1563_vm3, %v6210_v61  ;;  %v2552_v25 = vsel %vm510_vm5, %v2538_v24, %v2540_v22 }
 0x2ed   : > { %2186 = vmatpush1.bf16.msra.mxu0 %v2177_v1  ;;  %2217 = vmatprep.mubr.bf16.mxu0 %v7431_v0 }
 0x2ee   : > { %2285 = vmatprep.subr.bf16.mxu0 %v2278_v2  ;;  %v8230_v2 = vld [vmem:[#allocation2 + $0x8] sm:$0xff] }
 0x2ef   : > { %6599 = vmatmul.mubr.msk.bf16.vlgmr.msra.gmra.mrb[4].mxu1 %vm1563_vm3, %v6210_v61  ;;  %v2542_v29 = vpop.permute.xlu0 %2541 }
 0x2f0   : > { %6603 = vmatpush3.bf16.msra.mxu1 %v2176_v58  ;;  %6604 = vmatprep.mubr.msk.bf16.mxu1 %vm7433_vm4, %v7432_v6  ;;  %v2553_v30 = vsel %vm510_vm5, %v2540_v22, %v2542_v29 }
 0x2f1   : > { %6608 = vmatprep.subr.bf16.mxu1 %v7432_v6 }
 0x2f8   : > { %6214 = vmatmul.mubr.msk.bf16.vlgmr.msra.gmra.mrb[4].mxu0 %vm1563_vm3, %v6213_v15 }
 0x2f9   : > { %2286 = vmatpush1.bf16.msra.mxu0 %v2277_v16  ;;  %2317 = vmatprep.mubr.bf16.mxu0 %v7431_v0  ;;  %v2664_v16 = vpop.permute.xlu0 %2663 }
 0x2fa   : > { %2385 = vmatprep.subr.bf16.mxu0 %v2378_v18  ;;  %v2676_v29 = vsel %vm622_vm7, %v2662_v13, %v2664_v16 }
 0x2fb   : > { %6605 = vmatmul.mubr.msk.bf16.vlgmr.msra.gmra.mrb[4].mxu1 %vm1563_vm3, %v6213_v15  ;;  %v8240_v15 = vcombine.low %v8230_v2, %v7906_v11 }
 0x2fc   : > { %6609 = vmatpush3.bf16.msra.mxu1 %v2276_v62  ;;  %6610 = vmatprep.mubr.msk.bf16.mxu1 %vm7433_vm4, %v7432_v6  ;;  %v8217_v62 = vld [vmem:[#allocation2] sm:$0xff] }
 0x2fd   : > { %6614 = vmatprep.subr.bf16.mxu1 %v7432_v6  ;;  %v8228_v1 = vcombine.high %v8217_v62, %v7896_v5  ;;  %v8236_v4 = vcombine.low %v8217_v62, %v7896_v5  ;;  %v2660_v5 = vpop.permute.xlu1 %2659  ;;  %v2666_v18 = vpop.permute.xlu0 %2665 }
 0x304   : > { %6217 = vmatmul.mubr.msk.bf16.vlgmr.msra.gmra.mrb[4].mxu0 %vm1563_vm3, %v6216_v21 }
 0x305   : > { %2386 = vmatpush1.bf16.msra.mxu0 %v2377_v23  ;;  %2417 = vmatprep.mubr.bf16.mxu0 %v7431_v0 }
 0x306   : > { %2573 = vmatprep.subr.bf16.mxu0 %v2552_v25 }
 0x307   : > { %6611 = vmatmul.mubr.msk.bf16.vlgmr.msra.gmra.mrb[4].mxu1 %vm1563_vm3, %v6216_v21 }
 0x308   : > { %6615 = vmatpush3.bf16.msra.mxu1 %v2376_v17  ;;  %6616 = vmatprep.mubr.msk.bf16.mxu1 %vm7433_vm4, %v7432_v6  ;;  %v8248_v17 = vcombine.high %v8230_v2, %v7906_v11  ;;  %v2785_v11 = vpop.permute.xlu1 %2784 }
 0x309   : > { %6620 = vmatprep.subr.bf16.mxu1 %v7432_v6 }
 0x310   : > { %6220 = vmatmul.mubr.msk.bf16.vlgmr.msra.gmra.mrb[4].mxu0 %vm1563_vm3, %v6219_v27 }
 0x311   : > { %2574 = vmatpush1.bf16.msra.mxu0 %v2551_v28  ;;  %2605 = vmatprep.mubr.bf16.mxu0 %v7431_v0 }
 0x313   : > { %6617 = vmatmul.mubr.msk.bf16.vlgmr.msra.gmra.mrb[4].mxu1 %vm1563_vm3, %v6219_v27 }
 0x314   : > { %6621 = vmatpush3.bf16.msra.mxu1 %v2553_v30  ;;  %6624 = vmatprep.mubr.msk.bf16.mxu1 %vm7433_vm4, %v7432_v6  ;;  %v2502_v30 = vld [vmem:[%s9174_s4] sm:$0xf] }
 0x315   : > { %6622 = vmatprep.subr.bf16.mxu1 %v7432_v6 }
 0x3e3   : > { %v2419_v31 = vpop.f32.mrb[4].mxu0 }
 0x3e4   : > { %v6857_v32 = vadd.f32 %v2419_v31, %v1526_v19  ;;  %v2421_v33 = vpop.f32.mrb[5].mxu0 }
 0x3e5   : > { %v6858_v34 = vadd.f32 %v2421_v33, %v1526_v19  ;;  %v2423_v35 = vpop.f32.mrb[6].mxu0  ;;  %v2675_v33 = vsel %vm622_vm7, %v2660_v5, %v2662_v13 }
 0x3e6   : > { %vm2469_vm8 = vcmp.ge.f32.partialorder %v6857_v32, 0.0  ;;  %v2472_v36 = vmul.f32 0.2, %v6857_v32  ;;  %v2424_v37 = vpop.f32.mrb[7].mxu0  ;;  %v2460_v38 = vpop.f32.mrb[4].mxu1 }
 0x3e7   : > { %vm2470_vm15 = vcmp.ge.f32.partialorder %v6858_v34, 0.0  ;;  %v2473_v39 = vmul.f32 0.2, %v6858_v34  ;;  %v6859_v40 = vadd.f32 %v2460_v38, %v1526_v19  ;;  %v6618_v41 = vpop.f32.mrb[5].mxu1  ;;  %v2787_v19 = vpop.permute.xlu0 %2786 }
 0x3e8   : > { %v2475_v42 = vsel %vm2469_vm8, %v6857_v32, %v2472_v36  ;;  %v2463_v43 = vpop.f32.mrb[6].mxu1 }
 0x3e9   : > { %v8112_v44 = vmul.f32 %v2475_v42, %v7888_v50  ;;  %v2476_v45 = vsel %vm2470_vm15, %v6858_v34, %v2473_v39  ;;  %vm2471_vm0 = vcmp.ge.f32.partialorder %v6859_v40, 0.0  ;;  %v2474_v46 = vmul.f32 0.2, %v6859_v40  ;;  %v6619_v47 = vpop.f32.mrb[7].mxu1 }
 0x3ea   : > { %v8115_v49 = vmul.f32 %v2476_v45, %v7890_v51  ;;  %v2677_v34 = vsel %vm622_vm7, %v2664_v16, %v2666_v18  ;;  %v2799_v45 = vsel %vm732_vm9, %v2785_v11, %v2787_v19 }
 0x3eb   : > { %v2477_v52 = vsel %vm2471_vm0, %v6859_v40, %v2474_v46  ;;  %v6235_v46 = vld [vmem:[%s9174_s4 + $0x4] sm:$0xf]  ;;  %vm3724_vm0 = vcmask 261120  }
 0x3ec   : > { %v6380_v53 = vpack.c.bf16 %v8115_v49, %v8112_v44  ;;  %v2480_v54 = vmul.f32 %v2477_v52, %v7886_v48 }
 0x3ee   : > { %2494 = vst [vmem:[#allocation2 + $0x2c] sm:$0xff] %v6380_v53  ;;  %v6381_v55 = vpack.c.bf16 %v2480_v54, %v2480_v54 }
 0x3f0   : > { %2495 = vst.msk [vmem:[#allocation2 + $0x34] sm:$0xf] %vm1520_vm2, %v6381_v55 }
 0x3f5   : > { %v8121_v56 = vld [vmem:[#allocation2 + $0x28] sm:$0xff] }
 0x3f6   : > { %v6229_v57 = vcombine.high %v8121_v56, %v8121_v56  ;;  %v6228_v58 = vcombine.low %v8121_v56, %v8121_v56 }
 0x3f7   : > { %v8127_v59 = vld [vmem:[#allocation2 + $0x30] sm:$0xff] }
 0x3f8   : > { %2545 = vrot.lane.b32.xlu0 %v6229_v57, %s7434_s27  ;;  %2543 = vrot.lane.b32.xlu1 %v6228_v58, %s7434_s27  ;;  %v6231_v60 = vcombine.high %v8127_v59, %v8127_v59  ;;  %v6230_v61 = vcombine.low %v8127_v59, %v8127_v59 }
 0x3fc   : > { %2549 = vrot.lane.b32.xlu0 %v6231_v60, %s7434_s27  ;;  %2547 = vrot.lane.b32.xlu1 %v6230_v61, %s7434_s27 }
 0x400   : > { %2788 = vrot.lane.b32.xlu0 %v7922_v8, %s7436_s16  ;;  %2782 = vrot.lane.b32.xlu1 %v7904_v10, %s7436_s16 }
 0x404   : > { %2669 = vrot.lane.b32.xlu0 %v6229_v57, %s7435_s29  ;;  %2667 = vrot.lane.b32.xlu1 %v6228_v58, %s7435_s29 }
 0x408   : > { %2673 = vrot.lane.b32.xlu0 %v6231_v60, %s7435_s29  ;;  %2671 = vrot.lane.b32.xlu1 %v6230_v61, %s7435_s29 }
 0x40c   : > { %2909 = vrot.lane.b32.xlu0 %v7914_v12, %s7437_s18  ;;  %2907 = vrot.lane.b32.xlu1 %v7900_v9, %s7437_s18  ;;  %v8161_v9 = vld [vmem:[#allocation2 + $0xc] ss:$20 sps:$4 sm:$0xff]   ;;  %v8167_v12 = vld [vmem:[#allocation2 + $0x34] ss:$0 sps:$4 sm:$0xff]  }
 0x410   : > { %2792 = vrot.lane.b32.xlu0 %v6229_v57, %s7436_s16  ;;  %2790 = vrot.lane.b32.xlu1 %v6228_v58, %s7436_s16 }
 0x414   : > { %2796 = vrot.lane.b32.xlu0 %v6231_v60, %s7436_s16  ;;  %2794 = vrot.lane.b32.xlu1 %v6230_v61, %s7436_s16 }
 0x418   : > { %2911 = vrot.lane.b32.xlu0 %v7922_v8, %s7437_s18  ;;  %2905 = vrot.lane.b32.xlu1 %v7904_v10, %s7437_s18  ;;  %v8175_v10 = vpack.c.bf16 %v8112_v44, %v8112_v44  ;;  %v8179_v8 = vpack.c.bf16 %v8115_v49, %v8115_v49 }
 0x41c   : > { %2915 = vrot.lane.b32.xlu0 %v6229_v57, %s7437_s18  ;;  %2913 = vrot.lane.b32.xlu1 %v6228_v58, %s7437_s18 }
 0x420   : > { %2919 = vrot.lane.b32.xlu0 %v6231_v60, %s7437_s18  ;;  %2917 = vrot.lane.b32.xlu1 %v6230_v61, %s7437_s18 }
 0x424   : > { %3160 = vrot.lane.b32.xlu0 %v8161_v9, %s7438_s28  ;;  %3158 = vrot.lane.b32.xlu1 %v7945_v7, %s7438_s28 }
 0x428   : > { %3166 = vrot.lane.b32.xlu0 %v8167_v12, %s7438_s28  ;;  %3156 = vrot.lane.b32.xlu1 %v7952_v14, %s7438_s28 }
 0x42c   : > { %3162 = vrot.lane.b32.xlu0 %v8175_v10, %s7438_s28  ;;  %3164 = vrot.lane.b32.xlu1 %v8179_v8, %s7438_s28 }
 0x430   : > { %3277 = vrot.lane.b32.xlu0 %v8161_v9, %s7439_s20  ;;  %3275 = vrot.lane.b32.xlu1 %v7945_v7, %s7439_s20 }
 0x434   : > { %3283 = vrot.lane.b32.xlu0 %v8167_v12, %s7439_s20  ;;  %3273 = vrot.lane.b32.xlu1 %v7952_v14, %s7439_s20 }
 0x438   : > { %3279 = vrot.lane.b32.xlu0 %v8175_v10, %s7439_s20  ;;  %3281 = vrot.lane.b32.xlu1 %v8179_v8, %s7439_s20 }
 0x43c   : > { %3394 = vrot.lane.b32.xlu0 %v8161_v9, %s7440_s17  ;;  %3392 = vrot.lane.b32.xlu1 %v7945_v7, %s7440_s17 }
 0x440   : > { %3400 = vrot.lane.b32.xlu0 %v8167_v12, %s7440_s17  ;;  %3390 = vrot.lane.b32.xlu1 %v7952_v14, %s7440_s17 }
 0x444   : > { %3396 = vrot.lane.b32.xlu0 %v8175_v10, %s7440_s17  ;;  %3398 = vrot.lane.b32.xlu1 %v8179_v8, %s7440_s17 }
 0x448   : > { %3511 = vrot.lane.b32.xlu0 %v8161_v9, %s7441_s15  ;;  %3509 = vrot.lane.b32.xlu1 %v7945_v7, %s7441_s15 }
 0x44c   : > { %3513 = vrot.lane.b32.xlu0 %v8175_v10, %s7441_s15  ;;  %3507 = vrot.lane.b32.xlu1 %v7952_v14, %s7441_s15 }
 0x450   : > { %3517 = vrot.lane.b32.xlu0 %v8167_v12, %s7441_s15  ;;  %3515 = vrot.lane.b32.xlu1 %v8179_v8, %s7441_s15 }
 0x454   : > { %3698 = vrot.lane.b32.xlu0 %v8228_v1, %s7434_s27  ;;  %2499 = vperm.xlu1 %7262, %v2496_v63  }
 0x458   : > { %3696 = vrot.lane.b32.xlu0 %v8236_v4, %s7434_s27  ;;  %3700 = vrot.lane.b32.xlu1 %v8240_v15, %s7434_s27 }
 0x45c   : > { %3816 = vrot.lane.b32.xlu0 %v8228_v1, %s7435_s29  ;;  %3702 = vrot.lane.b32.xlu1 %v8248_v17, %s7434_s27 }
 0x460   : > { %3814 = vrot.lane.b32.xlu0 %v8236_v4, %s7435_s29  ;;  %3818 = vrot.lane.b32.xlu1 %v8240_v15, %s7435_s29 }
 0x464   : > { %3933 = vrot.lane.b32.xlu0 %v8228_v1, %s7436_s16  ;;  %3820 = vrot.lane.b32.xlu1 %v8248_v17, %s7435_s29 }
 0x468   : > { %3935 = vrot.lane.b32.xlu1 %v8240_v15, %s7436_s16 }
 0x46a   : > { %v2544_v20 = vpop.permute.xlu1 %2543  ;;  %v2546_v21 = vpop.permute.xlu0 %2545 }
 0x46b   : > { %v2554_v22 = vsel %vm510_vm5, %v2544_v20, %v2546_v21 }
 0x46c   : > { %v2565_v28 = vsel %vm518_vm6, %v2554_v22, 0 }
 0x46e   : > { %v2548_v23 = vpop.permute.xlu1 %2547  ;;  %v2550_v24 = vpop.permute.xlu0 %2549 }
 0x46f   : > { %v2556_v25 = vsel %vm510_vm5, %v2548_v23, %v2550_v24  ;;  %v2555_v26 = vsel %vm510_vm5, %v2546_v21, %v2548_v23 }
 0x470   : > { %v2571_v27 = vsel %vm518_vm6, %v2556_v25, 0  ;;  %6232 = vmatprep.subr.msk.bf16.mxu0 %vm518_vm6, %v2555_v26 }
 0x471   : > { %2576 = vmatpush1.bf16.msra.mxu0 %v2565_v28  ;;  %6623 = vmatpush3.bf16.msra.mxu1 %v2571_v27 }
 0x472   : > { %v2783_v31 = vpop.permute.xlu1 %2782  ;;  %2696 = vmatprep.subr.bf16.mxu0 %v2676_v29  ;;  %v2789_v32 = vpop.permute.xlu0 %2788  ;;  %6628 = vmatprep.subr.bf16.mxu1 %v7432_v6 }
 0x473   : > { %v2798_v53 = vsel %vm732_vm9, %v2783_v31, %v2785_v11  ;;  %v2800_v54 = vsel %vm732_vm9, %v2787_v19, %v2789_v32  ;;  %v6239_v11 = vld [vmem:[%s9174_s4 + $0x8] sm:$0xf]  ;;  %v6243_v32 = vld [vmem:[%s9174_s4 + $0xc] sm:$0xf] }
 0x474   : > { %6233 = vmatmul.mubr.msk.bf16.vlgmr.msra.gmra.mrb[8].mxu0 %vm2560_vm1, %v2502_v30  ;;  %6625 = vmatmul.mubr.msk.bf16.vlgmr.msra.gmra.mrb[8].mxu1 %vm2560_vm1, %v2502_v30 }
 0x475   : > { %2697 = vmatpush1.bf16.msra.mxu0 %v2675_v33  ;;  %6629 = vmatpush3.bf16.msra.mxu1 %v2677_v34 }
 0x476   : > { %v2668_v35 = vpop.permute.xlu1 %2667  ;;  %v2670_v36 = vpop.permute.xlu0 %2669  ;;  %6630 = vmatprep.subr.bf16.mxu1 %v7432_v6  ;;  %2728 = vmatprep.mubr.bf16.mxu0 %v7431_v0 }
 0x477   : > { %6632 = vmatprep.mubr.msk.bf16.mxu1 %vm7433_vm4, %v7432_v6  ;;  %v2678_v37 = vsel %vm622_vm7, %v2668_v35, %v2670_v36 }
 0x478   : > { %v2688_v43 = vsel %vm518_vm6, %v2678_v37, 0 }
 0x47a   : > { %v2672_v38 = vpop.permute.xlu1 %2671  ;;  %v2674_v39 = vpop.permute.xlu0 %2673 }
 0x47b   : > { %v2680_v40 = vsel %vm622_vm7, %v2672_v38, %v2674_v39  ;;  %v2679_v41 = vsel %vm622_vm7, %v2670_v36, %v2672_v38  ;;  %v6247_v38 = vld [vmem:[%s9174_s4 + $0x10] sm:$0xf] }
 0x47c   : > { %v2694_v42 = vsel %vm518_vm6, %v2680_v40, 0  ;;  %6236 = vmatprep.subr.msk.bf16.mxu0 %vm518_vm6, %v2679_v41 }
 0x47d   : > { %2699 = vmatpush1.bf16.msra.mxu0 %v2688_v43  ;;  %6631 = vmatpush3.bf16.msra.mxu1 %v2694_v42 }
 0x47e   : > { %v2908_v47 = vpop.permute.xlu1 %2907  ;;  %2819 = vmatprep.subr.bf16.mxu0 %v2799_v45  ;;  %v2910_v52 = vpop.permute.xlu0 %2909  ;;  %6636 = vmatprep.subr.bf16.mxu1 %v7432_v6 }
 0x47f   : > { %v2922_v18 = vsel %vm842_vm10, %v2908_v47, %v2910_v52 }
 0x480   : > { %6237 = vmatmul.mubr.msk.bf16.vlgmr.msra.gmra.mrb[8].mxu0 %vm2560_vm1, %v6235_v46  ;;  %6633 = vmatmul.mubr.msk.bf16.vlgmr.msra.gmra.mrb[8].mxu1 %vm2560_vm1, %v6235_v46 }
 0x481   : > { %2820 = vmatpush1.bf16.msra.mxu0 %v2798_v53  ;;  %6637 = vmatpush3.bf16.msra.mxu1 %v2800_v54  ;;  %v6257_v54 = vld [vmem:[%s9174_s4 + $0x14] sm:$0xf] }
 0x482   : > { %v2791_v55 = vpop.permute.xlu1 %2790  ;;  %v2793_v57 = vpop.permute.xlu0 %2792  ;;  %6638 = vmatprep.subr.bf16.mxu1 %v7432_v6  ;;  %2851 = vmatprep.mubr.bf16.mxu0 %v7431_v0 }
 0x483   : > { %6640 = vmatprep.mubr.msk.bf16.mxu1 %vm7433_vm4, %v7432_v6  ;;  %v2801_v58 = vsel %vm732_vm9, %v2791_v55, %v2793_v57 }
 0x484   : > { %v2811_v5 = vsel %vm518_vm6, %v2801_v58, 0 }
 0x486   : > { %v2795_v60 = vpop.permute.xlu1 %2794  ;;  %v2797_v61 = vpop.permute.xlu0 %2796 }
 0x487   : > { %v2803_v63 = vsel %vm732_vm9, %v2795_v60, %v2797_v61  ;;  %v2802_v13 = vsel %vm732_vm9, %v2793_v57, %v2795_v60 }
 0x488   : > { %v2817_v16 = vsel %vm518_vm6, %v2803_v63, 0  ;;  %6240 = vmatprep.subr.msk.bf16.mxu0 %vm518_vm6, %v2802_v13 }
 0x489   : > { %2822 = vmatpush1.bf16.msra.mxu0 %v2811_v5  ;;  %6639 = vmatpush3.bf16.msra.mxu1 %v2817_v16 }
 0x48a   : > { %v2906_v19 = vpop.permute.xlu1 %2905  ;;  %2942 = vmatprep.subr.bf16.mxu0 %v2922_v18  ;;  %v2912_v20 = vpop.permute.xlu0 %2911  ;;  %6644 = vmatprep.subr.bf16.mxu1 %v7432_v6 }
 0x48b   : > { %v2921_v21 = vsel %vm842_vm10, %v2906_v19, %v2908_v47  ;;  %v2923_v22 = vsel %vm842_vm10, %v2910_v52, %v2912_v20  ;;  %v6261_v20 = vld [vmem:[%s9174_s4 + $0x18] sm:$0xf] }
 0x48c   : > { %6241 = vmatmul.mubr.msk.bf16.vlgmr.msra.gmra.mrb[8].mxu0 %vm2560_vm1, %v6239_v11  ;;  %6641 = vmatmul.mubr.msk.bf16.vlgmr.msra.gmra.mrb[8].mxu1 %vm2560_vm1, %v6239_v11 }
 0x48d   : > { %2943 = vmatpush1.bf16.msra.mxu0 %v2921_v21  ;;  %6645 = vmatpush3.bf16.msra.mxu1 %v2923_v22 }
 0x48e   : > { %v2914_v23 = vpop.permute.xlu1 %2913  ;;  %v2916_v24 = vpop.permute.xlu0 %2915  ;;  %6646 = vmatprep.subr.bf16.mxu1 %v7432_v6  ;;  %2974 = vmatprep.mubr.bf16.mxu0 %v7431_v0 }
 0x48f   : > { %6648 = vmatprep.mubr.msk.bf16.mxu1 %vm7433_vm4, %v7432_v6  ;;  %v2924_v25 = vsel %vm842_vm10, %v2914_v23, %v2916_v24 }
 0x490   : > { %v2934_v31 = vsel %vm518_vm6, %v2924_v25, 0 }
 0x492   : > { %v2918_v26 = vpop.permute.xlu1 %2917  ;;  %v2920_v27 = vpop.permute.xlu0 %2919 }
 0x493   : > { %v2926_v28 = vsel %vm842_vm10, %v2918_v26, %v2920_v27  ;;  %v2925_v29 = vsel %vm842_vm10, %v2916_v24, %v2918_v26 }
 0x494   : > { %v2940_v30 = vsel %vm518_vm6, %v2926_v28, 0  ;;  %6244 = vmatprep.subr.msk.bf16.mxu0 %vm518_vm6, %v2925_v29 }
 0x495   : > { %2945 = vmatpush1.bf16.msra.mxu0 %v2934_v31  ;;  %6647 = vmatpush3.bf16.msra.mxu1 %v2940_v30  ;;  %v6265_v31 = vld [vmem:[%s9174_s4 + $0x1c] sm:$0xf] }
 0x496   : > { %v3159_v33 = vpop.permute.xlu1 %3158  ;;  %3070 = vmatprep.subr.bf16.mxu0 %v7945_v7  ;;  %v3161_v34 = vpop.permute.xlu0 %3160  ;;  %6652 = vmatprep.subr.bf16.mxu1 %v7432_v6  ;;  %v3062_v7 = vsel %vm518_vm6, %v8175_v10, 0 }
 0x498   : > { %6245 = vmatmul.mubr.msk.bf16.vlgmr.msra.gmra.mrb[8].mxu0 %vm2560_vm1, %v6243_v32  ;;  %6649 = vmatmul.mubr.msk.bf16.vlgmr.msra.gmra.mrb[8].mxu1 %vm2560_vm1, %v6243_v32 }
 0x499   : > { %3071 = vmatpush1.bf16.msra.mxu0 %v7952_v14  ;;  %6653 = vmatpush3.bf16.msra.mxu1 %v8161_v9  ;;  %v3068_v14 = vsel %vm518_vm6, %v8167_v12, 0  ;;  %v3169_v9 = vsel %vm1058_vm11, %v3159_v33, %v3161_v34 }
 0x49a   : > { %v3157_v35 = vpop.permute.xlu1 %3156  ;;  %6254 = vmatprep.subr.msk.bf16.mxu0 %vm518_vm6, %v8179_v8  ;;  %v3167_v36 = vpop.permute.xlu0 %3166  ;;  %6654 = vmatprep.subr.bf16.mxu1 %v7432_v6 }
 0x49b   : > { %3102 = vmatprep.mubr.bf16.mxu0 %v7431_v0  ;;  %6656 = vmatprep.mubr.msk.bf16.mxu1 %vm7433_vm4, %v7432_v6  ;;  %v3168_v10 = vsel %vm1058_vm11, %v3157_v35, %v3159_v33  ;;  %v3185_v46 = vsel %vm518_vm6, %v3167_v36, 0 }
 0x49d   : > { %3073 = vmatpush1.bf16.msra.mxu0 %v3062_v7  ;;  %6655 = vmatpush3.bf16.msra.mxu1 %v3068_v14 }
 0x49e   : > { %v3165_v37 = vpop.permute.xlu1 %3164  ;;  %3187 = vmatprep.subr.bf16.mxu0 %v3169_v9  ;;  %v3163_v8 = vpop.permute.xlu0 %3162  ;;  %6660 = vmatprep.subr.bf16.mxu1 %v7432_v6 }
 0x49f   : > { %v3170_v12 = vsel %vm1058_vm11, %v3163_v8, %v3165_v37  ;;  %v3171_v41 = vsel %vm1058_vm11, %v3165_v37, %v3167_v36  ;;  %v6269_v37 = vld [vmem:[%s9174_s4 + $0x20] sm:$0xf] }
 0x4a0   : > { %v3179_v45 = vsel %vm518_vm6, %v3170_v12, 0 }
 0x4a2   : > { %v3276_v39 = vpop.permute.xlu1 %3275  ;;  %v3278_v40 = vpop.permute.xlu0 %3277 }
 0x4a3   : > { %v3286_v47 = vsel %vm1165_vm12, %v3276_v39, %v3278_v40 }
 0x4a4   : > { %6255 = vmatmul.mubr.msk.bf16.vlgmr.msra.gmra.mrb[8].mxu0 %vm2560_vm1, %v6247_v38  ;;  %6657 = vmatmul.mubr.msk.bf16.vlgmr.msra.gmra.mrb[8].mxu1 %vm2560_vm1, %v6247_v38 }
 0x4a5   : > { %3188 = vmatpush1.bf16.msra.mxu0 %v3168_v10  ;;  %6661 = vmatpush3.bf16.msra.mxu1 %v3161_v34 }
 0x4a6   : > { %6258 = vmatprep.subr.msk.bf16.mxu0 %vm518_vm6, %v3171_v41  ;;  %v3274_v42 = vpop.permute.xlu1 %3273  ;;  %v3284_v43 = vpop.permute.xlu0 %3283  ;;  %6662 = vmatprep.subr.bf16.mxu1 %v7432_v6 }
 0x4a7   : > { %3219 = vmatprep.mubr.bf16.mxu0 %v7431_v0  ;;  %6664 = vmatprep.mubr.msk.bf16.mxu1 %vm7433_vm4, %v7432_v6  ;;  %v3285_v58 = vsel %vm1165_vm12, %v3274_v42, %v3276_v39  ;;  %v3302_v5 = vsel %vm518_vm6, %v3284_v43, 0 }
 0x4a9   : > { %3190 = vmatpush1.bf16.msra.mxu0 %v3179_v45  ;;  %6663 = vmatpush3.bf16.msra.mxu1 %v3185_v46 }
 0x4aa   : > { %3304 = vmatprep.subr.bf16.mxu0 %v3286_v47  ;;  %v3282_v52 = vpop.permute.xlu1 %3281  ;;  %v3280_v53 = vpop.permute.xlu0 %3279  ;;  %6668 = vmatprep.subr.bf16.mxu1 %v7432_v6 }
 0x4ab   : > { %v3287_v60 = vsel %vm1165_vm12, %v3280_v53, %v3282_v52  ;;  %v3288_v61 = vsel %vm1165_vm12, %v3282_v52, %v3284_v43 }
 0x4ac   : > { %v3296_v16 = vsel %vm518_vm6, %v3287_v60, 0 }
 0x4ae   : > { %v3393_v55 = vpop.permute.xlu1 %3392  ;;  %v3395_v57 = vpop.permute.xlu0 %3394 }
 0x4af   : > { %v3403_v18 = vsel %vm1272_vm13, %v3393_v55, %v3395_v57 }
 0x4b0   : > { %6259 = vmatmul.mubr.msk.bf16.vlgmr.msra.gmra.mrb[8].mxu0 %vm2560_vm1, %v6257_v54  ;;  %6665 = vmatmul.mubr.msk.bf16.vlgmr.msra.gmra.mrb[8].mxu1 %vm2560_vm1, %v6257_v54 }
 0x4b1   : > { %3305 = vmatpush1.bf16.msra.mxu0 %v3285_v58  ;;  %6669 = vmatpush3.bf16.msra.mxu1 %v3278_v40 }
 0x4b2   : > { %6262 = vmatprep.subr.msk.bf16.mxu0 %vm518_vm6, %v3288_v61  ;;  %v3391_v63 = vpop.permute.xlu1 %3390  ;;  %v3401_v13 = vpop.permute.xlu0 %3400  ;;  %6670 = vmatprep.subr.bf16.mxu1 %v7432_v6 }
 0x4b3   : > { %3336 = vmatprep.mubr.bf16.mxu0 %v7431_v0  ;;  %6672 = vmatprep.mubr.msk.bf16.mxu1 %vm7433_vm4, %v7432_v6  ;;  %v3402_v23 = vsel %vm1272_vm13, %v3391_v63, %v3393_v55  ;;  %v3419_v29 = vsel %vm518_vm6, %v3401_v13, 0 }
 0x4b5   : > { %3307 = vmatpush1.bf16.msra.mxu0 %v3296_v16  ;;  %6671 = vmatpush3.bf16.msra.mxu1 %v3302_v5 }
 0x4b6   : > { %3421 = vmatprep.subr.bf16.mxu0 %v3403_v18  ;;  %v3399_v11 = vpop.permute.xlu1 %3398  ;;  %v3397_v19 = vpop.permute.xlu0 %3396  ;;  %6676 = vmatprep.subr.bf16.mxu1 %v7432_v6 }
 0x4b7   : > { %v3404_v24 = vsel %vm1272_vm13, %v3397_v19, %v3399_v11  ;;  %v3405_v25 = vsel %vm1272_vm13, %v3399_v11, %v3401_v13 }
 0x4b8   : > { %v3413_v26 = vsel %vm518_vm6, %v3404_v24, 0 }
 0x4ba   : > { %v3510_v21 = vpop.permute.xlu1 %3509  ;;  %v3512_v22 = vpop.permute.xlu0 %3511 }
 0x4bb   : > { %v3520_v30 = vsel %vm1379_vm14, %v3510_v21, %v3512_v22 }
 0x4bc   : > { %6263 = vmatmul.mubr.msk.bf16.vlgmr.msra.gmra.mrb[8].mxu0 %vm2560_vm1, %v6261_v20  ;;  %6673 = vmatmul.mubr.msk.bf16.vlgmr.msra.gmra.mrb[8].mxu1 %vm2560_vm1, %v6261_v20 }
 0x4bd   : > { %3422 = vmatpush1.bf16.msra.mxu0 %v3402_v23  ;;  %6677 = vmatpush3.bf16.msra.mxu1 %v3395_v57 }
 0x4be   : > { %6266 = vmatprep.subr.msk.bf16.mxu0 %vm518_vm6, %v3405_v25  ;;  %6678 = vmatprep.subr.bf16.mxu1 %v7432_v6  ;;  %v3508_v27 = vpop.permute.xlu1 %3507  ;;  %v3514_v28 = vpop.permute.xlu0 %3513 }
 0x4bf   : > { %3453 = vmatprep.mubr.bf16.mxu0 %v7431_v0  ;;  %6680 = vmatprep.mubr.msk.bf16.mxu1 %vm7433_vm4, %v7432_v6  ;;  %v3519_v34 = vsel %vm1379_vm14, %v3508_v27, %v3510_v21 }
 0x4c1   : > { %3424 = vmatpush1.bf16.msra.mxu0 %v3413_v26  ;;  %6679 = vmatpush3.bf16.msra.mxu1 %v3419_v29  ;;  %v4773_v29 = vld [vmem:[#allocation2 + $0x1c] sm:$0xff] }
 0x4c2   : > { %3538 = vmatprep.subr.bf16.mxu0 %v3520_v30  ;;  %6684 = vmatprep.subr.bf16.mxu1 %v7432_v6  ;;  %v3516_v32 = vpop.permute.xlu1 %3515  ;;  %v3518_v33 = vpop.permute.xlu0 %3517 }
 0x4c3   : > { %v3521_v35 = vsel %vm1379_vm14, %v3514_v28, %v3516_v32  ;;  %v3522_v36 = vsel %vm1379_vm14, %v3516_v32, %v3518_v33  ;;  %v3536_v14 = vsel %vm518_vm6, %v3518_v33, 0 }
 0x4c4   : > { %v3530_v7 = vsel %vm518_vm6, %v3521_v35, 0 }
 0x4c6   : > { %v3699_v9 = vpop.permute.xlu0 %3698 }
 0x4c8   : > { %6267 = vmatmul.mubr.msk.bf16.vlgmr.msra.gmra.mrb[8].mxu0 %vm2560_vm1, %v6265_v31  ;;  %6681 = vmatmul.mubr.msk.bf16.vlgmr.msra.gmra.mrb[8].mxu1 %vm2560_vm1, %v6265_v31  ;;  %v6319_v31 = vcombine.low %v8230_v2, %v4773_v29 }
 0x4c9   : > { %3539 = vmatpush1.bf16.msra.mxu0 %v3519_v34  ;;  %6685 = vmatpush3.bf16.msra.mxu1 %v3512_v22  ;;  %v6320_v34 = vcombine.high %v8230_v2, %v4773_v29 }
 0x4ca   : > { %6270 = vmatprep.subr.msk.bf16.mxu0 %vm518_vm6, %v3522_v36  ;;  %6686 = vmatprep.subr.bf16.mxu1 %v7432_v6  ;;  %v3697_v38 = vpop.permute.xlu0 %3696 }
 0x4cb   : > { %3570 = vmatprep.mubr.bf16.mxu0 %v7431_v0  ;;  %6688 = vmatprep.mubr.msk.bf16.mxu1 %vm7433_vm4, %v7432_v6  ;;  %v3712_v10 = vsel %vm510_vm5, %v3697_v38, %v3699_v9 }
 0x4cd   : > { %3541 = vmatpush1.bf16.msra.mxu0 %v3530_v7  ;;  %6687 = vmatpush3.bf16.msra.mxu1 %v3536_v14 }
 0x4ce   : > { %6692 = vmatprep.subr.bf16.mxu1 %v7432_v6  ;;  %v3817_v32 = vpop.permute.xlu0 %3816 }
 0x4d2   : > { %v3815_v35 = vpop.permute.xlu0 %3814 }
 0x4d3   : > { %v2500_v8 = vpop.permute.xlu1 %2499 }
 0x4d4   : > { %6271 = vmatmul.mubr.msk.bf16.vlgmr.msra.gmra.mrb[8].mxu0 %vm2560_vm1, %v6269_v37  ;;  %6689 = vmatmul.mubr.msk.bf16.vlgmr.msra.gmra.mrb[8].mxu1 %vm2560_vm1, %v6269_v37 }
 0x4d5   : > { %3760 = vmatprep.mubr.bf16.mxu0 %v7431_v0  ;;  %6696 = vmatprep.mubr.msk.bf16.mxu1 %vm7433_vm4, %v7432_v6 }
 0x4d7   : > { %v3701_v39 = vpop.permute.xlu1 %3700 }
 0x4d8   : > { %v3713_v40 = vsel %vm510_vm5, %v3699_v9, %v3701_v39 }
 0x4d9   : > { %3728 = vmatprep.subr.bf16.mxu0 %v3713_v40  ;;  %v3655_v40 = vld [vmem:[%s9175_s5] sm:$0xf] }
 0x4da   : > { %3729 = vmatpush1.bf16.msra.mxu0 %v3712_v10 }
 0x4db   : > { %v3703_v12 = vpop.permute.xlu1 %3702 }
 0x4dc   : > { %v3714_v41 = vsel %vm510_vm5, %v3701_v39, %v3703_v12 }
 0x4dd   : > { %6693 = vmatpush3.bf16.msra.mxu1 %v3714_v41 }
 0x4de   : > { %6694 = vmatprep.subr.bf16.mxu1 %v7432_v6 }
 0x4df   : > { %v3819_v33 = vpop.permute.xlu1 %3818 }
 0x4e0   : > { %v3831_v10 = vsel %vm622_vm7, %v3817_v32, %v3819_v33 }
 0x4e3   : > { %v3821_v36 = vpop.permute.xlu1 %3820 }
 0x4e7   : > { %v3936_v7 = vpop.permute.xlu1 %3935 }
 0x5a7   : > { %v3572_v42 = vpop.f32.mrb[8].mxu0  ;;  %v3613_v43 = vpop.f32.mrb[8].mxu1 }
 0x5a8   : > { %v6860_v45 = vadd.f32 %v3572_v42, %v2500_v8  ;;  %v6862_v46 = vadd.f32 %v3613_v43, %v2500_v8  ;;  %v3574_v47 = vpop.f32.mrb[9].mxu0  ;;  %v6690_v52 = vpop.f32.mrb[9].mxu1  ;;  %v3832_v42 = vsel %vm622_vm7, %v3819_v33, %v3821_v36  ;;  %v3830_v43 = vsel %vm622_vm7, %v3815_v35, %v3817_v32 }
 0x5a9   : > { %v6861_v53 = vadd.f32 %v3574_v47, %v2500_v8  ;;  %v3576_v54 = vpop.f32.mrb[10].mxu0  ;;  %v3616_v55 = vpop.f32.mrb[10].mxu1 }
 0x5aa   : > { %vm3622_vm3 = vcmp.ge.f32.partialorder %v6860_v45, 0.0  ;;  %v3625_v57 = vmul.f32 0.2, %v6860_v45  ;;  %vm3624_vm8 = vcmp.ge.f32.partialorder %v6862_v46, 0.0  ;;  %v3627_v58 = vmul.f32 0.2, %v6862_v46 }
 0x5ab   : > { %vm3623_vm15 = vcmp.ge.f32.partialorder %v6861_v53, 0.0  ;;  %v3626_v60 = vmul.f32 0.2, %v6861_v53  ;;  %v3577_v61 = vpop.f32.mrb[11].mxu0  ;;  %v6691_v63 = vpop.f32.mrb[11].mxu1 }
 0x5ac   : > { %v3628_v13 = vsel %vm3622_vm3, %v6860_v45, %v3625_v57  ;;  %v3630_v16 = vsel %vm3624_vm8, %v6862_v46, %v3627_v58  ;;  %v6285_v57 = vld [vmem:[%s9175_s5 + $0x4] sm:$0xf] }
 0x5ad   : > { %v3631_v5 = vmul.f32 %v3628_v13, %v7888_v50  ;;  %v3633_v18 = vmul.f32 %v3630_v16, %v7886_v48  ;;  %v3629_v11 = vsel %vm3623_vm15, %v6861_v53, %v3626_v60  ;;  %vm4861_vm15 = vcmask 326656  }
 0x5ae   : > { %v3632_v19 = vmul.f32 %v3629_v11, %v7890_v51 }
 0x5af   : > { %v6383_v20 = vpack.c.bf16 %v3633_v18, %v3633_v18 }
 0x5b0   : > { %v8430_v21 = vpack.c.bf16 %v3632_v19, %v3631_v5 }
 0x5b1   : > { %3648 = vst.msk [vmem:[#allocation2 + $0x48] sm:$0xf] %vm1520_vm2, %v6383_v20 }
 0x5b2   : > { %3647 = vst [vmem:[#allocation2 + $0x40] sm:$0xff] %v8430_v21 }
 0x5b9   : > { %v3663_v22 = vld [vmem:[#allocation2 + $0x44] sm:$0xff]  ;;  %v3662_v23 = vld [vmem:[#allocation2 + $0x3c] sm:$0xff] }
 0x5ba   : > { %v8435_v24 = vcombine.low %v8127_v59, %v3663_v22  ;;  %v8438_v25 = vcombine.high %v8121_v56, %v3662_v23  ;;  %v8445_v26 = vcombine.high %v8127_v59, %v3663_v22  ;;  %v8448_v27 = vcombine.low %v8121_v56, %v3662_v23  ;;  %v8490_v56 = vld [vmem:[#allocation2 + $0xc] ss:$20 sps:$4 sm:$0xff]   ;;  %v8492_v59 = vld [vmem:[#allocation2 + $0x8] ss:$20 sps:$4 sm:$0xff]  }
 0x5bb   : > { %v6288_v23 = vld [vmem:[%s9175_s5 + $0x8] sm:$0xf] }
 0x5bc   : > { %3708 = vrot.lane.b32.xlu1 %v8435_v24, %s7434_s27  ;;  %3706 = vrot.lane.b32.xlu0 %v8438_v25, %s7434_s27 }
 0x5c0   : > { %3710 = vrot.lane.b32.xlu1 %v8445_v26, %s7434_s27  ;;  %3704 = vrot.lane.b32.xlu0 %v8448_v27, %s7434_s27 }
 0x5c4   : > { %3937 = vrot.lane.b32.xlu1 %v8248_v17, %s7436_s16  ;;  %3931 = vrot.lane.b32.xlu0 %v8236_v4, %s7436_s16 }
 0x5c8   : > { %3826 = vrot.lane.b32.xlu1 %v8435_v24, %s7435_s29  ;;  %3824 = vrot.lane.b32.xlu0 %v8438_v25, %s7435_s29 }
 0x5cc   : > { %3828 = vrot.lane.b32.xlu1 %v8445_v26, %s7435_s29  ;;  %3822 = vrot.lane.b32.xlu0 %v8448_v27, %s7435_s29 }
 0x5d0   : > { %4052 = vrot.lane.b32.xlu1 %v8240_v15, %s7437_s18  ;;  %4050 = vrot.lane.b32.xlu0 %v8228_v1, %s7437_s18  ;;  %v8499_v1 = vpack.c.bf16 %v3632_v19, %v8115_v49  ;;  %v8508_v15 = vpack.c.bf16 %v3631_v5, %v8112_v44  ;;  %v4772_v44 = vld [vmem:[#allocation2 + $0x14] sm:$0xff]  ;;  %v3649_v49 = vld [vmem:[%s9180_s10] sm:$0xff] }
 0x5d1   : > { %v6318_v28 = vcombine.high %v8217_v62, %v4772_v44  ;;  %v6317_v30 = vcombine.low %v8217_v62, %v4772_v44  ;;  %v3934_v62 = vpop.permute.xlu0 %3933 }
 0x5d2   : > { %v3948_v58 = vsel %vm732_vm9, %v3934_v62, %v3936_v7 }
 0x5d4   : > { %3943 = vrot.lane.b32.xlu1 %v8435_v24, %s7436_s16  ;;  %3941 = vrot.lane.b32.xlu0 %v8438_v25, %s7436_s16 }
 0x5d8   : > { %3945 = vrot.lane.b32.xlu1 %v8445_v26, %s7436_s16  ;;  %3939 = vrot.lane.b32.xlu0 %v8448_v27, %s7436_s16 }
 0x5dc   : > { %4054 = vrot.lane.b32.xlu1 %v8248_v17, %s7437_s18  ;;  %4048 = vrot.lane.b32.xlu0 %v8236_v4, %s7437_s18  ;;  %v8501_v4 = vld [vmem:[#allocation2 + $0x4] ss:$20 sps:$4 sm:$0xff]   ;;  %v8510_v17 = vld [vmem:[#allocation2 + $0x34] ss:$20 sps:$4 sm:$0xff]  }
 0x5e0   : > { %4060 = vrot.lane.b32.xlu1 %v8435_v24, %s7437_s18  ;;  %4058 = vrot.lane.b32.xlu0 %v8438_v25, %s7437_s18 }
 0x5e4   : > { %4062 = vrot.lane.b32.xlu1 %v8445_v26, %s7437_s18  ;;  %4056 = vrot.lane.b32.xlu0 %v8448_v27, %s7437_s18 }
 0x5e8   : > { %4298 = vrot.lane.b32.xlu1 %v8490_v56, %s7438_s28  ;;  %4296 = vrot.lane.b32.xlu0 %v8492_v59, %s7438_s28 }
 0x5ec   : > { %4302 = vrot.lane.b32.xlu1 %v8499_v1, %s7438_s28  ;;  %4294 = vrot.lane.b32.xlu0 %v8501_v4, %s7438_s28 }
 0x5f0   : > { %4300 = vrot.lane.b32.xlu1 %v8508_v15, %s7438_s28  ;;  %4304 = vrot.lane.b32.xlu0 %v8510_v17, %s7438_s28 }
 0x5f4   : > { %4409 = vrot.lane.b32.xlu1 %v8490_v56, %s7439_s20  ;;  %4407 = vrot.lane.b32.xlu0 %v8492_v59, %s7439_s20 }
 0x5f8   : > { %4413 = vrot.lane.b32.xlu1 %v8499_v1, %s7439_s20  ;;  %4405 = vrot.lane.b32.xlu0 %v8501_v4, %s7439_s20 }
 0x5fc   : > { %4411 = vrot.lane.b32.xlu1 %v8508_v15, %s7439_s20  ;;  %4415 = vrot.lane.b32.xlu0 %v8510_v17, %s7439_s20 }
 0x600   : > { %4520 = vrot.lane.b32.xlu1 %v8490_v56, %s7440_s17  ;;  %4518 = vrot.lane.b32.xlu0 %v8492_v59, %s7440_s17 }
 0x604   : > { %4524 = vrot.lane.b32.xlu1 %v8499_v1, %s7440_s17  ;;  %4516 = vrot.lane.b32.xlu0 %v8501_v4, %s7440_s17 }
 0x608   : > { %4522 = vrot.lane.b32.xlu1 %v8508_v15, %s7440_s17  ;;  %4526 = vrot.lane.b32.xlu0 %v8510_v17, %s7440_s17 }
 0x60c   : > { %4631 = vrot.lane.b32.xlu1 %v8490_v56, %s7441_s15  ;;  %4629 = vrot.lane.b32.xlu0 %v8492_v59, %s7441_s15 }
 0x610   : > { %4635 = vrot.lane.b32.xlu1 %v8499_v1, %s7441_s15  ;;  %4627 = vrot.lane.b32.xlu0 %v8501_v4, %s7441_s15 }
 0x614   : > { %4633 = vrot.lane.b32.xlu1 %v8508_v15, %s7441_s15  ;;  %4637 = vrot.lane.b32.xlu0 %v8510_v17, %s7441_s15 }
 0x618   : > { %4824 = vrot.lane.b32.xlu1 %v6318_v28, %s7434_s27  ;;  %3652 = vperm.xlu0 %7261, %v3649_v49  }
 0x61c   : > { %4822 = vrot.lane.b32.xlu1 %v6317_v30, %s7434_s27  ;;  %4826 = vrot.lane.b32.xlu0 %v6319_v31, %s7434_s27 }
 0x620   : > { %4962 = vrot.lane.b32.xlu1 %v6318_v28, %s7435_s29  ;;  %4828 = vrot.lane.b32.xlu0 %v6320_v34, %s7434_s27 }
 0x624   : > { %4960 = vrot.lane.b32.xlu1 %v6317_v30, %s7435_s29  ;;  %4964 = vrot.lane.b32.xlu0 %v6319_v31, %s7435_s29 }
 0x628   : > { %5099 = vrot.lane.b32.xlu1 %v6318_v28, %s7436_s16  ;;  %4966 = vrot.lane.b32.xlu0 %v6320_v34, %s7435_s29 }
 0x62c   : > { %5097 = vrot.lane.b32.xlu1 %v6317_v30, %s7436_s16  ;;  %5101 = vrot.lane.b32.xlu0 %v6319_v31, %s7436_s16 }
 0x62e   : > { %v3709_v2 = vpop.permute.xlu1 %3708  ;;  %v3707_v14 = vpop.permute.xlu0 %3706 }
 0x62f   : > { %v3716_v9 = vsel %vm510_vm5, %v3707_v14, %v3709_v2 }
 0x630   : > { %5236 = vrot.lane.b32.xlu1 %v6318_v28, %s7437_s18  ;;  %5103 = vrot.lane.b32.xlu0 %v6320_v34, %s7436_s16 }
 0x631   : > { %3730 = vmatprep.subr.bf16.mxu0 %v3716_v9 }
 0x632   : > { %v3711_v37 = vpop.permute.xlu1 %3710  ;;  %v3705_v8 = vpop.permute.xlu0 %3704 }
 0x633   : > { %v3717_v38 = vsel %vm510_vm5, %v3709_v2, %v3711_v37  ;;  %v3715_v39 = vsel %vm510_vm5, %v3705_v8, %v3707_v14 }
 0x634   : > { %5234 = vrot.lane.b32.xlu1 %v6317_v30, %s7437_s18  ;;  %6695 = vmatpush3.bf16.msra.mxu1 %v3717_v38 }
 0x635   : > { %5238 = vrot.lane.b32.xlu0 %v6319_v31, %s7437_s18  ;;  %3731 = vmatpush1.bf16.msra.mxu0 %v3715_v39 }
 0x636   : > { %3845 = vmatprep.subr.bf16.mxu0 %v3831_v10  ;;  %v3938_v12 = vpop.permute.xlu1 %3937  ;;  %v3932_v41 = vpop.permute.xlu0 %3931  ;;  %6700 = vmatprep.subr.bf16.mxu1 %v7432_v6 }
 0x637   : > { %6697 = vmatmul.mubr.msk.bf16.vlgmr.msra.gmra.mrb[12].mxu1 %vm3724_vm0, %v3655_v40  ;;  %v3949_v63 = vsel %vm732_vm9, %v3936_v7, %v3938_v12  ;;  %v3947_v13 = vsel %vm732_vm9, %v3932_v41, %v3934_v62  ;;  %v6291_v62 = vld [vmem:[%s9175_s5 + $0xc] sm:$0xf]  ;;  %v6303_v41 = vld [vmem:[%s9175_s5 + $0x14] sm:$0xf] }
 0x638   : > { %6283 = vmatmul.mubr.msk.bf16.vlgmr.msra.gmra.mrb[12].mxu0 %vm3724_vm0, %v3655_v40  ;;  %4832 = vrot.lane.b32.xlu1 %v8438_v25, %s7434_s27 }
 0x639   : > { %6701 = vmatpush3.bf16.msra.mxu1 %v3832_v42  ;;  %5240 = vrot.lane.b32.xlu0 %v6320_v34, %s7437_s18 }
 0x63a   : > { %3846 = vmatpush1.bf16.msra.mxu0 %v3830_v43  ;;  %v3827_v45 = vpop.permute.xlu1 %3826  ;;  %v3825_v46 = vpop.permute.xlu0 %3824  ;;  %6702 = vmatprep.subr.bf16.mxu1 %v7432_v6 }
 0x63b   : > { %v3834_v47 = vsel %vm622_vm7, %v3825_v46, %v3827_v45  ;;  %6704 = vmatprep.mubr.msk.bf16.mxu1 %vm7433_vm4, %v7432_v6  ;;  %3877 = vmatprep.mubr.bf16.mxu0 %v7431_v0 }
 0x63c   : > { %4830 = vrot.lane.b32.xlu1 %v8448_v27, %s7434_s27  ;;  %3847 = vmatprep.subr.bf16.mxu0 %v3834_v47 }
 0x63d   : > { %4834 = vrot.lane.b32.xlu0 %v8435_v24, %s7434_s27 }
 0x63e   : > { %v3829_v52 = vpop.permute.xlu1 %3828  ;;  %v3823_v53 = vpop.permute.xlu0 %3822 }
 0x63f   : > { %v3835_v54 = vsel %vm622_vm7, %v3827_v45, %v3829_v52  ;;  %v3833_v55 = vsel %vm622_vm7, %v3823_v53, %v3825_v46 }
 0x640   : > { %4970 = vrot.lane.b32.xlu1 %v8438_v25, %s7435_s29  ;;  %6703 = vmatpush3.bf16.msra.mxu1 %v3835_v54 }
 0x641   : > { %4836 = vrot.lane.b32.xlu0 %v8445_v26, %s7434_s27  ;;  %3848 = vmatpush1.bf16.msra.mxu0 %v3833_v55 }
 0x642   : > { %3962 = vmatprep.subr.bf16.mxu0 %v3948_v58  ;;  %v4053_v60 = vpop.permute.xlu1 %4052  ;;  %v4051_v61 = vpop.permute.xlu0 %4050  ;;  %6708 = vmatprep.subr.bf16.mxu1 %v7432_v6  ;;  %v6306_v58 = vld [vmem:[%s9175_s5 + $0x18] sm:$0xf] }
 0x643   : > { %6705 = vmatmul.mubr.msk.bf16.vlgmr.msra.gmra.mrb[12].mxu1 %vm3724_vm0, %v6285_v57  ;;  %v4065_v44 = vsel %vm842_vm10, %v4051_v61, %v4053_v60 }
 0x644   : > { %6286 = vmatmul.mubr.msk.bf16.vlgmr.msra.gmra.mrb[12].mxu0 %vm3724_vm0, %v6285_v57  ;;  %4968 = vrot.lane.b32.xlu1 %v8448_v27, %s7435_s29 }
 0x645   : > { %6709 = vmatpush3.bf16.msra.mxu1 %v3949_v63  ;;  %4972 = vrot.lane.b32.xlu0 %v8435_v24, %s7435_s29 }
 0x646   : > { %3963 = vmatpush1.bf16.msra.mxu0 %v3947_v13  ;;  %v3944_v16 = vpop.permute.xlu1 %3943  ;;  %v3942_v5 = vpop.permute.xlu0 %3941  ;;  %6710 = vmatprep.subr.bf16.mxu1 %v7432_v6 }
 0x647   : > { %v3951_v18 = vsel %vm732_vm9, %v3942_v5, %v3944_v16  ;;  %6712 = vmatprep.mubr.msk.bf16.mxu1 %vm7433_vm4, %v7432_v6  ;;  %3994 = vmatprep.mubr.bf16.mxu0 %v7431_v0 }
 0x648   : > { %5107 = vrot.lane.b32.xlu1 %v8438_v25, %s7436_s16  ;;  %3964 = vmatprep.subr.bf16.mxu0 %v3951_v18 }
 0x649   : > { %4974 = vrot.lane.b32.xlu0 %v8445_v26, %s7435_s29 }
 0x64a   : > { %v3946_v11 = vpop.permute.xlu1 %3945  ;;  %v3940_v19 = vpop.permute.xlu0 %3939 }
 0x64b   : > { %v3952_v20 = vsel %vm732_vm9, %v3944_v16, %v3946_v11  ;;  %v3950_v22 = vsel %vm732_vm9, %v3940_v19, %v3942_v5 }
 0x64c   : > { %5105 = vrot.lane.b32.xlu1 %v8448_v27, %s7436_s16  ;;  %6711 = vmatpush3.bf16.msra.mxu1 %v3952_v20  ;;  %v6309_v20 = vld [vmem:[%s9175_s5 + $0x1c] sm:$0xf] }
 0x64d   : > { %5109 = vrot.lane.b32.xlu0 %v8435_v24, %s7436_s16  ;;  %3965 = vmatpush1.bf16.msra.mxu0 %v3950_v22 }
 0x64e   : > { %4079 = vmatprep.subr.bf16.mxu0 %v4065_v44  ;;  %v4055_v49 = vpop.permute.xlu1 %4054  ;;  %v4049_v28 = vpop.permute.xlu0 %4048  ;;  %6716 = vmatprep.subr.bf16.mxu1 %v7432_v6 }
 0x64f   : > { %v4066_v29 = vsel %vm842_vm10, %v4053_v60, %v4055_v49  ;;  %v4064_v30 = vsel %vm842_vm10, %v4049_v28, %v4051_v61  ;;  %6713 = vmatmul.mubr.msk.bf16.vlgmr.msra.gmra.mrb[12].mxu1 %vm3724_vm0, %v6288_v23 }
 0x650   : > { %6289 = vmatmul.mubr.msk.bf16.vlgmr.msra.gmra.mrb[12].mxu0 %vm3724_vm0, %v6288_v23  ;;  %5244 = vrot.lane.b32.xlu1 %v8438_v25, %s7437_s18 }
 0x651   : > { %6717 = vmatpush3.bf16.msra.mxu1 %v4066_v29  ;;  %5111 = vrot.lane.b32.xlu0 %v8445_v26, %s7436_s16 }
 0x652   : > { %4080 = vmatpush1.bf16.msra.mxu0 %v4064_v30  ;;  %v4061_v31 = vpop.permute.xlu1 %4060  ;;  %v4059_v32 = vpop.permute.xlu0 %4058  ;;  %6718 = vmatprep.subr.bf16.mxu1 %v7432_v6 }
 0x653   : > { %v4068_v33 = vsel %vm842_vm10, %v4059_v32, %v4061_v31  ;;  %6720 = vmatprep.mubr.msk.bf16.mxu1 %vm7433_vm4, %v7432_v6  ;;  %4111 = vmatprep.mubr.bf16.mxu0 %v7431_v0 }
 0x654   : > { %5242 = vrot.lane.b32.xlu1 %v8448_v27, %s7437_s18  ;;  %4081 = vmatprep.subr.bf16.mxu0 %v4068_v33 }
 0x655   : > { %5246 = vrot.lane.b32.xlu0 %v8435_v24, %s7437_s18 }
 0x656   : > { %v4063_v25 = vpop.permute.xlu1 %4062  ;;  %v4057_v34 = vpop.permute.xlu0 %4056 }
 0x657   : > { %v4069_v35 = vsel %vm842_vm10, %v4061_v31, %v4063_v25  ;;  %v4067_v36 = vsel %vm842_vm10, %v4057_v34, %v4059_v32  ;;  %v6312_v31 = vld [vmem:[%s9175_s5 + $0x20] sm:$0xf] }
 0x658   : > { %6719 = vmatpush3.bf16.msra.mxu1 %v4069_v35  ;;  %4082 = vmatpush1.bf16.msra.mxu0 %v4067_v36 }
 0x659   : > { %5248 = vrot.lane.b32.xlu0 %v8445_v26, %s7437_s18  ;;  %4208 = vmatprep.subr.bf16.mxu0 %v8492_v59 }
 0x65a   : > { %v4299_v27 = vpop.permute.xlu1 %4298  ;;  %v4297_v7 = vpop.permute.xlu0 %4296  ;;  %6724 = vmatprep.subr.bf16.mxu1 %v7432_v6 }
 0x65b   : > { %6721 = vmatmul.mubr.msk.bf16.vlgmr.msra.gmra.mrb[12].mxu1 %vm3724_vm0, %v6291_v62  ;;  %v4307_v2 = vsel %vm1058_vm11, %v4297_v7, %v4299_v27 }
 0x65c   : > { %6292 = vmatmul.mubr.msk.bf16.vlgmr.msra.gmra.mrb[12].mxu0 %vm3724_vm0, %v6291_v62  ;;  %6725 = vmatpush3.bf16.msra.mxu1 %v8490_v56 }
 0x65d   : > { %4209 = vmatpush1.bf16.msra.mxu0 %v8501_v4  ;;  %6726 = vmatprep.subr.bf16.mxu1 %v7432_v6 }
 0x65e   : > { %4210 = vmatprep.subr.bf16.mxu0 %v8499_v1  ;;  %v4303_v24 = vpop.permute.xlu1 %4302  ;;  %v4295_v26 = vpop.permute.xlu0 %4294  ;;  %6728 = vmatprep.mubr.msk.bf16.mxu1 %vm7433_vm4, %v7432_v6  ;;  %v6294_v1 = vld [vmem:[%s9175_s5 + $0x10] sm:$0xf] }
 0x65f   : > { %4240 = vmatprep.mubr.bf16.mxu0 %v7431_v0  ;;  %v4306_v8 = vsel %vm1058_vm11, %v4295_v26, %v4297_v7 }
 0x660   : > { %6727 = vmatpush3.bf16.msra.mxu1 %v8510_v17 }
 0x661   : > { %4211 = vmatpush1.bf16.msra.mxu0 %v8508_v15  ;;  %6732 = vmatprep.subr.bf16.mxu1 %v7432_v6 }
 0x662   : > { %4319 = vmatprep.subr.bf16.mxu0 %v4307_v2  ;;  %v4301_v56 = vpop.permute.xlu1 %4300  ;;  %v4305_v14 = vpop.permute.xlu0 %4304 }
 0x663   : > { %v4309_v15 = vsel %vm1058_vm11, %v4303_v24, %v4305_v14  ;;  %v4308_v39 = vsel %vm1058_vm11, %v4301_v56, %v4303_v24 }
 0x666   : > { %v4410_v9 = vpop.permute.xlu1 %4409  ;;  %v4408_v37 = vpop.permute.xlu0 %4407 }
 0x667   : > { %6729 = vmatmul.mubr.msk.bf16.vlgmr.msra.gmra.mrb[12].mxu1 %vm3724_vm0, %v6294_v1  ;;  %v4418_v40 = vsel %vm1165_vm12, %v4408_v37, %v4410_v9 }
 0x668   : > { %6301 = vmatmul.mubr.msk.bf16.vlgmr.msra.gmra.mrb[12].mxu0 %vm3724_vm0, %v6294_v1  ;;  %6733 = vmatpush3.bf16.msra.mxu1 %v4299_v27 }
 0x669   : > { %4320 = vmatpush1.bf16.msra.mxu0 %v4306_v8  ;;  %6734 = vmatprep.subr.bf16.mxu1 %v7432_v6 }
 0x66a   : > { %4321 = vmatprep.subr.bf16.mxu0 %v4309_v15  ;;  %v4414_v17 = vpop.permute.xlu1 %4413  ;;  %v4406_v38 = vpop.permute.xlu0 %4405  ;;  %6736 = vmatprep.mubr.msk.bf16.mxu1 %vm7433_vm4, %v7432_v6 }
 0x66b   : > { %4351 = vmatprep.mubr.bf16.mxu0 %v7431_v0  ;;  %v4417_v45 = vsel %vm1165_vm12, %v4406_v38, %v4408_v37 }
 0x66c   : > { %6735 = vmatpush3.bf16.msra.mxu1 %v4305_v14 }
 0x66d   : > { %4322 = vmatpush1.bf16.msra.mxu0 %v4308_v39  ;;  %6740 = vmatprep.subr.bf16.mxu1 %v7432_v6 }
 0x66e   : > { %4430 = vmatprep.subr.bf16.mxu0 %v4418_v40  ;;  %v4412_v10 = vpop.permute.xlu1 %4411  ;;  %v4416_v12 = vpop.permute.xlu0 %4415 }
 0x66f   : > { %v4420_v46 = vsel %vm1165_vm12, %v4414_v17, %v4416_v12  ;;  %v4419_v53 = vsel %vm1165_vm12, %v4412_v10, %v4414_v17 }
 0x672   : > { %v4521_v42 = vpop.permute.xlu1 %4520  ;;  %v4519_v43 = vpop.permute.xlu0 %4518 }
 0x673   : > { %6737 = vmatmul.mubr.msk.bf16.vlgmr.msra.gmra.mrb[12].mxu1 %vm3724_vm0, %v6303_v41  ;;  %v4529_v54 = vsel %vm1272_vm13, %v4519_v43, %v4521_v42 }
 0x674   : > { %6304 = vmatmul.mubr.msk.bf16.vlgmr.msra.gmra.mrb[12].mxu0 %vm3724_vm0, %v6303_v41  ;;  %6741 = vmatpush3.bf16.msra.mxu1 %v4410_v9 }
 0x675   : > { %4431 = vmatpush1.bf16.msra.mxu0 %v4417_v45  ;;  %6742 = vmatprep.subr.bf16.mxu1 %v7432_v6 }
 0x676   : > { %4432 = vmatprep.subr.bf16.mxu0 %v4420_v46  ;;  %v4525_v47 = vpop.permute.xlu1 %4524  ;;  %v4517_v52 = vpop.permute.xlu0 %4516  ;;  %4462 = vmatprep.mubr.bf16.mxu0 %v7431_v0 }
 0x677   : > { %6744 = vmatprep.mubr.msk.bf16.mxu1 %vm7433_vm4, %v7432_v6  ;;  %v4528_v63 = vsel %vm1272_vm13, %v4517_v52, %v4519_v43 }
 0x678   : > { %6743 = vmatpush3.bf16.msra.mxu1 %v4416_v12 }
 0x679   : > { %4433 = vmatpush1.bf16.msra.mxu0 %v4419_v53  ;;  %6748 = vmatprep.subr.bf16.mxu1 %v7432_v6 }
 0x67a   : > { %4541 = vmatprep.subr.bf16.mxu0 %v4529_v54  ;;  %v4523_v55 = vpop.permute.xlu1 %4522  ;;  %v4527_v57 = vpop.permute.xlu0 %4526 }
 0x67b   : > { %v4531_v13 = vsel %vm1272_vm13, %v4525_v47, %v4527_v57  ;;  %v4530_v5 = vsel %vm1272_vm13, %v4523_v55, %v4525_v47 }
 0x67e   : > { %v4632_v60 = vpop.permute.xlu1 %4631  ;;  %v4630_v61 = vpop.permute.xlu0 %4629 }
 0x67f   : > { %6745 = vmatmul.mubr.msk.bf16.vlgmr.msra.gmra.mrb[12].mxu1 %vm3724_vm0, %v6306_v58  ;;  %v4640_v11 = vsel %vm1379_vm14, %v4630_v61, %v4632_v60 }
 0x680   : > { %6307 = vmatmul.mubr.msk.bf16.vlgmr.msra.gmra.mrb[12].mxu0 %vm3724_vm0, %v6306_v58  ;;  %6749 = vmatpush3.bf16.msra.mxu1 %v4521_v42 }
 0x681   : > { %4542 = vmatpush1.bf16.msra.mxu0 %v4528_v63  ;;  %6750 = vmatprep.subr.bf16.mxu1 %v7432_v6 }
 0x682   : > { %4543 = vmatprep.subr.bf16.mxu0 %v4531_v13  ;;  %v4636_v16 = vpop.permute.xlu1 %4635  ;;  %4573 = vmatprep.mubr.bf16.mxu0 %v7431_v0  ;;  %v4628_v18 = vpop.permute.xlu0 %4627 }
 0x683   : > { %6752 = vmatprep.mubr.msk.bf16.mxu1 %vm7433_vm4, %v7432_v6  ;;  %v4639_v44 = vsel %vm1379_vm14, %v4628_v18, %v4630_v61 }
 0x684   : > { %6751 = vmatpush3.bf16.msra.mxu1 %v4527_v57 }
 0x685   : > { %4544 = vmatpush1.bf16.msra.mxu0 %v4530_v5  ;;  %6756 = vmatprep.subr.bf16.mxu1 %v7432_v6 }
 0x686   : > { %4652 = vmatprep.subr.bf16.mxu0 %v4640_v11  ;;  %v4634_v19 = vpop.permute.xlu1 %4633  ;;  %v4638_v22 = vpop.permute.xlu0 %4637 }
 0x687   : > { %v4642_v49 = vsel %vm1379_vm14, %v4636_v16, %v4638_v22  ;;  %v4641_v29 = vsel %vm1379_vm14, %v4634_v19, %v4636_v16 }
 0x68a   : > { %v4825_v23 = vpop.permute.xlu1 %4824 }
 0x68b   : > { %6753 = vmatmul.mubr.msk.bf16.vlgmr.msra.gmra.mrb[12].mxu1 %vm3724_vm0, %v6309_v20 }
 0x68c   : > { %6310 = vmatmul.mubr.msk.bf16.vlgmr.msra.gmra.mrb[12].mxu0 %vm3724_vm0, %v6309_v20  ;;  %6757 = vmatpush3.bf16.msra.mxu1 %v4632_v60 }
 0x68d   : > { %4653 = vmatpush1.bf16.msra.mxu0 %v4639_v44  ;;  %6758 = vmatprep.subr.bf16.mxu1 %v7432_v6 }
 0x68e   : > { %4654 = vmatprep.subr.bf16.mxu0 %v4642_v49  ;;  %v4823_v28 = vpop.permute.xlu1 %4822  ;;  %4684 = vmatprep.mubr.bf16.mxu0 %v7431_v0 }
 0x68f   : > { %6760 = vmatprep.mubr.msk.bf16.mxu1 %vm7433_vm4, %v7432_v6  ;;  %v4846_v62 = vsel %vm510_vm5, %v4823_v28, %v4825_v23 }
 0x690   : > { %6759 = vmatpush3.bf16.msra.mxu1 %v4638_v22 }
 0x691   : > { %4655 = vmatpush1.bf16.msra.mxu0 %v4641_v29  ;;  %6764 = vmatprep.subr.bf16.mxu1 %v7432_v6 }
 0x692   : > { %v4963_v30 = vpop.permute.xlu1 %4962 }
 0x696   : > { %v4961_v32 = vpop.permute.xlu1 %4960 }
 0x697   : > { %v8735_v33 = vsel %vm622_vm7, %v4961_v32, %v4963_v30  ;;  %6761 = vmatmul.mubr.msk.bf16.vlgmr.msra.gmra.mrb[12].mxu1 %vm3724_vm0, %v6312_v31  ;;  %v3653_v25 = vpop.permute.xlu0 %3652 }
 0x698   : > { %6313 = vmatmul.mubr.msk.bf16.vlgmr.msra.gmra.mrb[12].mxu0 %vm3724_vm0, %v6312_v31  ;;  %6770 = vmatprep.mubr.msk.bf16.mxu1 %vm7433_vm4, %v7432_v6 }
 0x699   : > { %4906 = vmatprep.mubr.bf16.mxu0 %v7431_v0 }
 0x69a   : > { %v5100_v34 = vpop.permute.xlu1 %5099 }
 0x69b   : > { %v4827_v35 = vpop.permute.xlu0 %4826 }
 0x69c   : > { %v4847_v36 = vsel %vm510_vm5, %v4825_v23, %v4827_v35 }
 0x69d   : > { %4874 = vmatprep.subr.bf16.mxu0 %v4847_v36 }
 0x69e   : > { %v5098_v27 = vpop.permute.xlu1 %5097  ;;  %4875 = vmatpush1.bf16.msra.mxu0 %v4846_v62 }
 0x69f   : > { %v8745_v7 = vsel %vm732_vm9, %v5098_v27, %v5100_v34  ;;  %v4829_v24 = vpop.permute.xlu0 %4828 }
 0x6a0   : > { %v4848_v26 = vsel %vm510_vm5, %v4827_v35, %v4829_v24  ;;  %v8806_v24 = vld [vmem:[#allocation2 + $0x34] ss:$20 sps:$4 sm:$0xff]  }
 0x6a1   : > { %6765 = vmatpush3.bf16.msra.mxu1 %v4848_v26 }
 0x6a2   : > { %v5237_v2 = vpop.permute.xlu1 %5236  ;;  %6766 = vmatprep.subr.bf16.mxu1 %v7432_v6 }
 0x6a3   : > { %v4965_v56 = vpop.permute.xlu0 %4964 }
 0x6a4   : > { %v8750_v14 = vsel %vm622_vm7, %v4963_v30, %v4965_v56 }
 0x6a6   : > { %v5235_v1 = vpop.permute.xlu1 %5234 }
 0x6a7   : > { %v8753_v9 = vsel %vm842_vm10, %v5235_v1, %v5237_v2  ;;  %v4967_v37 = vpop.permute.xlu0 %4966 }
 0x6a8   : > { %v8756_v8 = vsel %vm622_vm7, %v4965_v56, %v4967_v37 }
 0x6aa   : > { %v4833_v10 = vpop.permute.xlu1 %4832 }
 0x6ab   : > { %v5102_v15 = vpop.permute.xlu0 %5101 }
 0x6ac   : > { %v8759_v17 = vsel %vm732_vm9, %v5100_v34, %v5102_v15 }
 0x6ae   : > { %v4831_v43 = vpop.permute.xlu1 %4830 }
 0x6af   : > { %v5104_v38 = vpop.permute.xlu0 %5103  ;;  %v4849_v47 = vsel %vm510_vm5, %v4831_v43, %v4833_v10 }
 0x6b0   : > { %v8762_v39 = vsel %vm732_vm9, %v5102_v15, %v5104_v38 }
 0x6b2   : > { %v4971_v56 = vpop.permute.xlu1 %4970 }
 0x6b3   : > { %v5239_v40 = vpop.permute.xlu0 %5238 }
 0x6b4   : > { %v8765_v12 = vsel %vm842_vm10, %v5237_v2, %v5239_v40 }
 0x6b6   : > { %v4969_v37 = vpop.permute.xlu1 %4968 }
 0x6b7   : > { %v5241_v41 = vpop.permute.xlu0 %5240 }
 0x6b8   : > { %v8768_v42 = vsel %vm842_vm10, %v5239_v40, %v5241_v41 }
 0x6ba   : > { %v8870_v38 = vpop.permute.xlu1 %5107 }
 0x6bb   : > { %v4835_v45 = vpop.permute.xlu0 %4834 }
 0x6bc   : > { %v4850_v46 = vsel %vm510_vm5, %v4833_v10, %v4835_v45  ;;  %v4763_v10 = vld [vmem:[%s9181_s11] sm:$0xf] }
 0x6bd   : > { %4876 = vmatprep.subr.bf16.mxu0 %v4850_v46 }
 0x6be   : > { %4877 = vmatpush1.bf16.msra.mxu0 %v4849_v47 }
 0x6bf   : > { %v4837_v52 = vpop.permute.xlu0 %4836 }
 0x6c0   : > { %v4851_v53 = vsel %vm510_vm5, %v4835_v45, %v4837_v52 }
 0x6c1   : > { %6767 = vmatpush3.bf16.msra.mxu1 %v4851_v53 }
 0x6c2   : > { %6768 = vmatprep.subr.bf16.mxu1 %v7432_v6 }
 0x6c3   : > { %v4973_v1 = vpop.permute.xlu0 %4972 }
 0x6c7   : > { %v4975_v15 = vpop.permute.xlu0 %4974 }
 0x76a   : > { %v4727_v54 = vpop.f32.mrb[12].mxu1 }
 0x76b   : > { %v4686_v55 = vpop.f32.mrb[12].mxu0  ;;  %v6865_v57 = vadd.f32 %v4727_v54, %v3653_v25  ;;  %v6762_v58 = vpop.f32.mrb[13].mxu1 }
 0x76c   : > { %v6863_v60 = vadd.f32 %v4686_v55, %v3653_v25  ;;  %v4688_v61 = vpop.f32.mrb[13].mxu0  ;;  %v4730_v63 = vpop.f32.mrb[14].mxu1 }
 0x76d   : > { %vm4738_vm1 = vcmp.ge.f32.partialorder %v6865_v57, 0.0  ;;  %v4741_v13 = vmul.f32 0.2, %v6865_v57  ;;  %v6864_v16 = vadd.f32 %v4688_v61, %v3653_v25  ;;  %v4690_v5 = vpop.f32.mrb[14].mxu0  ;;  %v6763_v18 = vpop.f32.mrb[15].mxu1 }
 0x76e   : > { %vm4736_vm3 = vcmp.ge.f32.partialorder %v6863_v60, 0.0  ;;  %v4739_v11 = vmul.f32 0.2, %v6863_v60  ;;  %v4691_v19 = vpop.f32.mrb[15].mxu0  ;;  %v4769_v63 = vld [vmem:[%s9176_s6] sm:$0x3]  ;;  %v4988_v5 = vsel %vm622_vm7, %v4971_v56, %v4973_v1 }
 0x76f   : > { %v4744_v20 = vsel %vm4738_vm1, %v6865_v57, %v4741_v13  ;;  %vm4737_vm8 = vcmp.ge.f32.partialorder %v6864_v16, 0.0  ;;  %v4740_v22 = vmul.f32 0.2, %v6864_v16  ;;  %v4989_v19 = vsel %vm622_vm7, %v4973_v1, %v4975_v15  ;;  %v6336_v1 = vld [vmem:[%s9176_s6 + $0x4] sm:$0x3] }
 0x770   : > { %v4742_v23 = vsel %vm4736_vm3, %v6863_v60, %v4739_v11  ;;  %v4747_v44 = vmul.f32 %v4744_v20, %v7886_v48 }
 0x771   : > { %v4745_v49 = vmul.f32 %v4742_v23, %v7888_v50  ;;  %v4743_v28 = vsel %vm4737_vm8, %v6864_v16, %v4740_v22  ;;  %v8782_v50 = vld [vmem:[#allocation2 + $0xc] ss:$20 sps:$4 sm:$0xff]  }
 0x772   : > { %v6385_v29 = vpack.c.bf16 %v4747_v44, %v4747_v44  ;;  %v4746_v30 = vmul.f32 %v4743_v28, %v7890_v51  ;;  %v5375_v51 = vld [vmem:[#allocation2 + $0x2c] sm:$0xff]  ;;  %v6332_v28 = vld [vmem:[%s9176_s6 + $0x2] sm:$0x3] }
 0x773   : > { %v8793_v62 = vcombine.high %v5375_v51, %v8430_v21  ;;  %v8804_v27 = vcombine.low %v5375_v51, %v8430_v21  ;;  %v8840_v2 = vpack.c.bf16 %v4745_v49, %v4745_v49 }
 0x774   : > { %4762 = vst.msk [vmem:[#allocation2 + $0x5c] sm:$0xf] %vm1520_vm2, %v6385_v29  ;;  %v6384_v31 = vpack.c.bf16 %v4746_v30, %v4745_v49  ;;  %v8838_v21 = vpack.c.bf16 %v4746_v30, %v4746_v30 }
 0x776   : > { %4761 = vst [vmem:[#allocation2 + $0x54] sm:$0xff] %v6384_v31 }
 0x77b   : > { %v8816_v26 = vld [vmem:[#allocation2 + $0x5c] ss:$0 sps:$4 sm:$0xff]  }
 0x77d   : > { %v4778_v32 = vld [vmem:[#allocation2 + $0x50] sm:$0xff]  ;;  %v4779_v35 = vld [vmem:[#allocation2 + $0x58] sm:$0xff] }
 0x77e   : > { %v6326_v25 = vcombine.high %v4778_v32, %v4778_v32  ;;  %v6325_v34 = vcombine.low %v4778_v32, %v4778_v32  ;;  %v6328_v36 = vcombine.high %v4779_v35, %v4779_v35  ;;  %v6327_v48 = vcombine.low %v4779_v35, %v4779_v35 }
 0x780   : > { %4840 = vrot.lane.b32.xlu0 %v6326_v25, %s7434_s27  ;;  %4838 = vrot.lane.b32.xlu1 %v6325_v34, %s7434_s27 }
 0x784   : > { %4844 = vrot.lane.b32.xlu0 %v6328_v36, %s7434_s27  ;;  %4842 = vrot.lane.b32.xlu1 %v6327_v48, %s7434_s27 }
 0x788   : > { %5523 = vrot.lane.b32.xlu0 %v8782_v50, %s7438_s28  ;;  %5521 = vrot.lane.b32.xlu1 %v8492_v59, %s7438_s28 }
 0x78c   : > { %4978 = vrot.lane.b32.xlu0 %v6326_v25, %s7435_s29  ;;  %4976 = vrot.lane.b32.xlu1 %v6325_v34, %s7435_s29 }
 0x790   : > { %4982 = vrot.lane.b32.xlu0 %v6328_v36, %s7435_s29  ;;  %4980 = vrot.lane.b32.xlu1 %v6327_v48, %s7435_s29  ;;  %s9126_s29 = scalar_lea.hbm %s9182_s12, %s7192_s26 }
 0x794   : > { %5527 = vrot.lane.b32.xlu0 %v8793_v62, %s7438_s28  ;;  %5519 = vrot.lane.b32.xlu1 %v8501_v4, %s7438_s28 }
 0x798   : > { %5115 = vrot.lane.b32.xlu0 %v6326_v25, %s7436_s16  ;;  %5113 = vrot.lane.b32.xlu1 %v6325_v34, %s7436_s16 }
 0x79c   : > { %5119 = vrot.lane.b32.xlu0 %v6328_v36, %s7436_s16  ;;  %5117 = vrot.lane.b32.xlu1 %v6327_v48, %s7436_s16  ;;  %s7361_s16 = sshll.u32 %s7442_s21, 4  ;;  %s7362_s16 = int_to_ptr.vmem [resolvable:$false] %s7361_s16 }
 0x79d   : > { %p7364_p13 = scmp.lt.s32.totalorder %s9128_s23, %s7362_s16 }
 0x7a0   : > { %5525 = vrot.lane.b32.xlu0 %v8804_v27, %s7438_s28  ;;  %5529 = vrot.lane.b32.xlu1 %v8806_v24, %s7438_s28 }
 0x7a4   : > { %5252 = vrot.lane.b32.xlu0 %v6326_v25, %s7437_s18  ;;  %5250 = vrot.lane.b32.xlu1 %v6325_v34, %s7437_s18 }
 0x7a8   : > { %5256 = vrot.lane.b32.xlu0 %v6328_v36, %s7437_s18  ;;  %5254 = vrot.lane.b32.xlu1 %v6327_v48, %s7437_s18  ;;  %s7363_s18 = scalar_lea.vmem %s7362_s16, 384 }
 0x7ac   : > { %5649 = vrot.lane.b32.xlu0 %v8492_v59, %s7439_s20  ;;  %5535 = vrot.lane.b32.xlu1 %v8816_v26, %s7438_s28 }
 0x7b0   : > { %5647 = vrot.lane.b32.xlu0 %v8501_v4, %s7439_s20  ;;  %5651 = vrot.lane.b32.xlu1 %v8782_v50, %s7439_s20 }
 0x7b4   : > { %5657 = vrot.lane.b32.xlu0 %v8806_v24, %s7439_s20  ;;  %5655 = vrot.lane.b32.xlu1 %v8793_v62, %s7439_s20 }
 0x7b8   : > { %5663 = vrot.lane.b32.xlu0 %v8816_v26, %s7439_s20  ;;  %5653 = vrot.lane.b32.xlu1 %v8804_v27, %s7439_s20 }
 0x7bc   : > { %5779 = vrot.lane.b32.xlu0 %v8782_v50, %s7440_s17  ;;  %5777 = vrot.lane.b32.xlu1 %v8492_v59, %s7440_s17 }
 0x7c0   : > { %5533 = vrot.lane.b32.xlu0 %v8838_v21, %s7438_s28  ;;  %5531 = vrot.lane.b32.xlu1 %v8840_v2, %s7438_s28 }
 0x7c4   : > { %5783 = vrot.lane.b32.xlu0 %v8793_v62, %s7440_s17  ;;  %5775 = vrot.lane.b32.xlu1 %v8501_v4, %s7440_s17 }
 0x7c8   : > { %5781 = vrot.lane.b32.xlu0 %v8804_v27, %s7440_s17  ;;  %5785 = vrot.lane.b32.xlu1 %v8806_v24, %s7440_s17 }
 0x7cc   : > { %5659 = vrot.lane.b32.xlu0 %v8840_v2, %s7439_s20  ;;  %5661 = vrot.lane.b32.xlu1 %v8838_v21, %s7439_s20 }
 0x7d0   : > { %5905 = vrot.lane.b32.xlu0 %v8492_v59, %s7441_s15  ;;  %5791 = vrot.lane.b32.xlu1 %v8816_v26, %s7440_s17  ;;  %v8872_v59 = vpop.permute.xlu0 %5109 }
 0x7d1   : > { %v5125_v31 = vsel %vm732_vm9, %v8870_v38, %v8872_v59 }
 0x7d4   : > { %5903 = vrot.lane.b32.xlu0 %v8501_v4, %s7441_s15  ;;  %5907 = vrot.lane.b32.xlu1 %v8782_v50, %s7441_s15  ;;  %v8882_v4 = vpop.permute.xlu1 %5105  ;;  %v8884_v40 = vpop.permute.xlu0 %5111 }
 0x7d8   : > { %5789 = vrot.lane.b32.xlu0 %v8838_v21, %s7440_s17  ;;  %5787 = vrot.lane.b32.xlu1 %v8840_v2, %s7440_s17  ;;  %v8893_v41 = vpop.permute.xlu1 %5244  ;;  %v8895_v43 = vpop.permute.xlu0 %5246 }
 0x7dc   : > { %5913 = vrot.lane.b32.xlu0 %v8806_v24, %s7441_s15  ;;  %5911 = vrot.lane.b32.xlu1 %v8793_v62, %s7441_s15  ;;  %v8897_v45 = vpop.permute.xlu1 %5242  ;;  %v8899_v46 = vpop.permute.xlu0 %5248 }
 0x7e0   : > { %5915 = vrot.lane.b32.xlu0 %v8840_v2, %s7441_s15  ;;  %5909 = vrot.lane.b32.xlu1 %v8804_v27, %s7441_s15 }
 0x7e4   : > { %5919 = vrot.lane.b32.xlu0 %v8816_v26, %s7441_s15  ;;  %5917 = vrot.lane.b32.xlu1 %v8838_v21, %s7441_s15 }
 0x7e8   : > { %4766 = vperm.xlu1 %7262, %v4763_v10  }
 0x7f2   : > { %v4839_v47 = vpop.permute.xlu1 %4838  ;;  %v4841_v52 = vpop.permute.xlu0 %4840 }
 0x7f3   : > { %v4852_v53 = vsel %vm510_vm5, %v4839_v47, %v4841_v52 }
 0x7f4   : > { %v4866_v60 = vsel %vm518_vm6, %v4852_v53, 0 }
 0x7f6   : > { %v4843_v54 = vpop.permute.xlu1 %4842  ;;  %v4845_v55 = vpop.permute.xlu0 %4844 }
 0x7f7   : > { %v4853_v57 = vsel %vm510_vm5, %v4841_v52, %v4843_v54  ;;  %v4854_v58 = vsel %vm510_vm5, %v4843_v54, %v4845_v55  ;;  %v7290_v55 = vld [vmem:[#allocation2 + $0x4] ss:$20 sps:$4 sm:$0xff]  }
 0x7f8   : > { %v4872_v61 = vsel %vm518_vm6, %v4854_v58, 0  ;;  %6329 = vmatprep.subr.msk.bf16.mxu0 %vm518_vm6, %v4853_v57 }
 0x7f9   : > { %4879 = vmatpush1.bf16.msra.mxu0 %v4866_v60  ;;  %6769 = vmatpush3.bf16.msra.mxu1 %v4872_v61  ;;  %v5431_v61 = vsel %vm518_vm6, %v8816_v26, 0 }
 0x7fa   : > { %v8910_v13 = vpop.permute.xlu1 %5521  ;;  %5011 = vmatprep.subr.bf16.mxu0 %v8750_v14  ;;  %v8913_v16 = vpop.permute.xlu0 %5523  ;;  %6774 = vmatprep.subr.bf16.mxu1 %v7432_v6  ;;  %v4987_v14 = vsel %vm622_vm7, %v4969_v37, %v4971_v56 }
 0x7fc   : > { %6330 = vmatmul.mubr.msk.bf16.vlgmr.msra.gmra.mrb[16].mxu0 %vm4861_vm15, %v4769_v63  ;;  %6771 = vmatmul.mubr.msk.bf16.vlgmr.msra.gmra.mrb[16].mxu1 %vm4861_vm15, %v4769_v63 }
 0x7fd   : > { %5012 = vmatpush1.bf16.msra.mxu0 %v8735_v33  ;;  %6775 = vmatpush3.bf16.msra.mxu1 %v8756_v8 }
 0x7fe   : > { %v4977_v18 = vpop.permute.xlu1 %4976  ;;  %5013 = vmatprep.subr.bf16.mxu0 %v4988_v5  ;;  %v4979_v11 = vpop.permute.xlu0 %4978  ;;  %6776 = vmatprep.subr.bf16.mxu1 %v7432_v6 }
 0x7ff   : > { %5043 = vmatprep.mubr.bf16.mxu0 %v7431_v0  ;;  %6780 = vmatprep.mubr.msk.bf16.mxu1 %vm7433_vm4, %v7432_v6  ;;  %v4990_v33 = vsel %vm622_vm7, %v4977_v18, %v4979_v11 }
 0x800   : > { %v5003_v44 = vsel %vm518_vm6, %v4990_v33, 0 }
 0x801   : > { %5014 = vmatpush1.bf16.msra.mxu0 %v4987_v14  ;;  %6777 = vmatpush3.bf16.msra.mxu1 %v4989_v19 }
 0x802   : > { %v4981_v8 = vpop.permute.xlu1 %4980  ;;  %v4983_v20 = vpop.permute.xlu0 %4982  ;;  %6778 = vmatprep.subr.bf16.mxu1 %v7432_v6 }
 0x803   : > { %v4991_v22 = vsel %vm622_vm7, %v4979_v11, %v4981_v8  ;;  %v4992_v23 = vsel %vm622_vm7, %v4981_v8, %v4983_v20 }
 0x804   : > { %v5009_v49 = vsel %vm518_vm6, %v4992_v23, 0  ;;  %6333 = vmatprep.subr.msk.bf16.mxu0 %vm518_vm6, %v4991_v22  ;;  %v6357_v22 = vld [vmem:[%s9176_s6 + $0xa] sm:$0x3] }
 0x805   : > { %5016 = vmatpush1.bf16.msra.mxu0 %v5003_v44  ;;  %6779 = vmatpush3.bf16.msra.mxu1 %v5009_v49 }
 0x806   : > { %v8937_v29 = vpop.permute.xlu1 %5519  ;;  %5148 = vmatprep.subr.bf16.mxu0 %v8759_v17  ;;  %v8940_v30 = vpop.permute.xlu0 %5527  ;;  %6784 = vmatprep.subr.bf16.mxu1 %v7432_v6  ;;  %v5126_v17 = vsel %vm732_vm9, %v8872_v59, %v8884_v40 }
 0x808   : > { %6334 = vmatmul.mubr.msk.bf16.vlgmr.msra.gmra.mrb[16].mxu0 %vm4861_vm15, %v6332_v28  ;;  %6781 = vmatmul.mubr.msk.bf16.vlgmr.msra.gmra.mrb[16].mxu1 %vm4861_vm15, %v6332_v28 }
 0x809   : > { %5149 = vmatpush1.bf16.msra.mxu0 %v8745_v7  ;;  %6785 = vmatpush3.bf16.msra.mxu1 %v8762_v39  ;;  %v5124_v7 = vsel %vm732_vm9, %v8882_v4, %v8870_v38  ;;  %v5262_v38 = vsel %vm842_vm10, %v8893_v41, %v8895_v43 }
 0x80a   : > { %v5114_v32 = vpop.permute.xlu1 %5113  ;;  %5150 = vmatprep.subr.bf16.mxu0 %v5125_v31  ;;  %v5116_v25 = vpop.permute.xlu0 %5115  ;;  %6786 = vmatprep.subr.bf16.mxu1 %v7432_v6 }
 0x80b   : > { %5180 = vmatprep.mubr.bf16.mxu0 %v7431_v0  ;;  %6790 = vmatprep.mubr.msk.bf16.mxu1 %vm7433_vm4, %v7432_v6  ;;  %v5127_v39 = vsel %vm732_vm9, %v5114_v32, %v5116_v25 }
 0x80c   : > { %v5140_v51 = vsel %vm518_vm6, %v5127_v39, 0 }
 0x80d   : > { %5151 = vmatpush1.bf16.msra.mxu0 %v5124_v7  ;;  %6787 = vmatpush3.bf16.msra.mxu1 %v5126_v17 }
 0x80e   : > { %v5118_v34 = vpop.permute.xlu1 %5117  ;;  %v5120_v35 = vpop.permute.xlu0 %5119  ;;  %6788 = vmatprep.subr.bf16.mxu1 %v7432_v6 }
 0x80f   : > { %v5128_v36 = vsel %vm732_vm9, %v5116_v25, %v5118_v34  ;;  %v5129_v48 = vsel %vm732_vm9, %v5118_v34, %v5120_v35 }
 0x810   : > { %v5146_v56 = vsel %vm518_vm6, %v5129_v48, 0  ;;  %6337 = vmatprep.subr.msk.bf16.mxu0 %vm518_vm6, %v5128_v36  ;;  %v6361_v36 = vld [vmem:[%s9176_s6 + $0xc] sm:$0x3] }
 0x811   : > { %5153 = vmatpush1.bf16.msra.mxu0 %v5140_v51  ;;  %6789 = vmatpush3.bf16.msra.mxu1 %v5146_v56 }
 0x812   : > { %v8970_v37 = vpop.permute.xlu1 %5529  ;;  %5285 = vmatprep.subr.bf16.mxu0 %v8765_v12  ;;  %v8973_v15 = vpop.permute.xlu0 %5525  ;;  %6794 = vmatprep.subr.bf16.mxu1 %v7432_v6  ;;  %v5263_v12 = vsel %vm842_vm10, %v8895_v43, %v8899_v46  ;;  %v6340_v43 = vld [vmem:[%s9176_s6 + $0x6] sm:$0x3]  ;;  %v7289_v46 = vld [vmem:[#allocation2 + $0x8] ss:$20 sps:$4 sm:$0xff]  }
 0x813   : > { %v5540_v26 = vsel %vm1058_vm11, %v8940_v30, %v8970_v37 }
 0x814   : > { %6338 = vmatmul.mubr.msk.bf16.vlgmr.msra.gmra.mrb[16].mxu0 %vm4861_vm15, %v6336_v1  ;;  %6791 = vmatmul.mubr.msk.bf16.vlgmr.msra.gmra.mrb[16].mxu1 %vm4861_vm15, %v6336_v1 }
 0x815   : > { %5286 = vmatpush1.bf16.msra.mxu0 %v8753_v9  ;;  %6795 = vmatpush3.bf16.msra.mxu1 %v8768_v42  ;;  %v5261_v9 = vsel %vm842_vm10, %v8897_v45, %v8893_v41 }
 0x816   : > { %v5251_v59 = vpop.permute.xlu1 %5250  ;;  %5287 = vmatprep.subr.bf16.mxu0 %v5262_v38  ;;  %v5253_v4 = vpop.permute.xlu0 %5252  ;;  %6796 = vmatprep.subr.bf16.mxu1 %v7432_v6 }
 0x817   : > { %5317 = vmatprep.mubr.bf16.mxu0 %v7431_v0  ;;  %6800 = vmatprep.mubr.msk.bf16.mxu1 %vm7433_vm4, %v7432_v6  ;;  %v5264_v42 = vsel %vm842_vm10, %v5251_v59, %v5253_v4 }
 0x818   : > { %v5277_v53 = vsel %vm518_vm6, %v5264_v42, 0 }
 0x819   : > { %5288 = vmatpush1.bf16.msra.mxu0 %v5261_v9  ;;  %6797 = vmatpush3.bf16.msra.mxu1 %v5263_v12 }
 0x81a   : > { %v5255_v40 = vpop.permute.xlu1 %5254  ;;  %v5257_v10 = vpop.permute.xlu0 %5256  ;;  %6798 = vmatprep.subr.bf16.mxu1 %v7432_v6 }
 0x81b   : > { %v5265_v47 = vsel %vm842_vm10, %v5253_v4, %v5255_v40  ;;  %v5266_v52 = vsel %vm842_vm10, %v5255_v40, %v5257_v10 }
 0x81c   : > { %v5283_v41 = vsel %vm518_vm6, %v5266_v52, 0  ;;  %6341 = vmatprep.subr.msk.bf16.mxu0 %vm518_vm6, %v5265_v47  ;;  %v6365_v47 = vld [vmem:[%s9176_s6 + $0xe] sm:$0x3] }
 0x81d   : > { %5290 = vmatpush1.bf16.msra.mxu0 %v5277_v53  ;;  %6799 = vmatpush3.bf16.msra.mxu1 %v5283_v41 }
 0x81e   : > { %v5536_v45 = vpop.permute.xlu1 %5535  ;;  %5433 = vmatprep.subr.bf16.mxu0 %v7289_v46  ;;  %v5650_v54 = vpop.permute.xlu0 %5649  ;;  %6804 = vmatprep.subr.bf16.mxu1 %v7432_v6 }
 0x81f   : > { %v5559_v33 = vsel %vm518_vm6, %v5536_v45, 0 }
 0x820   : > { %6342 = vmatmul.mubr.msk.bf16.vlgmr.msra.gmra.mrb[16].mxu0 %vm4861_vm15, %v6340_v43  ;;  %6801 = vmatmul.mubr.msk.bf16.vlgmr.msra.gmra.mrb[16].mxu1 %vm4861_vm15, %v6340_v43 }
 0x821   : > { %5434 = vmatpush1.bf16.msra.mxu0 %v7290_v55  ;;  %6805 = vmatpush3.bf16.msra.mxu1 %v8782_v50 }
 0x822   : > { %v5652_v57 = vpop.permute.xlu1 %5651  ;;  %5435 = vmatprep.subr.bf16.mxu0 %v8793_v62  ;;  %v5648_v58 = vpop.permute.xlu0 %5647  ;;  %6806 = vmatprep.subr.bf16.mxu1 %v7432_v6  ;;  %v5425_v62 = vsel %vm518_vm6, %v8840_v2, 0  ;;  %v5537_v2 = vsel %vm1058_vm11, %v8937_v29, %v8910_v13 }
 0x823   : > { %5465 = vmatprep.mubr.bf16.mxu0 %v7431_v0  ;;  %6810 = vmatprep.mubr.msk.bf16.mxu1 %vm7433_vm4, %v7432_v6  ;;  %v5666_v20 = vsel %vm1165_vm12, %v5650_v54, %v5652_v57  ;;  %v5665_v49 = vsel %vm1165_vm12, %v5648_v58, %v5650_v54 }
 0x825   : > { %5436 = vmatpush1.bf16.msra.mxu0 %v8804_v27  ;;  %6807 = vmatpush3.bf16.msra.mxu1 %v8806_v24  ;;  %v5538_v27 = vsel %vm1058_vm11, %v8910_v13, %v8913_v16  ;;  %v6344_v24 = vld [vmem:[%s9176_s6 + $0x8] sm:$0x3]  ;;  %v5539_v13 = vsel %vm1058_vm11, %v8973_v15, %v8940_v30 }
 0x826   : > { %v5656_v60 = vpop.permute.xlu1 %5655  ;;  %6354 = vmatprep.subr.msk.bf16.mxu0 %vm518_vm6, %v8838_v21  ;;  %v5658_v50 = vpop.permute.xlu0 %5657  ;;  %6808 = vmatprep.subr.bf16.mxu1 %v7432_v6 }
 0x827   : > { %v5668_v28 = vsel %vm1165_vm12, %v5656_v60, %v5658_v50 }
 0x829   : > { %5438 = vmatpush1.bf16.msra.mxu0 %v5425_v62  ;;  %6809 = vmatpush3.bf16.msra.mxu1 %v5431_v61 }
 0x82a   : > { %v5654_v21 = vpop.permute.xlu1 %5653  ;;  %5561 = vmatprep.subr.bf16.mxu0 %v5538_v27  ;;  %v5664_v63 = vpop.permute.xlu0 %5663  ;;  %6814 = vmatprep.subr.bf16.mxu1 %v7432_v6 }
 0x82b   : > { %v5667_v31 = vsel %vm1165_vm12, %v5654_v21, %v5656_v60  ;;  %v5687_v39 = vsel %vm518_vm6, %v5664_v63, 0 }
 0x82c   : > { %6355 = vmatmul.mubr.msk.bf16.vlgmr.msra.gmra.mrb[16].mxu0 %vm4861_vm15, %v6344_v24  ;;  %6811 = vmatmul.mubr.msk.bf16.vlgmr.msra.gmra.mrb[16].mxu1 %vm4861_vm15, %v6344_v24 }
 0x82d   : > { %5562 = vmatpush1.bf16.msra.mxu0 %v5537_v2  ;;  %6815 = vmatpush3.bf16.msra.mxu1 %v8913_v16 }
 0x82e   : > { %v5778_v5 = vpop.permute.xlu1 %5777  ;;  %5563 = vmatprep.subr.bf16.mxu0 %v5540_v26  ;;  %v5780_v18 = vpop.permute.xlu0 %5779  ;;  %6816 = vmatprep.subr.bf16.mxu1 %v7432_v6 }
 0x82f   : > { %5593 = vmatprep.mubr.bf16.mxu0 %v7431_v0  ;;  %6820 = vmatprep.mubr.msk.bf16.mxu1 %vm7433_vm4, %v7432_v6  ;;  %v5794_v35 = vsel %vm1272_vm13, %v5778_v5, %v5780_v18 }
 0x831   : > { %5564 = vmatpush1.bf16.msra.mxu0 %v5539_v13  ;;  %6817 = vmatpush3.bf16.msra.mxu1 %v8970_v37 }
 0x832   : > { %v5532_v16 = vpop.permute.xlu1 %5531  ;;  %v5534_v11 = vpop.permute.xlu0 %5533  ;;  %6818 = vmatprep.subr.bf16.mxu1 %v7432_v6 }
 0x833   : > { %v5541_v14 = vsel %vm1058_vm11, %v5532_v16, %v5534_v11  ;;  %v5542_v19 = vsel %vm1058_vm11, %v5534_v11, %v5536_v45 }
 0x834   : > { %v5553_v8 = vsel %vm518_vm6, %v5541_v14, 0  ;;  %6358 = vmatprep.subr.msk.bf16.mxu0 %vm518_vm6, %v5542_v19 }
 0x835   : > { %5566 = vmatpush1.bf16.msra.mxu0 %v5553_v8  ;;  %6819 = vmatpush3.bf16.msra.mxu1 %v5559_v33  ;;  %v7291_v33 = vld [vmem:[%s7655_s30] sm:$0xff] }
 0x836   : > { %v5776_v23 = vpop.permute.xlu1 %5775  ;;  %5689 = vmatprep.subr.bf16.mxu0 %v5666_v20  ;;  %v5784_v44 = vpop.permute.xlu0 %5783  ;;  %6824 = vmatprep.subr.bf16.mxu1 %v7432_v6  ;;  %v7292_v20 = vld [vmem:[%s7655_s30 + $0x8] sm:$0xf]  ;;  %s7357_s30 = scalar_lea.vmem %s9128_s23, 192 }
 0x837   : > { %v5793_v56 = vsel %vm1272_vm13, %v5776_v23, %v5778_v5  ;;  %p7358_p6 = scmp.ne.s32.totalorder %s9128_s23, %s7357_s30  ;;  %p7365_p11 = scmp.lt.s32.totalorder %s7363_s18, %s7357_s30 }
 0x838   : > { %6359 = vmatmul.mubr.msk.bf16.vlgmr.msra.gmra.mrb[16].mxu0 %vm4861_vm15, %v6357_v22  ;;  %6821 = vmatmul.mubr.msk.bf16.vlgmr.msra.gmra.mrb[16].mxu1 %vm4861_vm15, %v6357_v22 }
 0x839   : > { %5690 = vmatpush1.bf16.msra.mxu0 %v5665_v49  ;;  %6825 = vmatpush3.bf16.msra.mxu1 %v5652_v57  ;;  %p7359_p9 = pnand %p7358_p6, %p7600_p8  ;;  %p7366_p5 = por %p7365_p11, %p7364_p13 }
 0x83a   : > { %v5786_v29 = vpop.permute.xlu1 %5785  ;;  %5691 = vmatprep.subr.bf16.mxu0 %v5668_v28  ;;  %v5782_v30 = vpop.permute.xlu0 %5781  ;;  %6826 = vmatprep.subr.bf16.mxu1 %v7432_v6 }
 0x83b   : > { %5721 = vmatprep.mubr.bf16.mxu0 %v7431_v0  ;;  %6830 = vmatprep.mubr.msk.bf16.mxu1 %vm7433_vm4, %v7432_v6  ;;  %v5796_v1 = vsel %vm1272_vm13, %v5784_v44, %v5786_v29  ;;  %v5795_v38 = vsel %vm1272_vm13, %v5782_v30, %v5784_v44  ;;  %p7360_p12 = pneg %p7359_p9 }
 0x83d   : > { %5692 = vmatpush1.bf16.msra.mxu0 %v5667_v31  ;;  %6827 = vmatpush3.bf16.msra.mxu1 %v5658_v50  ;;  %p7367_p10 = pnand %p7366_p5, %p7360_p12 }
 0x83e   : > { %v5662_v32 = vpop.permute.xlu1 %5661  ;;  %v5660_v25 = vpop.permute.xlu0 %5659  ;;  %6828 = vmatprep.subr.bf16.mxu1 %v7432_v6 }
 0x83f   : > { %v5670_v7 = vsel %vm1165_vm12, %v5662_v32, %v5664_v63  ;;  %v5669_v17 = vsel %vm1165_vm12, %v5660_v25, %v5662_v32 }
 0x840   : > { %v5681_v34 = vsel %vm518_vm6, %v5669_v17, 0  ;;  %6362 = vmatprep.subr.msk.bf16.mxu0 %vm518_vm6, %v5670_v7 }
 0x841   : > { %5694 = vmatpush1.bf16.msra.mxu0 %v5681_v34  ;;  %6829 = vmatpush3.bf16.msra.mxu1 %v5687_v39 }
 0x842   : > { %v5792_v48 = vpop.permute.xlu1 %5791  ;;  %5817 = vmatprep.subr.bf16.mxu0 %v5794_v35  ;;  %v5906_v51 = vpop.permute.xlu0 %5905  ;;  %6834 = vmatprep.subr.bf16.mxu1 %v7432_v6 }
 0x843   : > { %v5815_v42 = vsel %vm518_vm6, %v5792_v48, 0 }
 0x844   : > { %6363 = vmatmul.mubr.msk.bf16.vlgmr.msra.gmra.mrb[16].mxu0 %vm4861_vm15, %v6361_v36  ;;  %6831 = vmatmul.mubr.msk.bf16.vlgmr.msra.gmra.mrb[16].mxu1 %vm4861_vm15, %v6361_v36 }
 0x845   : > { %5818 = vmatpush1.bf16.msra.mxu0 %v5793_v56  ;;  %6835 = vmatpush3.bf16.msra.mxu1 %v5780_v18 }
 0x846   : > { %v5908_v37 = vpop.permute.xlu1 %5907  ;;  %5819 = vmatprep.subr.bf16.mxu0 %v5796_v1  ;;  %v5904_v15 = vpop.permute.xlu0 %5903  ;;  %6836 = vmatprep.subr.bf16.mxu1 %v7432_v6 }
 0x847   : > { %5849 = vmatprep.mubr.bf16.mxu0 %v7431_v0  ;;  %6840 = vmatprep.mubr.msk.bf16.mxu1 %vm7433_vm4, %v7432_v6  ;;  %v5922_v10 = vsel %vm1379_vm14, %v5906_v51, %v5908_v37  ;;  %v5921_v41 = vsel %vm1379_vm14, %v5904_v15, %v5906_v51 }
 0x849   : > { %5820 = vmatpush1.bf16.msra.mxu0 %v5795_v38  ;;  %6837 = vmatpush3.bf16.msra.mxu1 %v5786_v29 }
 0x84a   : > { %v5788_v59 = vpop.permute.xlu1 %5787  ;;  %v5790_v4 = vpop.permute.xlu0 %5789  ;;  %6838 = vmatprep.subr.bf16.mxu1 %v7432_v6 }
 0x84b   : > { %v5797_v9 = vsel %vm1272_vm13, %v5788_v59, %v5790_v4  ;;  %v5798_v12 = vsel %vm1272_vm13, %v5790_v4, %v5792_v48 }
 0x84c   : > { %v5809_v40 = vsel %vm518_vm6, %v5797_v9, 0  ;;  %6366 = vmatprep.subr.msk.bf16.mxu0 %vm518_vm6, %v5798_v12 }
 0x84d   : > { %5822 = vmatpush1.bf16.msra.mxu0 %v5809_v40  ;;  %6839 = vmatpush3.bf16.msra.mxu1 %v5815_v42 }
 0x84e   : > { %v5912_v52 = vpop.permute.xlu1 %5911  ;;  %5945 = vmatprep.subr.bf16.mxu0 %v5922_v10  ;;  %v5914_v53 = vpop.permute.xlu0 %5913  ;;  %6844 = vmatprep.subr.bf16.mxu1 %v7432_v6 }
 0x84f   : > { %v5924_v43 = vsel %vm1379_vm14, %v5912_v52, %v5914_v53 }
 0x850   : > { %6367 = vmatmul.mubr.msk.bf16.vlgmr.msra.gmra.mrb[16].mxu0 %vm4861_vm15, %v6365_v47  ;;  %6841 = vmatmul.mubr.msk.bf16.vlgmr.msra.gmra.mrb[16].mxu1 %vm4861_vm15, %v6365_v47 }
 0x851   : > { %5946 = vmatpush1.bf16.msra.mxu0 %v5921_v41  ;;  %6845 = vmatpush3.bf16.msra.mxu1 %v5908_v37 }
 0x852   : > { %v5910_v45 = vpop.permute.xlu1 %5909  ;;  %5947 = vmatprep.subr.bf16.mxu0 %v5924_v43  ;;  %v5916_v46 = vpop.permute.xlu0 %5915  ;;  %6846 = vmatprep.subr.bf16.mxu1 %v7432_v6 }
 0x853   : > { %v5923_v54 = vsel %vm1379_vm14, %v5910_v45, %v5912_v52  ;;  %5977 = vmatprep.mubr.bf16.mxu0 %v7431_v0  ;;  %6850 = vmatprep.mubr.msk.bf16.mxu1 %vm7433_vm4, %v7432_v6  ;;  %v6369_v0 = vld [vmem:[%s9176_s6 + $0x10] sm:$0x3] }
 0x855   : > { %5948 = vmatpush1.bf16.msra.mxu0 %v5923_v54  ;;  %6847 = vmatpush3.bf16.msra.mxu1 %v5914_v53 }
 0x856   : > { %v5918_v55 = vpop.permute.xlu1 %5917  ;;  %v5920_v57 = vpop.permute.xlu0 %5919  ;;  %6848 = vmatprep.subr.bf16.mxu1 %v7432_v6 }
 0x857   : > { %v5925_v58 = vsel %vm1379_vm14, %v5916_v46, %v5918_v55  ;;  %v5926_v60 = vsel %vm1379_vm14, %v5918_v55, %v5920_v57  ;;  %v5943_v50 = vsel %vm518_vm6, %v5920_v57, 0 }
 0x858   : > { %v5937_v62 = vsel %vm518_vm6, %v5925_v58, 0  ;;  %6370 = vmatprep.subr.msk.bf16.mxu0 %vm518_vm6, %v5926_v60 }
 0x859   : > { %5950 = vmatpush1.bf16.msra.mxu0 %v5937_v62  ;;  %6849 = vmatpush3.bf16.msra.mxu1 %v5943_v50 }
 0x85c   : > { %6371 = vmatmul.mubr.msk.bf16.vlgmr.msra.gmra.mrb[16].mxu0 %vm4861_vm15, %v6369_v0  ;;  %6851 = vmatmul.mubr.msk.bf16.vlgmr.msra.gmra.mrb[16].mxu1 %vm4861_vm15, %v6369_v0 }
 0x867   : > { %v4767_v6 = vpop.permute.xlu1 %4766 }
 0x92f   : > { %v5979_v61 = vpop.f32.mrb[16].mxu0  ;;  %v6020_v27 = vpop.f32.mrb[16].mxu1 }
 0x930   : > { %v6866_v24 = vadd.f32 %v5979_v61, %v4767_v6  ;;  %v6868_v21 = vadd.f32 %v6020_v27, %v4767_v6  ;;  %v5981_v63 = vpop.f32.mrb[17].mxu0  ;;  %v6852_v2 = vpop.f32.mrb[17].mxu1 }
 0x931   : > { %v6867_v26 = vadd.f32 %v5981_v63, %v4767_v6  ;;  %v5983_v5 = vpop.f32.mrb[18].mxu0  ;;  %v6023_v18 = vpop.f32.mrb[18].mxu1 }
 0x932   : > { %v6029_v13 = vmul.f32 0.2, %v6866_v24  ;;  %v6031_v16 = vmul.f32 0.2, %v6868_v21  ;;  %v5984_v11 = vpop.f32.mrb[19].mxu0  ;;  %v6853_v14 = vpop.f32.mrb[19].mxu1 }
 0x933   : > { %v6030_v19 = vmul.f32 0.2, %v6867_v26 }
 0x934   : > { %v6032_v8 = vadd.f32 %v7291_v33, %v6029_v13  ;;  %v6034_v22 = vadd.f32 %v7292_v20, %v6031_v16 }
 0x935   : > { %v6033_v23 = vadd.f32 %v6030_v19, %v7682_v3 }
 0x936   : > { %6040 = vst.msk [vmem:[%s442_s19 + $0x8] sm:$0xf] %vm1520_vm2, %v6034_v22 }
 0x937   : > { %v6037_v44 = vcombine.low %v6032_v8, %v6033_v23 }
 0x939   : > { %6039 = vst [vmem:[%s442_s19] sm:$0xff] %v6037_v44 }
 0x93a   : > { %7370 = shalt.err (!%p7367_p10)
}
 0x93b   : > { %s7371_s1 = scalar_lea.hbm %s9126_s29, 192  ;;  %s7375_s17 = scalar_lea.hbm %s9182_s12, 384 }
 0x93c   : > { %p7372_p1 = scmp.ne.s32.totalorder %s9126_s29, %s7371_s1  ;;  %p7376_p3 = scmp.lt.u32.totalorder %s9126_s29, %s9182_s12 }
 0x93d   : > { %p7377_p0 = scmp.lt.u32.totalorder %s7375_s17, %s7371_s1  ;;  %p7379_p6 = scmp.lt.u32.totalorder %s7371_s1, %s9126_s29 }
 0x93e   : > { %p7373_p2 = pnand %p7372_p1, %p7600_p8 }
 0x93f   : > { %p7378_p4 = por %p7377_p0, %p7376_p3 }
 0x940   : > { %p7374_p7 = pneg %p7373_p2 }
 0x941   : > { %p7380_p9 = por %p7379_p6, %p7378_p4 }
 0x943   : > { %p7381_p12 = pnand %p7380_p9, %p7374_p7 }
 0x945   : > { %7384 = shalt.err (!%p7381_p12)
}
 0x946   : > { %7199 = dma.vmem_to_hbm [thread:$0]  (%p7600_p8), %s9128_s23, 192, %s9126_s29, %s6042_s25  }
 0x947 PF: > { %s9213_s19 = sld [smem:[#allocation12_spill]]  ;;  %s9214_s13 = sld [smem:[#allocation14_spill]] }
 0x948   : > { %p9216_p11 = scmp.ge.s32.totalorder %s7427_s24, 2 }
 0x94d   : > { %s6068_s27 = sand.u32 1, %s9213_s19   ;;  %p9215_p13 = scmp.ne.s32.totalorder %s9214_s13, 0 }
 0x94e   : > { %s6069_s30 = scalar_lea.sflag [#allocation5], %s6068_s27 }
 0x94f   : > { %p7210_p5 = pnand %p9216_p11, %p9215_p13 }
 0x951   : > { %7410 = dma.done.wait (!%p7210_p5), %s6069_s30, 192  }
 0x952   : > { %7412 = vsyncadd (!%p7210_p5), %s6069_s30, 4294967104  ;;  %s9217_s24 = sld [smem:[#allocation15_spill]]  ;;  %s9218_s16 = sld [smem:[#allocation13_spill]] }
 0x953   : > { %s9219_s23 = sld [smem:[#allocation16_spill]]  ;;  %s9220_s21 = smov %s7419_s22 }
 0x958   : > { %p26_p10 = scmp.ge.s32.totalorder %s9217_s24, 4   ;;  %s9221_s22 = smov %s9218_s16 }
 0x95a   :  { %28 = sbr.rel (!%p26_p10) target bundleno = 8 (0x8), region = 157 }
 0x961   :  { %6074 = vsyncpa [#allocation4], 1 }
 0x962   :  { %6076 = vsyncpa [#allocation4 + $0x1], 1 }
 0x963   :  { %6077 = vsyncpa [#allocation7], 1 }
 0x964   :  { %6078 = vsyncpa [#allocation5], 1 }
 0x965   :  { %6080 = vsyncpa [#allocation5 + $0x1], 1 }

</bundles_post_ra>
